<compile_context>
chip_gen: v7x
topology: tpu7x:2x2x1
jax: 0.10.0
libtpu: 0.0.40
codegen_flags: <defaults>
</compile_context>

<pallas_src>
import jax
import jax.numpy as jnp
from jax import lax
from jax.experimental import pallas as pl
from jax.experimental.pallas import tpu as pltpu


CONV_DTYPE = jnp.float32


def _round_up(x, m):
    return (x + m - 1) // m * m


# --------------------------- fused BN + ReLU + pad + 3x3x3 conv (+residual) ---------------------------

def _make_block_kernel(*, C, Cout, D, H, W, Wp, TD, add_residual, compute_sums):
    HWV = H * Wp            # flat lane-dense plane size (junk cols w >= W are zero)
    Hpad = H + 3            # 1 top zero row + H data rows + 2 bottom zero rows
    HpWp = Hpad * Wp
    Dp = D + 2              # zero plane front + D data planes + zero plane back

    def kernel(*refs):
        x_ref, s_ref, t_ref, w_ref, b_ref = refs[:5]
        idx = 5
        res_ref = refs[idx] if add_residual else None
        idx += 1 if add_residual else 0
        o_ref = refs[idx]
        idx += 1
        sum_ref = refs[idx] if compute_sums else None
        idx += 1 if compute_sums else 0
        vol_ref = refs[idx]

        f32 = jnp.float32

        # ---- BatchNorm + ReLU: one full-tile VPU pass over the whole sample (item #7) ----
        s = s_ref[...]                                   # (C, 1)
        t = t_ref[...]                                   # (C, 1)
        x = x_ref[...].astype(f32)                       # (C, D*H*Wp)
        col = lax.broadcasted_iota(jnp.int32, (1, D * HWV), 1) % Wp
        valid_in = col < W                               # lane mask: zero the junk columns
        a = jnp.where(valid_in, jnp.maximum(x * s + t, 0.0), 0.0)
        a = a.astype(vol_ref.dtype)

        # ---- scatter planes into the zero-padded (C, Dp*Hpad*Wp) VMEM volume ----
        # (VMEM scratch only: the padded activation never touches HBM -- review item #9)
        vol_ref[...] = jnp.zeros(vol_ref.shape, vol_ref.dtype)
        for d in range(D):
            dst = (d + 1) * HpWp + Wp + 1                # row 1, col 1 of padded plane d+1
            vol_ref[:, dst:dst + HWV] = a[:, d * HWV:(d + 1) * HWV]

        # ---- 3x3x3 conv: per depth chunk, 3 accumulating MXU matmuls (one per kd) ----
        w = w_ref[...]                                   # (Cout, 27*C), rows (kd,kh,kw,c)
        b = b_ref[...]                                   # (Cout, 1)
        chunk_valid = lax.broadcasted_iota(jnp.int32, (1, TD * HWV), 1) % Wp < W
        ch_sum = jnp.zeros((Cout, 1), f32)
        ch_sq = jnp.zeros((Cout, 1), f32)

        for d0 in range(0, D, TD):
            td = min(TD, D - d0)
            acc = jnp.zeros((Cout, td * HWV), f32)
            for kd in range(3):                          # kd-chunked im2col (item #3)
                rows = []
                for kh in range(3):
                    for kw in range(3):
                        off = kh * Wp + kw               # lane shift within a padded plane
                        cols = [vol_ref[:, (d0 + dd + kd) * HpWp + off:
                                           (d0 + dd + kd) * HpWp + off + HWV]
                                for dd in range(td)]
                        rows.append(cols[0] if td == 1 else jnp.concatenate(cols, axis=1))
                rhs = jnp.concatenate(rows, axis=0)      # (9*C, td*H*Wp)
                acc = acc + jnp.dot(w[:, kd * 9 * C:(kd + 1) * 9 * C], rhs,
                                    preferred_element_type=f32)
            acc = acc + b                                # bias once per chunk

            if compute_sums:
                # Zero junk columns so (a) the next block's padded volume stays correct and
                # (b) full-tile sums equal sums over valid positions only (item #10).
                acc = jnp.where(chunk_valid[:, :td * HWV], acc, 0.0)
                ch_sum = ch_sum + jnp.sum(acc, axis=1, keepdims=True)
                ch_sq = ch_sq + jnp.sum(acc * acc, axis=1, keepdims=True)

            if add_residual:
                # Residual fused full-tile against the Wp-strided residual (item #6).
                acc = acc + res_ref[:, d0 * HWV:(d0 + td) * HWV].astype(f32)

            # Single wide, lane-dense store per chunk (no masked W-wide store loop).
            o_ref[:, d0 * HWV:(d0 + td) * HWV] = acc.astype(o_ref.dtype)

        if compute_sums:
            sum_ref[:, 0:1] = ch_sum
            sum_ref[:, 1:2] = ch_sq

    return kernel


def conv3d_block(x_wp, scale, shift, wm, bias2d, residual=None, *,
                 D, H, W, Wp, compute_sums):
    # x_wp: (N, C, D*H*Wp) lane-dense, junk cols (w >= W) zero.
    # wm:   (Cout, 27*C)   folded 3x3x3 weights, row order (kd, kh, kw, c).
    N, C, DHWV = x_wp.shape
    Cout = wm.shape[0]
    HWV = H * Wp
    assert DHWV == D * HWV
    Hpad, Dp = H + 3, D + 2
    TD = min(D, 8)                     # depth chunk bounding the im2col buffer (items #1/#3)

    in_specs = [
        pl.BlockSpec((None, C, DHWV), lambda n: (n, 0, 0)),
        pl.BlockSpec((C, 1), lambda n: (0, 0)),
        pl.BlockSpec((C, 1), lambda n: (0, 0)),
        pl.BlockSpec((Cout, 27 * C), lambda n: (0, 0)),
        pl.BlockSpec((Cout, 1), lambda n: (0, 0)),
    ]
    args = [x_wp, scale, shift, wm, bias2d]
    if residual is not None:
        in_specs.append(pl.BlockSpec((None, Cout, DHWV), lambda n: (n, 0, 0)))
        args.append(residual)

    if compute_sums:
        out_shape = (jax.ShapeDtypeStruct((N, Cout, DHWV), CONV_DTYPE),
                     jax.ShapeDtypeStruct((N, Cout, 2), jnp.float32))
        out_specs = (pl.BlockSpec((None, Cout, DHWV), lambda n: (n, 0, 0)),
                     pl.BlockSpec((None, Cout, 2), lambda n: (n, 0, 0)))
    else:
        out_shape = jax.ShapeDtypeStruct((N, Cout, DHWV), CONV_DTYPE)
        out_specs = pl.BlockSpec((None, Cout, DHWV), lambda n: (n, 0, 0))

    kernel = _make_block_kernel(C=C, Cout=Cout, D=D, H=H, W=W, Wp=Wp, TD=TD,
                                add_residual=residual is not None,
                                compute_sums=compute_sums)
    return pl.pallas_call(
        kernel,
        out_shape=out_shape,
        grid=(N,),
        in_specs=in_specs,
        out_specs=out_specs,
        scratch_shapes=[pltpu.VMEM((C, Dp * Hpad * Wp), CONV_DTYPE)],
        compiler_params=pltpu.CompilerParams(
            dimension_semantics=("parallel",),          # v7x: 2 TCs shard on N
            vmem_limit_bytes=48 * 1024 * 1024),         # v7x-safe budget; covers v5e default
    )(*args)


# --------------------------- ResConv3D forward ---------------------------

def res_conv3d(x, p, eps=1e-5):
    # x: (N, C, D, H, W)  == PyTorch NCDHW
    N, C, D, H, W = x.shape
    Cmid = p["w1"].shape[-1]
    Cout = p["w2"].shape[-1]
    assert Cout == C, "residual add requires out_dim == in_dim"
    Wp = _round_up(W + 2, 8)
    HWV = H * Wp
    cnt = N * D * H * W

    # Lane-pad rows W -> Wp once in the wrapper (zeros) -> (N, C, D*H*Wp) plane-flat layout.
    x_wp = jnp.pad(x, ((0, 0), (0, 0), (0, 0), (0, 0), (0, Wp - W))) \
              .reshape(N, C, D * HWV).astype(CONV_DTYPE)

    # ---- block-1 BatchNorm stats over x (training mode, biased variance; f32 one-pass) ----
    xs = jnp.sum(x, axis=(0, 2, 3, 4), dtype=jnp.float32)
    xq = jnp.sum(x.astype(jnp.float32) ** 2, axis=(0, 2, 3, 4))
    mean1 = xs / cnt
    var1 = xq / cnt - mean1 * mean1
    inv1 = p["g1"] / jnp.sqrt(var1 + eps)
    scale1 = inv1.reshape(C, 1).astype(jnp.float32)
    shift1 = (p["be1"] - mean1 * inv1).reshape(C, 1).astype(jnp.float32)

    wm1 = jnp.transpose(p["w1"].reshape(27 * C, Cmid)).astype(CONV_DTYPE)
    b1 = p["b1"].reshape(Cmid, 1).astype(jnp.float32)

    y1, sums1 = conv3d_block(x_wp, scale1, shift1, wm1, b1, residual=None,
                             D=D, H=H, W=W, Wp=Wp, compute_sums=True)

    # ---- block-2 BN stats straight from block-1's in-kernel channel sums (no y1 re-read) ----
    tot = jnp.sum(sums1, axis=0)                       # (Cmid, 2): [sum, sum_sq]
    mean2 = tot[:, 0] / cnt
    var2 = tot[:, 1] / cnt - mean2 * mean2
    inv2 = p["g2"] / jnp.sqrt(var2 + eps)
    scale2 = inv2.reshape(Cmid, 1).astype(jnp.float32)
    shift2 = (p["be2"] - mean2 * inv2).reshape(Cmid, 1).astype(jnp.float32)

    wm2 = jnp.transpose(p["w2"].reshape(27 * Cmid, Cout)).astype(CONV_DTYPE)
    b2 = p["b2"].reshape(Cout, 1).astype(jnp.float32)

    y2 = conv3d_block(y1, scale2, shift2, wm2, b2, residual=x_wp,
                      D=D, H=H, W=W, Wp=Wp, compute_sums=False)

    # One XLA strip of the padded lanes at the very end (all kernel stores stayed lane-dense).
    return y2.reshape(N, C, D, H, Wp)[..., :W]


# --------------------------- pure-JAX reference ---------------------------

def ref_forward(x, p, eps=1e-5):
    v = jnp.transpose(x, (0, 2, 3, 4, 1))              # NCDHW -> NDHWC

    def bn_relu(u, g, b):
        m = u.mean(axis=(0, 1, 2, 3), keepdims=True)
        va = ((u - m) ** 2).mean(axis=(0, 1, 2, 3), keepdims=True)
        return jax.nn.relu((u - m) / jnp.sqrt(va + eps) * g + b)

    def conv(u, w, b):
        return lax.conv_general_dilated(
            u, w, window_strides=(1, 1, 1), padding=((1, 1), (1, 1), (1, 1)),
            dimension_numbers=("NDHWC", "DHWIO", "NDHWC")) + b

    y1 = conv(bn_relu(v, p["g1"], p["be1"]), p["w1"], p["b1"])
    y2 = conv(bn_relu(y1, p["g2"], p["be2"]), p["w2"], p["b2"])
    return jnp.transpose(v + y2, (0, 4, 1, 2, 3))      # back to NCDHW


# --------------------------- main ---------------------------

if __name__ == "__main__":
    N, C, D, H, W = 2, 8, 4, 8, 8      # NCDHW; in_dim == out_dim == 8 (required by residual)
    key = jax.random.PRNGKey(0)
    kx, kw1, kb1, kw2, kb2, kg1, kbe1, kg2, kbe2 = jax.random.split(key, 9)

    x = jax.random.normal(kx, (N, C, D, H, W), jnp.float32)

    fan_in = 27 * C
    params = dict(
        w1=jax.random.normal(kw1, (3, 3, 3, C, C), jnp.float32) / jnp.sqrt(fan_in),
        b1=0.1 * jax.random.normal(kb1, (C,), jnp.float32),
        w2=jax.random.normal(kw2, (3, 3, 3, C, C), jnp.float32) / jnp.sqrt(fan_in),
        b2=0.1 * jax.random.normal(kb2, (C,), jnp.float32),
        g1=1.0 + 0.1 * jax.random.normal(kg1, (C,), jnp.float32),
        be1=0.1 * jax.random.normal(kbe1, (C,), jnp.float32),
        g2=1.0 + 0.1 * jax.random.normal(kg2, (C,), jnp.float32),
        be2=0.1 * jax.random.normal(kbe2, (C,), jnp.float32),
    )

    out = jax.block_until_ready(jax.jit(res_conv3d)(x, params))
    ref = jax.block_until_ready(ref_forward(x, params))

    assert out.shape == x.shape, (out.shape, x.shape)
    max_err = float(jnp.max(jnp.abs(out - ref)))
    assert max_err < 1e-3, f"max abs err {max_err}"
    print("KERNEL_OK")
</pallas_src>

<mosaic_0001>
module attributes {stable_mosaic.version = 11 : i64} {
  func.func @kernel(%arg0: i32, %arg1: memref<1x8x512xf32, #tpu.memory_space<vmem>>, %arg2: memref<8x1xf32, #tpu.memory_space<vmem>>, %arg3: memref<8x1xf32, #tpu.memory_space<vmem>>, %arg4: memref<8x216xf32, #tpu.memory_space<vmem>>, %arg5: memref<8x1xf32, #tpu.memory_space<vmem>>, %arg6: memref<1x8x512xf32, #tpu.memory_space<vmem>>, %arg7: memref<1x8x2xf32, #tpu.memory_space<vmem>>, %arg8: memref<8x1056xf32, #tpu.memory_space<vmem>>) attributes {dimension_semantics = [#tpu.dimension_semantics<parallel>], iteration_bounds = array<i64: 2>, scalar_prefetch = 0 : i64, scratch_operands = 1 : i64, tpu.core_type = #tpu.core_type<tc>, window_params = [{transform_indices = @transform_0, window_bounds = array<i64: 1, 8, 512>}, {pipeline_mode = #tpu.pipeline_mode<synchronous>, transform_indices = @transform_1, window_bounds = array<i64: 8, 1>}, {pipeline_mode = #tpu.pipeline_mode<synchronous>, transform_indices = @transform_2, window_bounds = array<i64: 8, 1>}, {pipeline_mode = #tpu.pipeline_mode<synchronous>, transform_indices = @transform_3, window_bounds = array<i64: 8, 216>}, {pipeline_mode = #tpu.pipeline_mode<synchronous>, transform_indices = @transform_4, window_bounds = array<i64: 8, 1>}, {transform_indices = @transform_5, window_bounds = array<i64: 1, 8, 512>}, {transform_indices = @transform_6, window_bounds = array<i64: 1, 8, 2>}]} {
    %c0 = arith.constant 0 : index
    %c0_0 = arith.constant 0 : index
    %0 = vector.load %arg2[%c0, %c0_0] : memref<8x1xf32, #tpu.memory_space<vmem>>, vector<8x1xf32>
    %c0_1 = arith.constant 0 : index
    %c0_2 = arith.constant 0 : index
    %1 = vector.load %arg3[%c0_1, %c0_2] : memref<8x1xf32, #tpu.memory_space<vmem>>, vector<8x1xf32>
    %c0_3 = arith.constant 0 : index
    %c0_4 = arith.constant 0 : index
    %c0_5 = arith.constant 0 : index
    %2 = vector.load %arg1[%c0_3, %c0_4, %c0_5] : memref<1x8x512xf32, #tpu.memory_space<vmem>>, vector<1x8x512xf32>
    %3 = vector.shape_cast %2 : vector<1x8x512xf32> to vector<8x512xf32>
    %4 = tpu.iota {dimensions = array<i32: 1>} : vector<1x512xi32>
    %c16_i32 = arith.constant 16 : i32
    %c0_i32 = arith.constant 0 : i32
    %5 = arith.cmpi eq, %c16_i32, %c0_i32 : i32
    %c1_i32 = arith.constant 1 : i32
    %6 = arith.select %5, %c1_i32, %c16_i32 : i32
    %7 = vector.broadcast %6 : i32 to vector<1x512xi32>
    %8 = arith.remsi %4, %7 : vector<1x512xi32>
    %c0_i32_6 = arith.constant 0 : i32
    %9 = vector.broadcast %c0_i32_6 : i32 to vector<1x512xi32>
    %10 = arith.cmpi ne, %8, %9 : vector<1x512xi32>
    %c0_i32_7 = arith.constant 0 : i32
    %11 = vector.broadcast %c0_i32_7 : i32 to vector<1x512xi32>
    %12 = arith.cmpi slt, %8, %11 : vector<1x512xi32>
    %c0_i32_8 = arith.constant 0 : i32
    %13 = arith.cmpi slt, %6, %c0_i32_8 : i32
    %14 = vector.broadcast %13 : i1 to vector<1x512xi1>
    %15 = vector.broadcast %14 : vector<1x512xi1> to vector<1x512xi1>
    %16 = arith.xori %12, %15 : vector<1x512xi1>
    %17 = arith.andi %16, %10 : vector<1x512xi1>
    %18 = vector.broadcast %6 : i32 to vector<1x512xi32>
    %19 = arith.addi %8, %18 : vector<1x512xi32>
    %20 = arith.select %17, %19, %8 : vector<1x512xi1>, vector<1x512xi32>
    %c8_i32 = arith.constant 8 : i32
    %21 = vector.broadcast %c8_i32 : i32 to vector<1x512xi32>
    %22 = arith.cmpi slt, %20, %21 : vector<1x512xi32>
    %23 = vector.broadcast %0 : vector<8x1xf32> to vector<8x512xf32>
    %24 = arith.mulf %3, %23 : vector<8x512xf32>
    %25 = vector.broadcast %1 : vector<8x1xf32> to vector<8x512xf32>
    %26 = arith.addf %24, %25 : vector<8x512xf32>
    %cst = arith.constant 0.000000e+00 : f32
    %27 = vector.broadcast %cst : f32 to vector<8x512xf32>
    %28 = arith.maximumf %26, %27 : vector<8x512xf32>
    %cst_9 = arith.constant 0.000000e+00 : f32
    %29 = vector.shape_cast %22 : vector<1x512xi1> to vector<1x512xi1>
    %30 = vector.broadcast %29 : vector<1x512xi1> to vector<8x512xi1>
    %31 = vector.broadcast %cst_9 : f32 to vector<8x512xf32>
    %32 = arith.select %30, %28, %31 : vector<8x512xi1>, vector<8x512xf32>
    %cst_10 = arith.constant 0.000000e+00 : f32
    %33 = vector.broadcast %cst_10 : f32 to vector<8x1056xf32>
    %c0_11 = arith.constant 0 : index
    %c0_12 = arith.constant 0 : index
    %34 = vector.load %arg8[%c0_11, %c0_12] : memref<8x1056xf32, #tpu.memory_space<vmem>>, vector<8x1056xf32>
    tpu.vector_store %arg8[%c0_11, %c0_12], %33 {strides = array<i32>} : memref<8x1056xf32, #tpu.memory_space<vmem>>, vector<8x1056xf32>,
    %35 = vector.extract_strided_slice %32 {offsets = [0, 0], sizes = [8, 128], strides = [1, 1]} : vector<8x512xf32> to vector<8x128xf32>
    %c0_13 = arith.constant 0 : index
    %c193 = arith.constant 193 : index
    %36 = vector.load %arg8[%c0_13, %c193] : memref<8x1056xf32, #tpu.memory_space<vmem>>, vector<8x128xf32>
    tpu.vector_store %arg8[%c0_13, %c193], %35 {strides = array<i32>} : memref<8x1056xf32, #tpu.memory_space<vmem>>, vector<8x128xf32>,
    %37 = vector.extract_strided_slice %32 {offsets = [0, 128], sizes = [8, 128], strides = [1, 1]} : vector<8x512xf32> to vector<8x128xf32>
    %c0_14 = arith.constant 0 : index
    %c369 = arith.constant 369 : index
    %38 = vector.load %arg8[%c0_14, %c369] : memref<8x1056xf32, #tpu.memory_space<vmem>>, vector<8x128xf32>
    tpu.vector_store %arg8[%c0_14, %c369], %37 {strides = array<i32>} : memref<8x1056xf32, #tpu.memory_space<vmem>>, vector<8x128xf32>,
    %39 = vector.extract_strided_slice %32 {offsets = [0, 256], sizes = [8, 128], strides = [1, 1]} : vector<8x512xf32> to vector<8x128xf32>
    %c0_15 = arith.constant 0 : index
    %c545 = arith.constant 545 : index
    %40 = vector.load %arg8[%c0_15, %c545] : memref<8x1056xf32, #tpu.memory_space<vmem>>, vector<8x128xf32>
    tpu.vector_store %arg8[%c0_15, %c545], %39 {strides = array<i32>} : memref<8x1056xf32, #tpu.memory_space<vmem>>, vector<8x128xf32>,
    %41 = vector.extract_strided_slice %32 {offsets = [0, 384], sizes = [8, 128], strides = [1, 1]} : vector<8x512xf32> to vector<8x128xf32>
    %c0_16 = arith.constant 0 : index
    %c721 = arith.constant 721 : index
    %42 = vector.load %arg8[%c0_16, %c721] : memref<8x1056xf32, #tpu.memory_space<vmem>>, vector<8x128xf32>
    tpu.vector_store %arg8[%c0_16, %c721], %41 {strides = array<i32>} : memref<8x1056xf32, #tpu.memory_space<vmem>>, vector<8x128xf32>,
    %c0_17 = arith.constant 0 : index
    %c0_18 = arith.constant 0 : index
    %43 = vector.load %arg4[%c0_17, %c0_18] : memref<8x216xf32, #tpu.memory_space<vmem>>, vector<8x216xf32>
    %c0_19 = arith.constant 0 : index
    %c0_20 = arith.constant 0 : index
    %44 = vector.load %arg5[%c0_19, %c0_20] : memref<8x1xf32, #tpu.memory_space<vmem>>, vector<8x1xf32>
    %45 = tpu.iota {dimensions = array<i32: 1>} : vector<1x512xi32>
    %c16_i32_21 = arith.constant 16 : i32
    %c0_i32_22 = arith.constant 0 : i32
    %46 = arith.cmpi eq, %c16_i32_21, %c0_i32_22 : i32
    %c1_i32_23 = arith.constant 1 : i32
    %47 = arith.select %46, %c1_i32_23, %c16_i32_21 : i32
    %48 = vector.broadcast %47 : i32 to vector<1x512xi32>
    %49 = arith.remsi %45, %48 : vector<1x512xi32>
    %c0_i32_24 = arith.constant 0 : i32
    %50 = vector.broadcast %c0_i32_24 : i32 to vector<1x512xi32>
    %51 = arith.cmpi ne, %49, %50 : vector<1x512xi32>
    %c0_i32_25 = arith.constant 0 : i32
    %52 = vector.broadcast %c0_i32_25 : i32 to vector<1x512xi32>
    %53 = arith.cmpi slt, %49, %52 : vector<1x512xi32>
    %c0_i32_26 = arith.constant 0 : i32
    %54 = arith.cmpi slt, %47, %c0_i32_26 : i32
    %55 = vector.broadcast %54 : i1 to vector<1x512xi1>
    %56 = vector.broadcast %55 : vector<1x512xi1> to vector<1x512xi1>
    %57 = arith.xori %53, %56 : vector<1x512xi1>
    %58 = arith.andi %57, %51 : vector<1x512xi1>
    %59 = vector.broadcast %47 : i32 to vector<1x512xi32>
    %60 = arith.addi %49, %59 : vector<1x512xi32>
    %61 = arith.select %58, %60, %49 : vector<1x512xi1>, vector<1x512xi32>
    %c8_i32_27 = arith.constant 8 : i32
    %62 = vector.broadcast %c8_i32_27 : i32 to vector<1x512xi32>
    %63 = arith.cmpi slt, %61, %62 : vector<1x512xi32>
    %cst_28 = arith.constant 0.000000e+00 : f32
    %64 = vector.broadcast %cst_28 : f32 to vector<8x1xf32>
    %cst_29 = arith.constant 0.000000e+00 : f32
    %65 = vector.broadcast %cst_29 : f32 to vector<8x1xf32>
    %cst_30 = arith.constant 0.000000e+00 : f32
    %66 = vector.broadcast %cst_30 : f32 to vector<8x512xf32>
    %c0_31 = arith.constant 0 : index
    %c0_32 = arith.constant 0 : index
    %67 = vector.load %arg8[%c0_31, %c0_32] : memref<8x1056xf32, #tpu.memory_space<vmem>>, vector<8x128xf32>
    %c0_33 = arith.constant 0 : index
    %c176 = arith.constant 176 : index
    %68 = vector.load %arg8[%c0_33, %c176] : memref<8x1056xf32, #tpu.memory_space<vmem>>, vector<8x128xf32>
    %c0_34 = arith.constant 0 : index
    %c352 = arith.constant 352 : index
    %69 = vector.load %arg8[%c0_34, %c352] : memref<8x1056xf32, #tpu.memory_space<vmem>>, vector<8x128xf32>
    %c0_35 = arith.constant 0 : index
    %c528 = arith.constant 528 : index
    %70 = vector.load %arg8[%c0_35, %c528] : memref<8x1056xf32, #tpu.memory_space<vmem>>, vector<8x128xf32>
    %71 = tpu.concatenate %67, %68, %69, %70 in 1 : vector<8x128xf32>, vector<8x128xf32>, vector<8x128xf32>, vector<8x128xf32> -> vector<8x512xf32>
    %c0_36 = arith.constant 0 : index
    %c1 = arith.constant 1 : index
    %72 = vector.load %arg8[%c0_36, %c1] : memref<8x1056xf32, #tpu.memory_space<vmem>>, vector<8x128xf32>
    %c0_37 = arith.constant 0 : index
    %c177 = arith.constant 177 : index
    %73 = vector.load %arg8[%c0_37, %c177] : memref<8x1056xf32, #tpu.memory_space<vmem>>, vector<8x128xf32>
    %c0_38 = arith.constant 0 : index
    %c353 = arith.constant 353 : index
    %74 = vector.load %arg8[%c0_38, %c353] : memref<8x1056xf32, #tpu.memory_space<vmem>>, vector<8x128xf32>
    %c0_39 = arith.constant 0 : index
    %c529 = arith.constant 529 : index
    %75 = vector.load %arg8[%c0_39, %c529] : memref<8x1056xf32, #tpu.memory_space<vmem>>, vector<8x128xf32>
    %76 = tpu.concatenate %72, %73, %74, %75 in 1 : vector<8x128xf32>, vector<8x128xf32>, vector<8x128xf32>, vector<8x128xf32> -> vector<8x512xf32>
    %c0_40 = arith.constant 0 : index
    %c2 = arith.constant 2 : index
    %77 = vector.load %arg8[%c0_40, %c2] : memref<8x1056xf32, #tpu.memory_space<vmem>>, vector<8x128xf32>
    %c0_41 = arith.constant 0 : index
    %c178 = arith.constant 178 : index
    %78 = vector.load %arg8[%c0_41, %c178] : memref<8x1056xf32, #tpu.memory_space<vmem>>, vector<8x128xf32>
    %c0_42 = arith.constant 0 : index
    %c354 = arith.constant 354 : index
    %79 = vector.load %arg8[%c0_42, %c354] : memref<8x1056xf32, #tpu.memory_space<vmem>>, vector<8x128xf32>
    %c0_43 = arith.constant 0 : index
    %c530 = arith.constant 530 : index
    %80 = vector.load %arg8[%c0_43, %c530] : memref<8x1056xf32, #tpu.memory_space<vmem>>, vector<8x128xf32>
    %81 = tpu.concatenate %77, %78, %79, %80 in 1 : vector<8x128xf32>, vector<8x128xf32>, vector<8x128xf32>, vector<8x128xf32> -> vector<8x512xf32>
    %c0_44 = arith.constant 0 : index
    %c16 = arith.constant 16 : index
    %82 = vector.load %arg8[%c0_44, %c16] : memref<8x1056xf32, #tpu.memory_space<vmem>>, vector<8x128xf32>
    %c0_45 = arith.constant 0 : index
    %c192 = arith.constant 192 : index
    %83 = vector.load %arg8[%c0_45, %c192] : memref<8x1056xf32, #tpu.memory_space<vmem>>, vector<8x128xf32>
    %c0_46 = arith.constant 0 : index
    %c368 = arith.constant 368 : index
    %84 = vector.load %arg8[%c0_46, %c368] : memref<8x1056xf32, #tpu.memory_space<vmem>>, vector<8x128xf32>
    %c0_47 = arith.constant 0 : index
    %c544 = arith.constant 544 : index
    %85 = vector.load %arg8[%c0_47, %c544] : memref<8x1056xf32, #tpu.memory_space<vmem>>, vector<8x128xf32>
    %86 = tpu.concatenate %82, %83, %84, %85 in 1 : vector<8x128xf32>, vector<8x128xf32>, vector<8x128xf32>, vector<8x128xf32> -> vector<8x512xf32>
    %c0_48 = arith.constant 0 : index
    %c17 = arith.constant 17 : index
    %87 = vector.load %arg8[%c0_48, %c17] : memref<8x1056xf32, #tpu.memory_space<vmem>>, vector<8x128xf32>
    %c0_49 = arith.constant 0 : index
    %c193_50 = arith.constant 193 : index
    %88 = vector.load %arg8[%c0_49, %c193_50] : memref<8x1056xf32, #tpu.memory_space<vmem>>, vector<8x128xf32>
    %c0_51 = arith.constant 0 : index
    %c369_52 = arith.constant 369 : index
    %89 = vector.load %arg8[%c0_51, %c369_52] : memref<8x1056xf32, #tpu.memory_space<vmem>>, vector<8x128xf32>
    %c0_53 = arith.constant 0 : index
    %c545_54 = arith.constant 545 : index
    %90 = vector.load %arg8[%c0_53, %c545_54] : memref<8x1056xf32, #tpu.memory_space<vmem>>, vector<8x128xf32>
    %91 = tpu.concatenate %87, %88, %89, %90 in 1 : vector<8x128xf32>, vector<8x128xf32>, vector<8x128xf32>, vector<8x128xf32> -> vector<8x512xf32>
    %c0_55 = arith.constant 0 : index
    %c18 = arith.constant 18 : index
    %92 = vector.load %arg8[%c0_55, %c18] : memref<8x1056xf32, #tpu.memory_space<vmem>>, vector<8x128xf32>
    %c0_56 = arith.constant 0 : index
    %c194 = arith.constant 194 : index
    %93 = vector.load %arg8[%c0_56, %c194] : memref<8x1056xf32, #tpu.memory_space<vmem>>, vector<8x128xf32>
    %c0_57 = arith.constant 0 : index
    %c370 = arith.constant 370 : index
    %94 = vector.load %arg8[%c0_57, %c370] : memref<8x1056xf32, #tpu.memory_space<vmem>>, vector<8x128xf32>
    %c0_58 = arith.constant 0 : index
    %c546 = arith.constant 546 : index
    %95 = vector.load %arg8[%c0_58, %c546] : memref<8x1056xf32, #tpu.memory_space<vmem>>, vector<8x128xf32>
    %96 = tpu.concatenate %92, %93, %94, %95 in 1 : vector<8x128xf32>, vector<8x128xf32>, vector<8x128xf32>, vector<8x128xf32> -> vector<8x512xf32>
    %c0_59 = arith.constant 0 : index
    %c32 = arith.constant 32 : index
    %97 = vector.load %arg8[%c0_59, %c32] : memref<8x1056xf32, #tpu.memory_space<vmem>>, vector<8x128xf32>
    %c0_60 = arith.constant 0 : index
    %c208 = arith.constant 208 : index
    %98 = vector.load %arg8[%c0_60, %c208] : memref<8x1056xf32, #tpu.memory_space<vmem>>, vector<8x128xf32>
    %c0_61 = arith.constant 0 : index
    %c384 = arith.constant 384 : index
    %99 = vector.load %arg8[%c0_61, %c384] : memref<8x1056xf32, #tpu.memory_space<vmem>>, vector<8x128xf32>
    %c0_62 = arith.constant 0 : index
    %c560 = arith.constant 560 : index
    %100 = vector.load %arg8[%c0_62, %c560] : memref<8x1056xf32, #tpu.memory_space<vmem>>, vector<8x128xf32>
    %101 = tpu.concatenate %97, %98, %99, %100 in 1 : vector<8x128xf32>, vector<8x128xf32>, vector<8x128xf32>, vector<8x128xf32> -> vector<8x512xf32>
    %c0_63 = arith.constant 0 : index
    %c33 = arith.constant 33 : index
    %102 = vector.load %arg8[%c0_63, %c33] : memref<8x1056xf32, #tpu.memory_space<vmem>>, vector<8x128xf32>
    %c0_64 = arith.constant 0 : index
    %c209 = arith.constant 209 : index
    %103 = vector.load %arg8[%c0_64, %c209] : memref<8x1056xf32, #tpu.memory_space<vmem>>, vector<8x128xf32>
    %c0_65 = arith.constant 0 : index
    %c385 = arith.constant 385 : index
    %104 = vector.load %arg8[%c0_65, %c385] : memref<8x1056xf32, #tpu.memory_space<vmem>>, vector<8x128xf32>
    %c0_66 = arith.constant 0 : index
    %c561 = arith.constant 561 : index
    %105 = vector.load %arg8[%c0_66, %c561] : memref<8x1056xf32, #tpu.memory_space<vmem>>, vector<8x128xf32>
    %106 = tpu.concatenate %102, %103, %104, %105 in 1 : vector<8x128xf32>, vector<8x128xf32>, vector<8x128xf32>, vector<8x128xf32> -> vector<8x512xf32>
    %c0_67 = arith.constant 0 : index
    %c34 = arith.constant 34 : index
    %107 = vector.load %arg8[%c0_67, %c34] : memref<8x1056xf32, #tpu.memory_space<vmem>>, vector<8x128xf32>
    %c0_68 = arith.constant 0 : index
    %c210 = arith.constant 210 : index
    %108 = vector.load %arg8[%c0_68, %c210] : memref<8x1056xf32, #tpu.memory_space<vmem>>, vector<8x128xf32>
    %c0_69 = arith.constant 0 : index
    %c386 = arith.constant 386 : index
    %109 = vector.load %arg8[%c0_69, %c386] : memref<8x1056xf32, #tpu.memory_space<vmem>>, vector<8x128xf32>
    %c0_70 = arith.constant 0 : index
    %c562 = arith.constant 562 : index
    %110 = vector.load %arg8[%c0_70, %c562] : memref<8x1056xf32, #tpu.memory_space<vmem>>, vector<8x128xf32>
    %111 = tpu.concatenate %107, %108, %109, %110 in 1 : vector<8x128xf32>, vector<8x128xf32>, vector<8x128xf32>, vector<8x128xf32> -> vector<8x512xf32>
    %112 = tpu.concatenate %71, %76, %81, %86, %91, %96, %101, %106, %111 in 0 : vector<8x512xf32>, vector<8x512xf32>, vector<8x512xf32>, vector<8x512xf32>, vector<8x512xf32>, vector<8x512xf32>, vector<8x512xf32>, vector<8x512xf32>, vector<8x512xf32> -> vector<72x512xf32>
    %113 = vector.extract_strided_slice %43 {offsets = [0, 0], sizes = [8, 72], strides = [1, 1]} : vector<8x216xf32> to vector<8x72xf32>
    %cst_71 = arith.constant dense<0.000000e+00> : vector<8x512xf32>
    %114 = tpu.matmul %113, %112, %cst_71 {dimension_numbers = #tpu.dot_dimension_numbers<[1], [0], [0], [1], [0, 0, 1, 1], [], []>} : vector<8x72xf32>, vector<72x512xf32>, vector<8x512xf32> -> vector<8x512xf32>
    %115 = arith.addf %66, %114 : vector<8x512xf32>
    %c0_72 = arith.constant 0 : index
    %c176_73 = arith.constant 176 : index
    %116 = vector.load %arg8[%c0_72, %c176_73] : memref<8x1056xf32, #tpu.memory_space<vmem>>, vector<8x128xf32>
    %c0_74 = arith.constant 0 : index
    %c352_75 = arith.constant 352 : index
    %117 = vector.load %arg8[%c0_74, %c352_75] : memref<8x1056xf32, #tpu.memory_space<vmem>>, vector<8x128xf32>
    %c0_76 = arith.constant 0 : index
    %c528_77 = arith.constant 528 : index
    %118 = vector.load %arg8[%c0_76, %c528_77] : memref<8x1056xf32, #tpu.memory_space<vmem>>, vector<8x128xf32>
    %c0_78 = arith.constant 0 : index
    %c704 = arith.constant 704 : index
    %119 = vector.load %arg8[%c0_78, %c704] : memref<8x1056xf32, #tpu.memory_space<vmem>>, vector<8x128xf32>
    %120 = tpu.concatenate %116, %117, %118, %119 in 1 : vector<8x128xf32>, vector<8x128xf32>, vector<8x128xf32>, vector<8x128xf32> -> vector<8x512xf32>
    %c0_79 = arith.constant 0 : index
    %c177_80 = arith.constant 177 : index
    %121 = vector.load %arg8[%c0_79, %c177_80] : memref<8x1056xf32, #tpu.memory_space<vmem>>, vector<8x128xf32>
    %c0_81 = arith.constant 0 : index
    %c353_82 = arith.constant 353 : index
    %122 = vector.load %arg8[%c0_81, %c353_82] : memref<8x1056xf32, #tpu.memory_space<vmem>>, vector<8x128xf32>
    %c0_83 = arith.constant 0 : index
    %c529_84 = arith.constant 529 : index
    %123 = vector.load %arg8[%c0_83, %c529_84] : memref<8x1056xf32, #tpu.memory_space<vmem>>, vector<8x128xf32>
    %c0_85 = arith.constant 0 : index
    %c705 = arith.constant 705 : index
    %124 = vector.load %arg8[%c0_85, %c705] : memref<8x1056xf32, #tpu.memory_space<vmem>>, vector<8x128xf32>
    %125 = tpu.concatenate %121, %122, %123, %124 in 1 : vector<8x128xf32>, vector<8x128xf32>, vector<8x128xf32>, vector<8x128xf32> -> vector<8x512xf32>
    %c0_86 = arith.constant 0 : index
    %c178_87 = arith.constant 178 : index
    %126 = vector.load %arg8[%c0_86, %c178_87] : memref<8x1056xf32, #tpu.memory_space<vmem>>, vector<8x128xf32>
    %c0_88 = arith.constant 0 : index
    %c354_89 = arith.constant 354 : index
    %127 = vector.load %arg8[%c0_88, %c354_89] : memref<8x1056xf32, #tpu.memory_space<vmem>>, vector<8x128xf32>
    %c0_90 = arith.constant 0 : index
    %c530_91 = arith.constant 530 : index
    %128 = vector.load %arg8[%c0_90, %c530_91] : memref<8x1056xf32, #tpu.memory_space<vmem>>, vector<8x128xf32>
    %c0_92 = arith.constant 0 : index
    %c706 = arith.constant 706 : index
    %129 = vector.load %arg8[%c0_92, %c706] : memref<8x1056xf32, #tpu.memory_space<vmem>>, vector<8x128xf32>
    %130 = tpu.concatenate %126, %127, %128, %129 in 1 : vector<8x128xf32>, vector<8x128xf32>, vector<8x128xf32>, vector<8x128xf32> -> vector<8x512xf32>
    %c0_93 = arith.constant 0 : index
    %c192_94 = arith.constant 192 : index
    %131 = vector.load %arg8[%c0_93, %c192_94] : memref<8x1056xf32, #tpu.memory_space<vmem>>, vector<8x128xf32>
    %c0_95 = arith.constant 0 : index
    %c368_96 = arith.constant 368 : index
    %132 = vector.load %arg8[%c0_95, %c368_96] : memref<8x1056xf32, #tpu.memory_space<vmem>>, vector<8x128xf32>
    %c0_97 = arith.constant 0 : index
    %c544_98 = arith.constant 544 : index
    %133 = vector.load %arg8[%c0_97, %c544_98] : memref<8x1056xf32, #tpu.memory_space<vmem>>, vector<8x128xf32>
    %c0_99 = arith.constant 0 : index
    %c720 = arith.constant 720 : index
    %134 = vector.load %arg8[%c0_99, %c720] : memref<8x1056xf32, #tpu.memory_space<vmem>>, vector<8x128xf32>
    %135 = tpu.concatenate %131, %132, %133, %134 in 1 : vector<8x128xf32>, vector<8x128xf32>, vector<8x128xf32>, vector<8x128xf32> -> vector<8x512xf32>
    %c0_100 = arith.constant 0 : index
    %c193_101 = arith.constant 193 : index
    %136 = vector.load %arg8[%c0_100, %c193_101] : memref<8x1056xf32, #tpu.memory_space<vmem>>, vector<8x128xf32>
    %c0_102 = arith.constant 0 : index
    %c369_103 = arith.constant 369 : index
    %137 = vector.load %arg8[%c0_102, %c369_103] : memref<8x1056xf32, #tpu.memory_space<vmem>>, vector<8x128xf32>
    %c0_104 = arith.constant 0 : index
    %c545_105 = arith.constant 545 : index
    %138 = vector.load %arg8[%c0_104, %c545_105] : memref<8x1056xf32, #tpu.memory_space<vmem>>, vector<8x128xf32>
    %c0_106 = arith.constant 0 : index
    %c721_107 = arith.constant 721 : index
    %139 = vector.load %arg8[%c0_106, %c721_107] : memref<8x1056xf32, #tpu.memory_space<vmem>>, vector<8x128xf32>
    %140 = tpu.concatenate %136, %137, %138, %139 in 1 : vector<8x128xf32>, vector<8x128xf32>, vector<8x128xf32>, vector<8x128xf32> -> vector<8x512xf32>
    %c0_108 = arith.constant 0 : index
    %c194_109 = arith.constant 194 : index
    %141 = vector.load %arg8[%c0_108, %c194_109] : memref<8x1056xf32, #tpu.memory_space<vmem>>, vector<8x128xf32>
    %c0_110 = arith.constant 0 : index
    %c370_111 = arith.constant 370 : index
    %142 = vector.load %arg8[%c0_110, %c370_111] : memref<8x1056xf32, #tpu.memory_space<vmem>>, vector<8x128xf32>
    %c0_112 = arith.constant 0 : index
    %c546_113 = arith.constant 546 : index
    %143 = vector.load %arg8[%c0_112, %c546_113] : memref<8x1056xf32, #tpu.memory_space<vmem>>, vector<8x128xf32>
    %c0_114 = arith.constant 0 : index
    %c722 = arith.constant 722 : index
    %144 = vector.load %arg8[%c0_114, %c722] : memref<8x1056xf32, #tpu.memory_space<vmem>>, vector<8x128xf32>
    %145 = tpu.concatenate %141, %142, %143, %144 in 1 : vector<8x128xf32>, vector<8x128xf32>, vector<8x128xf32>, vector<8x128xf32> -> vector<8x512xf32>
    %c0_115 = arith.constant 0 : index
    %c208_116 = arith.constant 208 : index
    %146 = vector.load %arg8[%c0_115, %c208_116] : memref<8x1056xf32, #tpu.memory_space<vmem>>, vector<8x128xf32>
    %c0_117 = arith.constant 0 : index
    %c384_118 = arith.constant 384 : index
    %147 = vector.load %arg8[%c0_117, %c384_118] : memref<8x1056xf32, #tpu.memory_space<vmem>>, vector<8x128xf32>
    %c0_119 = arith.constant 0 : index
    %c560_120 = arith.constant 560 : index
    %148 = vector.load %arg8[%c0_119, %c560_120] : memref<8x1056xf32, #tpu.memory_space<vmem>>, vector<8x128xf32>
    %c0_121 = arith.constant 0 : index
    %c736 = arith.constant 736 : index
    %149 = vector.load %arg8[%c0_121, %c736] : memref<8x1056xf32, #tpu.memory_space<vmem>>, vector<8x128xf32>
    %150 = tpu.concatenate %146, %147, %148, %149 in 1 : vector<8x128xf32>, vector<8x128xf32>, vector<8x128xf32>, vector<8x128xf32> -> vector<8x512xf32>
    %c0_122 = arith.constant 0 : index
    %c209_123 = arith.constant 209 : index
    %151 = vector.load %arg8[%c0_122, %c209_123] : memref<8x1056xf32, #tpu.memory_space<vmem>>, vector<8x128xf32>
    %c0_124 = arith.constant 0 : index
    %c385_125 = arith.constant 385 : index
    %152 = vector.load %arg8[%c0_124, %c385_125] : memref<8x1056xf32, #tpu.memory_space<vmem>>, vector<8x128xf32>
    %c0_126 = arith.constant 0 : index
    %c561_127 = arith.constant 561 : index
    %153 = vector.load %arg8[%c0_126, %c561_127] : memref<8x1056xf32, #tpu.memory_space<vmem>>, vector<8x128xf32>
    %c0_128 = arith.constant 0 : index
    %c737 = arith.constant 737 : index
    %154 = vector.load %arg8[%c0_128, %c737] : memref<8x1056xf32, #tpu.memory_space<vmem>>, vector<8x128xf32>
    %155 = tpu.concatenate %151, %152, %153, %154 in 1 : vector<8x128xf32>, vector<8x128xf32>, vector<8x128xf32>, vector<8x128xf32> -> vector<8x512xf32>
    %c0_129 = arith.constant 0 : index
    %c210_130 = arith.constant 210 : index
    %156 = vector.load %arg8[%c0_129, %c210_130] : memref<8x1056xf32, #tpu.memory_space<vmem>>, vector<8x128xf32>
    %c0_131 = arith.constant 0 : index
    %c386_132 = arith.constant 386 : index
    %157 = vector.load %arg8[%c0_131, %c386_132] : memref<8x1056xf32, #tpu.memory_space<vmem>>, vector<8x128xf32>
    %c0_133 = arith.constant 0 : index
    %c562_134 = arith.constant 562 : index
    %158 = vector.load %arg8[%c0_133, %c562_134] : memref<8x1056xf32, #tpu.memory_space<vmem>>, vector<8x128xf32>
    %c0_135 = arith.constant 0 : index
    %c738 = arith.constant 738 : index
    %159 = vector.load %arg8[%c0_135, %c738] : memref<8x1056xf32, #tpu.memory_space<vmem>>, vector<8x128xf32>
    %160 = tpu.concatenate %156, %157, %158, %159 in 1 : vector<8x128xf32>, vector<8x128xf32>, vector<8x128xf32>, vector<8x128xf32> -> vector<8x512xf32>
    %161 = tpu.concatenate %120, %125, %130, %135, %140, %145, %150, %155, %160 in 0 : vector<8x512xf32>, vector<8x512xf32>, vector<8x512xf32>, vector<8x512xf32>, vector<8x512xf32>, vector<8x512xf32>, vector<8x512xf32>, vector<8x512xf32>, vector<8x512xf32> -> vector<72x512xf32>
    %162 = vector.extract_strided_slice %43 {offsets = [0, 72], sizes = [8, 72], strides = [1, 1]} : vector<8x216xf32> to vector<8x72xf32>
    %cst_136 = arith.constant dense<0.000000e+00> : vector<8x512xf32>
    %163 = tpu.matmul %162, %161, %cst_136 {dimension_numbers = #tpu.dot_dimension_numbers<[1], [0], [0], [1], [0, 0, 1, 1], [], []>} : vector<8x72xf32>, vector<72x512xf32>, vector<8x512xf32> -> vector<8x512xf32>
    %164 = arith.addf %115, %163 : vector<8x512xf32>
    %c0_137 = arith.constant 0 : index
    %c352_138 = arith.constant 352 : index
    %165 = vector.load %arg8[%c0_137, %c352_138] : memref<8x1056xf32, #tpu.memory_space<vmem>>, vector<8x128xf32>
    %c0_139 = arith.constant 0 : index
    %c528_140 = arith.constant 528 : index
    %166 = vector.load %arg8[%c0_139, %c528_140] : memref<8x1056xf32, #tpu.memory_space<vmem>>, vector<8x128xf32>
    %c0_141 = arith.constant 0 : index
    %c704_142 = arith.constant 704 : index
    %167 = vector.load %arg8[%c0_141, %c704_142] : memref<8x1056xf32, #tpu.memory_space<vmem>>, vector<8x128xf32>
    %c0_143 = arith.constant 0 : index
    %c880 = arith.constant 880 : index
    %168 = vector.load %arg8[%c0_143, %c880] : memref<8x1056xf32, #tpu.memory_space<vmem>>, vector<8x128xf32>
    %169 = tpu.concatenate %165, %166, %167, %168 in 1 : vector<8x128xf32>, vector<8x128xf32>, vector<8x128xf32>, vector<8x128xf32> -> vector<8x512xf32>
    %c0_144 = arith.constant 0 : index
    %c353_145 = arith.constant 353 : index
    %170 = vector.load %arg8[%c0_144, %c353_145] : memref<8x1056xf32, #tpu.memory_space<vmem>>, vector<8x128xf32>
    %c0_146 = arith.constant 0 : index
    %c529_147 = arith.constant 529 : index
    %171 = vector.load %arg8[%c0_146, %c529_147] : memref<8x1056xf32, #tpu.memory_space<vmem>>, vector<8x128xf32>
    %c0_148 = arith.constant 0 : index
    %c705_149 = arith.constant 705 : index
    %172 = vector.load %arg8[%c0_148, %c705_149] : memref<8x1056xf32, #tpu.memory_space<vmem>>, vector<8x128xf32>
    %c0_150 = arith.constant 0 : index
    %c881 = arith.constant 881 : index
    %173 = vector.load %arg8[%c0_150, %c881] : memref<8x1056xf32, #tpu.memory_space<vmem>>, vector<8x128xf32>
    %174 = tpu.concatenate %170, %171, %172, %173 in 1 : vector<8x128xf32>, vector<8x128xf32>, vector<8x128xf32>, vector<8x128xf32> -> vector<8x512xf32>
    %c0_151 = arith.constant 0 : index
    %c354_152 = arith.constant 354 : index
    %175 = vector.load %arg8[%c0_151, %c354_152] : memref<8x1056xf32, #tpu.memory_space<vmem>>, vector<8x128xf32>
    %c0_153 = arith.constant 0 : index
    %c530_154 = arith.constant 530 : index
    %176 = vector.load %arg8[%c0_153, %c530_154] : memref<8x1056xf32, #tpu.memory_space<vmem>>, vector<8x128xf32>
    %c0_155 = arith.constant 0 : index
    %c706_156 = arith.constant 706 : index
    %177 = vector.load %arg8[%c0_155, %c706_156] : memref<8x1056xf32, #tpu.memory_space<vmem>>, vector<8x128xf32>
    %c0_157 = arith.constant 0 : index
    %c882 = arith.constant 882 : index
    %178 = vector.load %arg8[%c0_157, %c882] : memref<8x1056xf32, #tpu.memory_space<vmem>>, vector<8x128xf32>
    %179 = tpu.concatenate %175, %176, %177, %178 in 1 : vector<8x128xf32>, vector<8x128xf32>, vector<8x128xf32>, vector<8x128xf32> -> vector<8x512xf32>
    %c0_158 = arith.constant 0 : index
    %c368_159 = arith.constant 368 : index
    %180 = vector.load %arg8[%c0_158, %c368_159] : memref<8x1056xf32, #tpu.memory_space<vmem>>, vector<8x128xf32>
    %c0_160 = arith.constant 0 : index
    %c544_161 = arith.constant 544 : index
    %181 = vector.load %arg8[%c0_160, %c544_161] : memref<8x1056xf32, #tpu.memory_space<vmem>>, vector<8x128xf32>
    %c0_162 = arith.constant 0 : index
    %c720_163 = arith.constant 720 : index
    %182 = vector.load %arg8[%c0_162, %c720_163] : memref<8x1056xf32, #tpu.memory_space<vmem>>, vector<8x128xf32>
    %c0_164 = arith.constant 0 : index
    %c896 = arith.constant 896 : index
    %183 = vector.load %arg8[%c0_164, %c896] : memref<8x1056xf32, #tpu.memory_space<vmem>>, vector<8x128xf32>
    %184 = tpu.concatenate %180, %181, %182, %183 in 1 : vector<8x128xf32>, vector<8x128xf32>, vector<8x128xf32>, vector<8x128xf32> -> vector<8x512xf32>
    %c0_165 = arith.constant 0 : index
    %c369_166 = arith.constant 369 : index
    %185 = vector.load %arg8[%c0_165, %c369_166] : memref<8x1056xf32, #tpu.memory_space<vmem>>, vector<8x128xf32>
    %c0_167 = arith.constant 0 : index
    %c545_168 = arith.constant 545 : index
    %186 = vector.load %arg8[%c0_167, %c545_168] : memref<8x1056xf32, #tpu.memory_space<vmem>>, vector<8x128xf32>
    %c0_169 = arith.constant 0 : index
    %c721_170 = arith.constant 721 : index
    %187 = vector.load %arg8[%c0_169, %c721_170] : memref<8x1056xf32, #tpu.memory_space<vmem>>, vector<8x128xf32>
    %c0_171 = arith.constant 0 : index
    %c897 = arith.constant 897 : index
    %188 = vector.load %arg8[%c0_171, %c897] : memref<8x1056xf32, #tpu.memory_space<vmem>>, vector<8x128xf32>
    %189 = tpu.concatenate %185, %186, %187, %188 in 1 : vector<8x128xf32>, vector<8x128xf32>, vector<8x128xf32>, vector<8x128xf32> -> vector<8x512xf32>
    %c0_172 = arith.constant 0 : index
    %c370_173 = arith.constant 370 : index
    %190 = vector.load %arg8[%c0_172, %c370_173] : memref<8x1056xf32, #tpu.memory_space<vmem>>, vector<8x128xf32>
    %c0_174 = arith.constant 0 : index
    %c546_175 = arith.constant 546 : index
    %191 = vector.load %arg8[%c0_174, %c546_175] : memref<8x1056xf32, #tpu.memory_space<vmem>>, vector<8x128xf32>
    %c0_176 = arith.constant 0 : index
    %c722_177 = arith.constant 722 : index
    %192 = vector.load %arg8[%c0_176, %c722_177] : memref<8x1056xf32, #tpu.memory_space<vmem>>, vector<8x128xf32>
    %c0_178 = arith.constant 0 : index
    %c898 = arith.constant 898 : index
    %193 = vector.load %arg8[%c0_178, %c898] : memref<8x1056xf32, #tpu.memory_space<vmem>>, vector<8x128xf32>
    %194 = tpu.concatenate %190, %191, %192, %193 in 1 : vector<8x128xf32>, vector<8x128xf32>, vector<8x128xf32>, vector<8x128xf32> -> vector<8x512xf32>
    %c0_179 = arith.constant 0 : index
    %c384_180 = arith.constant 384 : index
    %195 = vector.load %arg8[%c0_179, %c384_180] : memref<8x1056xf32, #tpu.memory_space<vmem>>, vector<8x128xf32>
    %c0_181 = arith.constant 0 : index
    %c560_182 = arith.constant 560 : index
    %196 = vector.load %arg8[%c0_181, %c560_182] : memref<8x1056xf32, #tpu.memory_space<vmem>>, vector<8x128xf32>
    %c0_183 = arith.constant 0 : index
    %c736_184 = arith.constant 736 : index
    %197 = vector.load %arg8[%c0_183, %c736_184] : memref<8x1056xf32, #tpu.memory_space<vmem>>, vector<8x128xf32>
    %c0_185 = arith.constant 0 : index
    %c912 = arith.constant 912 : index
    %198 = vector.load %arg8[%c0_185, %c912] : memref<8x1056xf32, #tpu.memory_space<vmem>>, vector<8x128xf32>
    %199 = tpu.concatenate %195, %196, %197, %198 in 1 : vector<8x128xf32>, vector<8x128xf32>, vector<8x128xf32>, vector<8x128xf32> -> vector<8x512xf32>
    %c0_186 = arith.constant 0 : index
    %c385_187 = arith.constant 385 : index
    %200 = vector.load %arg8[%c0_186, %c385_187] : memref<8x1056xf32, #tpu.memory_space<vmem>>, vector<8x128xf32>
    %c0_188 = arith.constant 0 : index
    %c561_189 = arith.constant 561 : index
    %201 = vector.load %arg8[%c0_188, %c561_189] : memref<8x1056xf32, #tpu.memory_space<vmem>>, vector<8x128xf32>
    %c0_190 = arith.constant 0 : index
    %c737_191 = arith.constant 737 : index
    %202 = vector.load %arg8[%c0_190, %c737_191] : memref<8x1056xf32, #tpu.memory_space<vmem>>, vector<8x128xf32>
    %c0_192 = arith.constant 0 : index
    %c913 = arith.constant 913 : index
    %203 = vector.load %arg8[%c0_192, %c913] : memref<8x1056xf32, #tpu.memory_space<vmem>>, vector<8x128xf32>
    %204 = tpu.concatenate %200, %201, %202, %203 in 1 : vector<8x128xf32>, vector<8x128xf32>, vector<8x128xf32>, vector<8x128xf32> -> vector<8x512xf32>
    %c0_193 = arith.constant 0 : index
    %c386_194 = arith.constant 386 : index
    %205 = vector.load %arg8[%c0_193, %c386_194] : memref<8x1056xf32, #tpu.memory_space<vmem>>, vector<8x128xf32>
    %c0_195 = arith.constant 0 : index
    %c562_196 = arith.constant 562 : index
    %206 = vector.load %arg8[%c0_195, %c562_196] : memref<8x1056xf32, #tpu.memory_space<vmem>>, vector<8x128xf32>
    %c0_197 = arith.constant 0 : index
    %c738_198 = arith.constant 738 : index
    %207 = vector.load %arg8[%c0_197, %c738_198] : memref<8x1056xf32, #tpu.memory_space<vmem>>, vector<8x128xf32>
    %c0_199 = arith.constant 0 : index
    %c914 = arith.constant 914 : index
    %208 = vector.load %arg8[%c0_199, %c914] : memref<8x1056xf32, #tpu.memory_space<vmem>>, vector<8x128xf32>
    %209 = tpu.concatenate %205, %206, %207, %208 in 1 : vector<8x128xf32>, vector<8x128xf32>, vector<8x128xf32>, vector<8x128xf32> -> vector<8x512xf32>
    %210 = tpu.concatenate %169, %174, %179, %184, %189, %194, %199, %204, %209 in 0 : vector<8x512xf32>, vector<8x512xf32>, vector<8x512xf32>, vector<8x512xf32>, vector<8x512xf32>, vector<8x512xf32>, vector<8x512xf32>, vector<8x512xf32>, vector<8x512xf32> -> vector<72x512xf32>
    %211 = vector.extract_strided_slice %43 {offsets = [0, 144], sizes = [8, 72], strides = [1, 1]} : vector<8x216xf32> to vector<8x72xf32>
    %cst_200 = arith.constant dense<0.000000e+00> : vector<8x512xf32>
    %212 = tpu.matmul %211, %210, %cst_200 {dimension_numbers = #tpu.dot_dimension_numbers<[1], [0], [0], [1], [0, 0, 1, 1], [], []>} : vector<8x72xf32>, vector<72x512xf32>, vector<8x512xf32> -> vector<8x512xf32>
    %213 = arith.addf %164, %212 : vector<8x512xf32>
    %214 = vector.broadcast %44 : vector<8x1xf32> to vector<8x512xf32>
    %215 = arith.addf %213, %214 : vector<8x512xf32>
    %cst_201 = arith.constant 0.000000e+00 : f32
    %216 = vector.shape_cast %63 : vector<1x512xi1> to vector<1x512xi1>
    %217 = vector.broadcast %216 : vector<1x512xi1> to vector<8x512xi1>
    %218 = vector.broadcast %cst_201 : f32 to vector<8x512xf32>
    %219 = arith.select %217, %215, %218 : vector<8x512xi1>, vector<8x512xf32>
    %cst_202 = arith.constant dense<0.000000e+00> : vector<8xf32>
    %220 = vector.multi_reduction <add>, %219, %cst_202 [1] : vector<8x512xf32> to vector<8xf32>
    %221 = vector.shape_cast %220 : vector<8xf32> to vector<8x1xf32>
    %222 = arith.addf %64, %221 : vector<8x1xf32>
    %223 = arith.mulf %219, %219 : vector<8x512xf32>
    %cst_203 = arith.constant dense<0.000000e+00> : vector<8xf32>
    %224 = vector.multi_reduction <add>, %223, %cst_203 [1] : vector<8x512xf32> to vector<8xf32>
    %225 = vector.shape_cast %224 : vector<8xf32> to vector<8x1xf32>
    %226 = arith.addf %65, %225 : vector<8x1xf32>
    %c0_204 = arith.constant 0 : index
    %c0_205 = arith.constant 0 : index
    %c0_206 = arith.constant 0 : index
    %227 = vector.load %arg6[%c0_204, %c0_205, %c0_206] : memref<1x8x512xf32, #tpu.memory_space<vmem>>, vector<1x8x512xf32>
    %228 = vector.shape_cast %227 : vector<1x8x512xf32> to vector<8x512xf32>
    %229 = vector.shape_cast %219 : vector<8x512xf32> to vector<1x8x512xf32>
    tpu.vector_store %arg6[%c0_204, %c0_205, %c0_206], %229 {strides = array<i32>} : memref<1x8x512xf32, #tpu.memory_space<vmem>>, vector<1x8x512xf32>,
    %c0_207 = arith.constant 0 : index
    %c0_208 = arith.constant 0 : index
    %c0_209 = arith.constant 0 : index
    %230 = vector.load %arg7[%c0_207, %c0_208, %c0_209] : memref<1x8x2xf32, #tpu.memory_space<vmem>>, vector<1x8x1xf32>
    %231 = vector.shape_cast %230 : vector<1x8x1xf32> to vector<8x1xf32>
    %232 = vector.shape_cast %222 : vector<8x1xf32> to vector<1x8x1xf32>
    tpu.vector_store %arg7[%c0_207, %c0_208, %c0_209], %232 {strides = array<i32>} : memref<1x8x2xf32, #tpu.memory_space<vmem>>, vector<1x8x1xf32>,
    %c0_210 = arith.constant 0 : index
    %c0_211 = arith.constant 0 : index
    %c1_212 = arith.constant 1 : index
    %233 = vector.load %arg7[%c0_210, %c0_211, %c1_212] : memref<1x8x2xf32, #tpu.memory_space<vmem>>, vector<1x8x1xf32>
    %234 = vector.shape_cast %233 : vector<1x8x1xf32> to vector<8x1xf32>
    %235 = vector.shape_cast %226 : vector<8x1xf32> to vector<1x8x1xf32>
    tpu.vector_store %arg7[%c0_210, %c0_211, %c1_212], %235 {strides = array<i32>} : memref<1x8x2xf32, #tpu.memory_space<vmem>>, vector<1x8x1xf32>,
    return
  }
  func.func @transform_0(%arg0: i32) -> (i32, i32, i32) {
    %c0_i32 = arith.constant 0 : i32
    %c0_i32_0 = arith.constant 0 : i32
    %c0_i32_1 = arith.constant 0 : i32
    return %arg0, %c0_i32, %c0_i32_0 : i32, i32, i32
  }
  func.func @transform_1(%arg0: i32) -> (i32, i32) {
    %c0_i32 = arith.constant 0 : i32
    %c0_i32_0 = arith.constant 0 : i32
    %c0_i32_1 = arith.constant 0 : i32
    return %c0_i32, %c0_i32_0 : i32, i32
  }
  func.func @transform_2(%arg0: i32) -> (i32, i32) {
    %c0_i32 = arith.constant 0 : i32
    %c0_i32_0 = arith.constant 0 : i32
    %c0_i32_1 = arith.constant 0 : i32
    return %c0_i32, %c0_i32_0 : i32, i32
  }
  func.func @transform_3(%arg0: i32) -> (i32, i32) {
    %c0_i32 = arith.constant 0 : i32
    %c0_i32_0 = arith.constant 0 : i32
    %c0_i32_1 = arith.constant 0 : i32
    return %c0_i32, %c0_i32_0 : i32, i32
  }
  func.func @transform_4(%arg0: i32) -> (i32, i32) {
    %c0_i32 = arith.constant 0 : i32
    %c0_i32_0 = arith.constant 0 : i32
    %c0_i32_1 = arith.constant 0 : i32
    return %c0_i32, %c0_i32_0 : i32, i32
  }
  func.func @transform_5(%arg0: i32) -> (i32, i32, i32) {
    %c0_i32 = arith.constant 0 : i32
    %c0_i32_0 = arith.constant 0 : i32
    %c0_i32_1 = arith.constant 0 : i32
    return %arg0, %c0_i32, %c0_i32_0 : i32, i32, i32
  }
  func.func @transform_6(%arg0: i32) -> (i32, i32, i32) {
    %c0_i32 = arith.constant 0 : i32
    %c0_i32_0 = arith.constant 0 : i32
    %c0_i32_1 = arith.constant 0 : i32
    return %arg0, %c0_i32, %c0_i32_0 : i32, i32, i32
  }
}

module attributes {stable_mosaic.version = 11 : i64} {
  func.func @kernel(%arg0: i32, %arg1: memref<1x8x512xf32, #tpu.memory_space<vmem>>, %arg2: memref<8x1xf32, #tpu.memory_space<vmem>>, %arg3: memref<8x1xf32, #tpu.memory_space<vmem>>, %arg4: memref<8x216xf32, #tpu.memory_space<vmem>>, %arg5: memref<8x1xf32, #tpu.memory_space<vmem>>, %arg6: memref<1x8x512xf32, #tpu.memory_space<vmem>>, %arg7: memref<1x8x512xf32, #tpu.memory_space<vmem>>, %arg8: memref<8x1056xf32, #tpu.memory_space<vmem>>) attributes {dimension_semantics = [#tpu.dimension_semantics<parallel>], iteration_bounds = array<i64: 2>, scalar_prefetch = 0 : i64, scratch_operands = 1 : i64, tpu.core_type = #tpu.core_type<tc>, window_params = [{transform_indices = @transform_0, window_bounds = array<i64: 1, 8, 512>}, {pipeline_mode = #tpu.pipeline_mode<synchronous>, transform_indices = @transform_1, window_bounds = array<i64: 8, 1>}, {pipeline_mode = #tpu.pipeline_mode<synchronous>, transform_indices = @transform_2, window_bounds = array<i64: 8, 1>}, {pipeline_mode = #tpu.pipeline_mode<synchronous>, transform_indices = @transform_3, window_bounds = array<i64: 8, 216>}, {pipeline_mode = #tpu.pipeline_mode<synchronous>, transform_indices = @transform_4, window_bounds = array<i64: 8, 1>}, {transform_indices = @transform_5, window_bounds = array<i64: 1, 8, 512>}, {transform_indices = @transform_6, window_bounds = array<i64: 1, 8, 512>}]} {
    %c0 = arith.constant 0 : index
    %c0_0 = arith.constant 0 : index
    %0 = vector.load %arg2[%c0, %c0_0] : memref<8x1xf32, #tpu.memory_space<vmem>>, vector<8x1xf32>
    %c0_1 = arith.constant 0 : index
    %c0_2 = arith.constant 0 : index
    %1 = vector.load %arg3[%c0_1, %c0_2] : memref<8x1xf32, #tpu.memory_space<vmem>>, vector<8x1xf32>
    %c0_3 = arith.constant 0 : index
    %c0_4 = arith.constant 0 : index
    %c0_5 = arith.constant 0 : index
    %2 = vector.load %arg1[%c0_3, %c0_4, %c0_5] : memref<1x8x512xf32, #tpu.memory_space<vmem>>, vector<1x8x512xf32>
    %3 = vector.shape_cast %2 : vector<1x8x512xf32> to vector<8x512xf32>
    %4 = tpu.iota {dimensions = array<i32: 1>} : vector<1x512xi32>
    %c16_i32 = arith.constant 16 : i32
    %c0_i32 = arith.constant 0 : i32
    %5 = arith.cmpi eq, %c16_i32, %c0_i32 : i32
    %c1_i32 = arith.constant 1 : i32
    %6 = arith.select %5, %c1_i32, %c16_i32 : i32
    %7 = vector.broadcast %6 : i32 to vector<1x512xi32>
    %8 = arith.remsi %4, %7 : vector<1x512xi32>
    %c0_i32_6 = arith.constant 0 : i32
    %9 = vector.broadcast %c0_i32_6 : i32 to vector<1x512xi32>
    %10 = arith.cmpi ne, %8, %9 : vector<1x512xi32>
    %c0_i32_7 = arith.constant 0 : i32
    %11 = vector.broadcast %c0_i32_7 : i32 to vector<1x512xi32>
    %12 = arith.cmpi slt, %8, %11 : vector<1x512xi32>
    %c0_i32_8 = arith.constant 0 : i32
    %13 = arith.cmpi slt, %6, %c0_i32_8 : i32
    %14 = vector.broadcast %13 : i1 to vector<1x512xi1>
    %15 = vector.broadcast %14 : vector<1x512xi1> to vector<1x512xi1>
    %16 = arith.xori %12, %15 : vector<1x512xi1>
    %17 = arith.andi %16, %10 : vector<1x512xi1>
    %18 = vector.broadcast %6 : i32 to vector<1x512xi32>
    %19 = arith.addi %8, %18 : vector<1x512xi32>
    %20 = arith.select %17, %19, %8 : vector<1x512xi1>, vector<1x512xi32>
    %c8_i32 = arith.constant 8 : i32
    %21 = vector.broadcast %c8_i32 : i32 to vector<1x512xi32>
    %22 = arith.cmpi slt, %20, %21 : vector<1x512xi32>
    %23 = vector.broadcast %0 : vector<8x1xf32> to vector<8x512xf32>
    %24 = arith.mulf %3, %23 : vector<8x512xf32>
    %25 = vector.broadcast %1 : vector<8x1xf32> to vector<8x512xf32>
    %26 = arith.addf %24, %25 : vector<8x512xf32>
    %cst = arith.constant 0.000000e+00 : f32
    %27 = vector.broadcast %cst : f32 to vector<8x512xf32>
    %28 = arith.maximumf %26, %27 : vector<8x512xf32>
    %cst_9 = arith.constant 0.000000e+00 : f32
    %29 = vector.shape_cast %22 : vector<1x512xi1> to vector<1x512xi1>
    %30 = vector.broadcast %29 : vector<1x512xi1> to vector<8x512xi1>
    %31 = vector.broadcast %cst_9 : f32 to vector<8x512xf32>
    %32 = arith.select %30, %28, %31 : vector<8x512xi1>, vector<8x512xf32>
    %cst_10 = arith.constant 0.000000e+00 : f32
    %33 = vector.broadcast %cst_10 : f32 to vector<8x1056xf32>
    %c0_11 = arith.constant 0 : index
    %c0_12 = arith.constant 0 : index
    %34 = vector.load %arg8[%c0_11, %c0_12] : memref<8x1056xf32, #tpu.memory_space<vmem>>, vector<8x1056xf32>
    tpu.vector_store %arg8[%c0_11, %c0_12], %33 {strides = array<i32>} : memref<8x1056xf32, #tpu.memory_space<vmem>>, vector<8x1056xf32>,
    %35 = vector.extract_strided_slice %32 {offsets = [0, 0], sizes = [8, 128], strides = [1, 1]} : vector<8x512xf32> to vector<8x128xf32>
    %c0_13 = arith.constant 0 : index
    %c193 = arith.constant 193 : index
    %36 = vector.load %arg8[%c0_13, %c193] : memref<8x1056xf32, #tpu.memory_space<vmem>>, vector<8x128xf32>
    tpu.vector_store %arg8[%c0_13, %c193], %35 {strides = array<i32>} : memref<8x1056xf32, #tpu.memory_space<vmem>>, vector<8x128xf32>,
    %37 = vector.extract_strided_slice %32 {offsets = [0, 128], sizes = [8, 128], strides = [1, 1]} : vector<8x512xf32> to vector<8x128xf32>
    %c0_14 = arith.constant 0 : index
    %c369 = arith.constant 369 : index
    %38 = vector.load %arg8[%c0_14, %c369] : memref<8x1056xf32, #tpu.memory_space<vmem>>, vector<8x128xf32>
    tpu.vector_store %arg8[%c0_14, %c369], %37 {strides = array<i32>} : memref<8x1056xf32, #tpu.memory_space<vmem>>, vector<8x128xf32>,
    %39 = vector.extract_strided_slice %32 {offsets = [0, 256], sizes = [8, 128], strides = [1, 1]} : vector<8x512xf32> to vector<8x128xf32>
    %c0_15 = arith.constant 0 : index
    %c545 = arith.constant 545 : index
    %40 = vector.load %arg8[%c0_15, %c545] : memref<8x1056xf32, #tpu.memory_space<vmem>>, vector<8x128xf32>
    tpu.vector_store %arg8[%c0_15, %c545], %39 {strides = array<i32>} : memref<8x1056xf32, #tpu.memory_space<vmem>>, vector<8x128xf32>,
    %41 = vector.extract_strided_slice %32 {offsets = [0, 384], sizes = [8, 128], strides = [1, 1]} : vector<8x512xf32> to vector<8x128xf32>
    %c0_16 = arith.constant 0 : index
    %c721 = arith.constant 721 : index
    %42 = vector.load %arg8[%c0_16, %c721] : memref<8x1056xf32, #tpu.memory_space<vmem>>, vector<8x128xf32>
    tpu.vector_store %arg8[%c0_16, %c721], %41 {strides = array<i32>} : memref<8x1056xf32, #tpu.memory_space<vmem>>, vector<8x128xf32>,
    %c0_17 = arith.constant 0 : index
    %c0_18 = arith.constant 0 : index
    %43 = vector.load %arg4[%c0_17, %c0_18] : memref<8x216xf32, #tpu.memory_space<vmem>>, vector<8x216xf32>
    %c0_19 = arith.constant 0 : index
    %c0_20 = arith.constant 0 : index
    %44 = vector.load %arg5[%c0_19, %c0_20] : memref<8x1xf32, #tpu.memory_space<vmem>>, vector<8x1xf32>
    %cst_21 = arith.constant 0.000000e+00 : f32
    %45 = vector.broadcast %cst_21 : f32 to vector<8x512xf32>
    %c0_22 = arith.constant 0 : index
    %c0_23 = arith.constant 0 : index
    %46 = vector.load %arg8[%c0_22, %c0_23] : memref<8x1056xf32, #tpu.memory_space<vmem>>, vector<8x128xf32>
    %c0_24 = arith.constant 0 : index
    %c176 = arith.constant 176 : index
    %47 = vector.load %arg8[%c0_24, %c176] : memref<8x1056xf32, #tpu.memory_space<vmem>>, vector<8x128xf32>
    %c0_25 = arith.constant 0 : index
    %c352 = arith.constant 352 : index
    %48 = vector.load %arg8[%c0_25, %c352] : memref<8x1056xf32, #tpu.memory_space<vmem>>, vector<8x128xf32>
    %c0_26 = arith.constant 0 : index
    %c528 = arith.constant 528 : index
    %49 = vector.load %arg8[%c0_26, %c528] : memref<8x1056xf32, #tpu.memory_space<vmem>>, vector<8x128xf32>
    %50 = tpu.concatenate %46, %47, %48, %49 in 1 : vector<8x128xf32>, vector<8x128xf32>, vector<8x128xf32>, vector<8x128xf32> -> vector<8x512xf32>
    %c0_27 = arith.constant 0 : index
    %c1 = arith.constant 1 : index
    %51 = vector.load %arg8[%c0_27, %c1] : memref<8x1056xf32, #tpu.memory_space<vmem>>, vector<8x128xf32>
    %c0_28 = arith.constant 0 : index
    %c177 = arith.constant 177 : index
    %52 = vector.load %arg8[%c0_28, %c177] : memref<8x1056xf32, #tpu.memory_space<vmem>>, vector<8x128xf32>
    %c0_29 = arith.constant 0 : index
    %c353 = arith.constant 353 : index
    %53 = vector.load %arg8[%c0_29, %c353] : memref<8x1056xf32, #tpu.memory_space<vmem>>, vector<8x128xf32>
    %c0_30 = arith.constant 0 : index
    %c529 = arith.constant 529 : index
    %54 = vector.load %arg8[%c0_30, %c529] : memref<8x1056xf32, #tpu.memory_space<vmem>>, vector<8x128xf32>
    %55 = tpu.concatenate %51, %52, %53, %54 in 1 : vector<8x128xf32>, vector<8x128xf32>, vector<8x128xf32>, vector<8x128xf32> -> vector<8x512xf32>
    %c0_31 = arith.constant 0 : index
    %c2 = arith.constant 2 : index
    %56 = vector.load %arg8[%c0_31, %c2] : memref<8x1056xf32, #tpu.memory_space<vmem>>, vector<8x128xf32>
    %c0_32 = arith.constant 0 : index
    %c178 = arith.constant 178 : index
    %57 = vector.load %arg8[%c0_32, %c178] : memref<8x1056xf32, #tpu.memory_space<vmem>>, vector<8x128xf32>
    %c0_33 = arith.constant 0 : index
    %c354 = arith.constant 354 : index
    %58 = vector.load %arg8[%c0_33, %c354] : memref<8x1056xf32, #tpu.memory_space<vmem>>, vector<8x128xf32>
    %c0_34 = arith.constant 0 : index
    %c530 = arith.constant 530 : index
    %59 = vector.load %arg8[%c0_34, %c530] : memref<8x1056xf32, #tpu.memory_space<vmem>>, vector<8x128xf32>
    %60 = tpu.concatenate %56, %57, %58, %59 in 1 : vector<8x128xf32>, vector<8x128xf32>, vector<8x128xf32>, vector<8x128xf32> -> vector<8x512xf32>
    %c0_35 = arith.constant 0 : index
    %c16 = arith.constant 16 : index
    %61 = vector.load %arg8[%c0_35, %c16] : memref<8x1056xf32, #tpu.memory_space<vmem>>, vector<8x128xf32>
    %c0_36 = arith.constant 0 : index
    %c192 = arith.constant 192 : index
    %62 = vector.load %arg8[%c0_36, %c192] : memref<8x1056xf32, #tpu.memory_space<vmem>>, vector<8x128xf32>
    %c0_37 = arith.constant 0 : index
    %c368 = arith.constant 368 : index
    %63 = vector.load %arg8[%c0_37, %c368] : memref<8x1056xf32, #tpu.memory_space<vmem>>, vector<8x128xf32>
    %c0_38 = arith.constant 0 : index
    %c544 = arith.constant 544 : index
    %64 = vector.load %arg8[%c0_38, %c544] : memref<8x1056xf32, #tpu.memory_space<vmem>>, vector<8x128xf32>
    %65 = tpu.concatenate %61, %62, %63, %64 in 1 : vector<8x128xf32>, vector<8x128xf32>, vector<8x128xf32>, vector<8x128xf32> -> vector<8x512xf32>
    %c0_39 = arith.constant 0 : index
    %c17 = arith.constant 17 : index
    %66 = vector.load %arg8[%c0_39, %c17] : memref<8x1056xf32, #tpu.memory_space<vmem>>, vector<8x128xf32>
    %c0_40 = arith.constant 0 : index
    %c193_41 = arith.constant 193 : index
    %67 = vector.load %arg8[%c0_40, %c193_41] : memref<8x1056xf32, #tpu.memory_space<vmem>>, vector<8x128xf32>
    %c0_42 = arith.constant 0 : index
    %c369_43 = arith.constant 369 : index
    %68 = vector.load %arg8[%c0_42, %c369_43] : memref<8x1056xf32, #tpu.memory_space<vmem>>, vector<8x128xf32>
    %c0_44 = arith.constant 0 : index
    %c545_45 = arith.constant 545 : index
    %69 = vector.load %arg8[%c0_44, %c545_45] : memref<8x1056xf32, #tpu.memory_space<vmem>>, vector<8x128xf32>
    %70 = tpu.concatenate %66, %67, %68, %69 in 1 : vector<8x128xf32>, vector<8x128xf32>, vector<8x128xf32>, vector<8x128xf32> -> vector<8x512xf32>
    %c0_46 = arith.constant 0 : index
    %c18 = arith.constant 18 : index
    %71 = vector.load %arg8[%c0_46, %c18] : memref<8x1056xf32, #tpu.memory_space<vmem>>, vector<8x128xf32>
    %c0_47 = arith.constant 0 : index
    %c194 = arith.constant 194 : index
    %72 = vector.load %arg8[%c0_47, %c194] : memref<8x1056xf32, #tpu.memory_space<vmem>>, vector<8x128xf32>
    %c0_48 = arith.constant 0 : index
    %c370 = arith.constant 370 : index
    %73 = vector.load %arg8[%c0_48, %c370] : memref<8x1056xf32, #tpu.memory_space<vmem>>, vector<8x128xf32>
    %c0_49 = arith.constant 0 : index
    %c546 = arith.constant 546 : index
    %74 = vector.load %arg8[%c0_49, %c546] : memref<8x1056xf32, #tpu.memory_space<vmem>>, vector<8x128xf32>
    %75 = tpu.concatenate %71, %72, %73, %74 in 1 : vector<8x128xf32>, vector<8x128xf32>, vector<8x128xf32>, vector<8x128xf32> -> vector<8x512xf32>
    %c0_50 = arith.constant 0 : index
    %c32 = arith.constant 32 : index
    %76 = vector.load %arg8[%c0_50, %c32] : memref<8x1056xf32, #tpu.memory_space<vmem>>, vector<8x128xf32>
    %c0_51 = arith.constant 0 : index
    %c208 = arith.constant 208 : index
    %77 = vector.load %arg8[%c0_51, %c208] : memref<8x1056xf32, #tpu.memory_space<vmem>>, vector<8x128xf32>
    %c0_52 = arith.constant 0 : index
    %c384 = arith.constant 384 : index
    %78 = vector.load %arg8[%c0_52, %c384] : memref<8x1056xf32, #tpu.memory_space<vmem>>, vector<8x128xf32>
    %c0_53 = arith.constant 0 : index
    %c560 = arith.constant 560 : index
    %79 = vector.load %arg8[%c0_53, %c560] : memref<8x1056xf32, #tpu.memory_space<vmem>>, vector<8x128xf32>
    %80 = tpu.concatenate %76, %77, %78, %79 in 1 : vector<8x128xf32>, vector<8x128xf32>, vector<8x128xf32>, vector<8x128xf32> -> vector<8x512xf32>
    %c0_54 = arith.constant 0 : index
    %c33 = arith.constant 33 : index
    %81 = vector.load %arg8[%c0_54, %c33] : memref<8x1056xf32, #tpu.memory_space<vmem>>, vector<8x128xf32>
    %c0_55 = arith.constant 0 : index
    %c209 = arith.constant 209 : index
    %82 = vector.load %arg8[%c0_55, %c209] : memref<8x1056xf32, #tpu.memory_space<vmem>>, vector<8x128xf32>
    %c0_56 = arith.constant 0 : index
    %c385 = arith.constant 385 : index
    %83 = vector.load %arg8[%c0_56, %c385] : memref<8x1056xf32, #tpu.memory_space<vmem>>, vector<8x128xf32>
    %c0_57 = arith.constant 0 : index
    %c561 = arith.constant 561 : index
    %84 = vector.load %arg8[%c0_57, %c561] : memref<8x1056xf32, #tpu.memory_space<vmem>>, vector<8x128xf32>
    %85 = tpu.concatenate %81, %82, %83, %84 in 1 : vector<8x128xf32>, vector<8x128xf32>, vector<8x128xf32>, vector<8x128xf32> -> vector<8x512xf32>
    %c0_58 = arith.constant 0 : index
    %c34 = arith.constant 34 : index
    %86 = vector.load %arg8[%c0_58, %c34] : memref<8x1056xf32, #tpu.memory_space<vmem>>, vector<8x128xf32>
    %c0_59 = arith.constant 0 : index
    %c210 = arith.constant 210 : index
    %87 = vector.load %arg8[%c0_59, %c210] : memref<8x1056xf32, #tpu.memory_space<vmem>>, vector<8x128xf32>
    %c0_60 = arith.constant 0 : index
    %c386 = arith.constant 386 : index
    %88 = vector.load %arg8[%c0_60, %c386] : memref<8x1056xf32, #tpu.memory_space<vmem>>, vector<8x128xf32>
    %c0_61 = arith.constant 0 : index
    %c562 = arith.constant 562 : index
    %89 = vector.load %arg8[%c0_61, %c562] : memref<8x1056xf32, #tpu.memory_space<vmem>>, vector<8x128xf32>
    %90 = tpu.concatenate %86, %87, %88, %89 in 1 : vector<8x128xf32>, vector<8x128xf32>, vector<8x128xf32>, vector<8x128xf32> -> vector<8x512xf32>
    %91 = tpu.concatenate %50, %55, %60, %65, %70, %75, %80, %85, %90 in 0 : vector<8x512xf32>, vector<8x512xf32>, vector<8x512xf32>, vector<8x512xf32>, vector<8x512xf32>, vector<8x512xf32>, vector<8x512xf32>, vector<8x512xf32>, vector<8x512xf32> -> vector<72x512xf32>
    %92 = vector.extract_strided_slice %43 {offsets = [0, 0], sizes = [8, 72], strides = [1, 1]} : vector<8x216xf32> to vector<8x72xf32>
    %cst_62 = arith.constant dense<0.000000e+00> : vector<8x512xf32>
    %93 = tpu.matmul %92, %91, %cst_62 {dimension_numbers = #tpu.dot_dimension_numbers<[1], [0], [0], [1], [0, 0, 1, 1], [], []>} : vector<8x72xf32>, vector<72x512xf32>, vector<8x512xf32> -> vector<8x512xf32>
    %94 = arith.addf %45, %93 : vector<8x512xf32>
    %c0_63 = arith.constant 0 : index
    %c176_64 = arith.constant 176 : index
    %95 = vector.load %arg8[%c0_63, %c176_64] : memref<8x1056xf32, #tpu.memory_space<vmem>>, vector<8x128xf32>
    %c0_65 = arith.constant 0 : index
    %c352_66 = arith.constant 352 : index
    %96 = vector.load %arg8[%c0_65, %c352_66] : memref<8x1056xf32, #tpu.memory_space<vmem>>, vector<8x128xf32>
    %c0_67 = arith.constant 0 : index
    %c528_68 = arith.constant 528 : index
    %97 = vector.load %arg8[%c0_67, %c528_68] : memref<8x1056xf32, #tpu.memory_space<vmem>>, vector<8x128xf32>
    %c0_69 = arith.constant 0 : index
    %c704 = arith.constant 704 : index
    %98 = vector.load %arg8[%c0_69, %c704] : memref<8x1056xf32, #tpu.memory_space<vmem>>, vector<8x128xf32>
    %99 = tpu.concatenate %95, %96, %97, %98 in 1 : vector<8x128xf32>, vector<8x128xf32>, vector<8x128xf32>, vector<8x128xf32> -> vector<8x512xf32>
    %c0_70 = arith.constant 0 : index
    %c177_71 = arith.constant 177 : index
    %100 = vector.load %arg8[%c0_70, %c177_71] : memref<8x1056xf32, #tpu.memory_space<vmem>>, vector<8x128xf32>
    %c0_72 = arith.constant 0 : index
    %c353_73 = arith.constant 353 : index
    %101 = vector.load %arg8[%c0_72, %c353_73] : memref<8x1056xf32, #tpu.memory_space<vmem>>, vector<8x128xf32>
    %c0_74 = arith.constant 0 : index
    %c529_75 = arith.constant 529 : index
    %102 = vector.load %arg8[%c0_74, %c529_75] : memref<8x1056xf32, #tpu.memory_space<vmem>>, vector<8x128xf32>
    %c0_76 = arith.constant 0 : index
    %c705 = arith.constant 705 : index
    %103 = vector.load %arg8[%c0_76, %c705] : memref<8x1056xf32, #tpu.memory_space<vmem>>, vector<8x128xf32>
    %104 = tpu.concatenate %100, %101, %102, %103 in 1 : vector<8x128xf32>, vector<8x128xf32>, vector<8x128xf32>, vector<8x128xf32> -> vector<8x512xf32>
    %c0_77 = arith.constant 0 : index
    %c178_78 = arith.constant 178 : index
    %105 = vector.load %arg8[%c0_77, %c178_78] : memref<8x1056xf32, #tpu.memory_space<vmem>>, vector<8x128xf32>
    %c0_79 = arith.constant 0 : index
    %c354_80 = arith.constant 354 : index
    %106 = vector.load %arg8[%c0_79, %c354_80] : memref<8x1056xf32, #tpu.memory_space<vmem>>, vector<8x128xf32>
    %c0_81 = arith.constant 0 : index
    %c530_82 = arith.constant 530 : index
    %107 = vector.load %arg8[%c0_81, %c530_82] : memref<8x1056xf32, #tpu.memory_space<vmem>>, vector<8x128xf32>
    %c0_83 = arith.constant 0 : index
    %c706 = arith.constant 706 : index
    %108 = vector.load %arg8[%c0_83, %c706] : memref<8x1056xf32, #tpu.memory_space<vmem>>, vector<8x128xf32>
    %109 = tpu.concatenate %105, %106, %107, %108 in 1 : vector<8x128xf32>, vector<8x128xf32>, vector<8x128xf32>, vector<8x128xf32> -> vector<8x512xf32>
    %c0_84 = arith.constant 0 : index
    %c192_85 = arith.constant 192 : index
    %110 = vector.load %arg8[%c0_84, %c192_85] : memref<8x1056xf32, #tpu.memory_space<vmem>>, vector<8x128xf32>
    %c0_86 = arith.constant 0 : index
    %c368_87 = arith.constant 368 : index
    %111 = vector.load %arg8[%c0_86, %c368_87] : memref<8x1056xf32, #tpu.memory_space<vmem>>, vector<8x128xf32>
    %c0_88 = arith.constant 0 : index
    %c544_89 = arith.constant 544 : index
    %112 = vector.load %arg8[%c0_88, %c544_89] : memref<8x1056xf32, #tpu.memory_space<vmem>>, vector<8x128xf32>
    %c0_90 = arith.constant 0 : index
    %c720 = arith.constant 720 : index
    %113 = vector.load %arg8[%c0_90, %c720] : memref<8x1056xf32, #tpu.memory_space<vmem>>, vector<8x128xf32>
    %114 = tpu.concatenate %110, %111, %112, %113 in 1 : vector<8x128xf32>, vector<8x128xf32>, vector<8x128xf32>, vector<8x128xf32> -> vector<8x512xf32>
    %c0_91 = arith.constant 0 : index
    %c193_92 = arith.constant 193 : index
    %115 = vector.load %arg8[%c0_91, %c193_92] : memref<8x1056xf32, #tpu.memory_space<vmem>>, vector<8x128xf32>
    %c0_93 = arith.constant 0 : index
    %c369_94 = arith.constant 369 : index
    %116 = vector.load %arg8[%c0_93, %c369_94] : memref<8x1056xf32, #tpu.memory_space<vmem>>, vector<8x128xf32>
    %c0_95 = arith.constant 0 : index
    %c545_96 = arith.constant 545 : index
    %117 = vector.load %arg8[%c0_95, %c545_96] : memref<8x1056xf32, #tpu.memory_space<vmem>>, vector<8x128xf32>
    %c0_97 = arith.constant 0 : index
    %c721_98 = arith.constant 721 : index
    %118 = vector.load %arg8[%c0_97, %c721_98] : memref<8x1056xf32, #tpu.memory_space<vmem>>, vector<8x128xf32>
    %119 = tpu.concatenate %115, %116, %117, %118 in 1 : vector<8x128xf32>, vector<8x128xf32>, vector<8x128xf32>, vector<8x128xf32> -> vector<8x512xf32>
    %c0_99 = arith.constant 0 : index
    %c194_100 = arith.constant 194 : index
    %120 = vector.load %arg8[%c0_99, %c194_100] : memref<8x1056xf32, #tpu.memory_space<vmem>>, vector<8x128xf32>
    %c0_101 = arith.constant 0 : index
    %c370_102 = arith.constant 370 : index
    %121 = vector.load %arg8[%c0_101, %c370_102] : memref<8x1056xf32, #tpu.memory_space<vmem>>, vector<8x128xf32>
    %c0_103 = arith.constant 0 : index
    %c546_104 = arith.constant 546 : index
    %122 = vector.load %arg8[%c0_103, %c546_104] : memref<8x1056xf32, #tpu.memory_space<vmem>>, vector<8x128xf32>
    %c0_105 = arith.constant 0 : index
    %c722 = arith.constant 722 : index
    %123 = vector.load %arg8[%c0_105, %c722] : memref<8x1056xf32, #tpu.memory_space<vmem>>, vector<8x128xf32>
    %124 = tpu.concatenate %120, %121, %122, %123 in 1 : vector<8x128xf32>, vector<8x128xf32>, vector<8x128xf32>, vector<8x128xf32> -> vector<8x512xf32>
    %c0_106 = arith.constant 0 : index
    %c208_107 = arith.constant 208 : index
    %125 = vector.load %arg8[%c0_106, %c208_107] : memref<8x1056xf32, #tpu.memory_space<vmem>>, vector<8x128xf32>
    %c0_108 = arith.constant 0 : index
    %c384_109 = arith.constant 384 : index
    %126 = vector.load %arg8[%c0_108, %c384_109] : memref<8x1056xf32, #tpu.memory_space<vmem>>, vector<8x128xf32>
    %c0_110 = arith.constant 0 : index
    %c560_111 = arith.constant 560 : index
    %127 = vector.load %arg8[%c0_110, %c560_111] : memref<8x1056xf32, #tpu.memory_space<vmem>>, vector<8x128xf32>
    %c0_112 = arith.constant 0 : index
    %c736 = arith.constant 736 : index
    %128 = vector.load %arg8[%c0_112, %c736] : memref<8x1056xf32, #tpu.memory_space<vmem>>, vector<8x128xf32>
    %129 = tpu.concatenate %125, %126, %127, %128 in 1 : vector<8x128xf32>, vector<8x128xf32>, vector<8x128xf32>, vector<8x128xf32> -> vector<8x512xf32>
    %c0_113 = arith.constant 0 : index
    %c209_114 = arith.constant 209 : index
    %130 = vector.load %arg8[%c0_113, %c209_114] : memref<8x1056xf32, #tpu.memory_space<vmem>>, vector<8x128xf32>
    %c0_115 = arith.constant 0 : index
    %c385_116 = arith.constant 385 : index
    %131 = vector.load %arg8[%c0_115, %c385_116] : memref<8x1056xf32, #tpu.memory_space<vmem>>, vector<8x128xf32>
    %c0_117 = arith.constant 0 : index
    %c561_118 = arith.constant 561 : index
    %132 = vector.load %arg8[%c0_117, %c561_118] : memref<8x1056xf32, #tpu.memory_space<vmem>>, vector<8x128xf32>
    %c0_119 = arith.constant 0 : index
    %c737 = arith.constant 737 : index
    %133 = vector.load %arg8[%c0_119, %c737] : memref<8x1056xf32, #tpu.memory_space<vmem>>, vector<8x128xf32>
    %134 = tpu.concatenate %130, %131, %132, %133 in 1 : vector<8x128xf32>, vector<8x128xf32>, vector<8x128xf32>, vector<8x128xf32> -> vector<8x512xf32>
    %c0_120 = arith.constant 0 : index
    %c210_121 = arith.constant 210 : index
    %135 = vector.load %arg8[%c0_120, %c210_121] : memref<8x1056xf32, #tpu.memory_space<vmem>>, vector<8x128xf32>
    %c0_122 = arith.constant 0 : index
    %c386_123 = arith.constant 386 : index
    %136 = vector.load %arg8[%c0_122, %c386_123] : memref<8x1056xf32, #tpu.memory_space<vmem>>, vector<8x128xf32>
    %c0_124 = arith.constant 0 : index
    %c562_125 = arith.constant 562 : index
    %137 = vector.load %arg8[%c0_124, %c562_125] : memref<8x1056xf32, #tpu.memory_space<vmem>>, vector<8x128xf32>
    %c0_126 = arith.constant 0 : index
    %c738 = arith.constant 738 : index
    %138 = vector.load %arg8[%c0_126, %c738] : memref<8x1056xf32, #tpu.memory_space<vmem>>, vector<8x128xf32>
    %139 = tpu.concatenate %135, %136, %137, %138 in 1 : vector<8x128xf32>, vector<8x128xf32>, vector<8x128xf32>, vector<8x128xf32> -> vector<8x512xf32>
    %140 = tpu.concatenate %99, %104, %109, %114, %119, %124, %129, %134, %139 in 0 : vector<8x512xf32>, vector<8x512xf32>, vector<8x512xf32>, vector<8x512xf32>, vector<8x512xf32>, vector<8x512xf32>, vector<8x512xf32>, vector<8x512xf32>, vector<8x512xf32> -> vector<72x512xf32>
    %141 = vector.extract_strided_slice %43 {offsets = [0, 72], sizes = [8, 72], strides = [1, 1]} : vector<8x216xf32> to vector<8x72xf32>
    %cst_127 = arith.constant dense<0.000000e+00> : vector<8x512xf32>
    %142 = tpu.matmul %141, %140, %cst_127 {dimension_numbers = #tpu.dot_dimension_numbers<[1], [0], [0], [1], [0, 0, 1, 1], [], []>} : vector<8x72xf32>, vector<72x512xf32>, vector<8x512xf32> -> vector<8x512xf32>
    %143 = arith.addf %94, %142 : vector<8x512xf32>
    %c0_128 = arith.constant 0 : index
    %c352_129 = arith.constant 352 : index
    %144 = vector.load %arg8[%c0_128, %c352_129] : memref<8x1056xf32, #tpu.memory_space<vmem>>, vector<8x128xf32>
    %c0_130 = arith.constant 0 : index
    %c528_131 = arith.constant 528 : index
    %145 = vector.load %arg8[%c0_130, %c528_131] : memref<8x1056xf32, #tpu.memory_space<vmem>>, vector<8x128xf32>
    %c0_132 = arith.constant 0 : index
    %c704_133 = arith.constant 704 : index
    %146 = vector.load %arg8[%c0_132, %c704_133] : memref<8x1056xf32, #tpu.memory_space<vmem>>, vector<8x128xf32>
    %c0_134 = arith.constant 0 : index
    %c880 = arith.constant 880 : index
    %147 = vector.load %arg8[%c0_134, %c880] : memref<8x1056xf32, #tpu.memory_space<vmem>>, vector<8x128xf32>
    %148 = tpu.concatenate %144, %145, %146, %147 in 1 : vector<8x128xf32>, vector<8x128xf32>, vector<8x128xf32>, vector<8x128xf32> -> vector<8x512xf32>
    %c0_135 = arith.constant 0 : index
    %c353_136 = arith.constant 353 : index
    %149 = vector.load %arg8[%c0_135, %c353_136] : memref<8x1056xf32, #tpu.memory_space<vmem>>, vector<8x128xf32>
    %c0_137 = arith.constant 0 : index
    %c529_138 = arith.constant 529 : index
    %150 = vector.load %arg8[%c0_137, %c529_138] : memref<8x1056xf32, #tpu.memory_space<vmem>>, vector<8x128xf32>
    %c0_139 = arith.constant 0 : index
    %c705_140 = arith.constant 705 : index
    %151 = vector.load %arg8[%c0_139, %c705_140] : memref<8x1056xf32, #tpu.memory_space<vmem>>, vector<8x128xf32>
    %c0_141 = arith.constant 0 : index
    %c881 = arith.constant 881 : index
    %152 = vector.load %arg8[%c0_141, %c881] : memref<8x1056xf32, #tpu.memory_space<vmem>>, vector<8x128xf32>
    %153 = tpu.concatenate %149, %150, %151, %152 in 1 : vector<8x128xf32>, vector<8x128xf32>, vector<8x128xf32>, vector<8x128xf32> -> vector<8x512xf32>
    %c0_142 = arith.constant 0 : index
    %c354_143 = arith.constant 354 : index
    %154 = vector.load %arg8[%c0_142, %c354_143] : memref<8x1056xf32, #tpu.memory_space<vmem>>, vector<8x128xf32>
    %c0_144 = arith.constant 0 : index
    %c530_145 = arith.constant 530 : index
    %155 = vector.load %arg8[%c0_144, %c530_145] : memref<8x1056xf32, #tpu.memory_space<vmem>>, vector<8x128xf32>
    %c0_146 = arith.constant 0 : index
    %c706_147 = arith.constant 706 : index
    %156 = vector.load %arg8[%c0_146, %c706_147] : memref<8x1056xf32, #tpu.memory_space<vmem>>, vector<8x128xf32>
    %c0_148 = arith.constant 0 : index
    %c882 = arith.constant 882 : index
    %157 = vector.load %arg8[%c0_148, %c882] : memref<8x1056xf32, #tpu.memory_space<vmem>>, vector<8x128xf32>
    %158 = tpu.concatenate %154, %155, %156, %157 in 1 : vector<8x128xf32>, vector<8x128xf32>, vector<8x128xf32>, vector<8x128xf32> -> vector<8x512xf32>
    %c0_149 = arith.constant 0 : index
    %c368_150 = arith.constant 368 : index
    %159 = vector.load %arg8[%c0_149, %c368_150] : memref<8x1056xf32, #tpu.memory_space<vmem>>, vector<8x128xf32>
    %c0_151 = arith.constant 0 : index
    %c544_152 = arith.constant 544 : index
    %160 = vector.load %arg8[%c0_151, %c544_152] : memref<8x1056xf32, #tpu.memory_space<vmem>>, vector<8x128xf32>
    %c0_153 = arith.constant 0 : index
    %c720_154 = arith.constant 720 : index
    %161 = vector.load %arg8[%c0_153, %c720_154] : memref<8x1056xf32, #tpu.memory_space<vmem>>, vector<8x128xf32>
    %c0_155 = arith.constant 0 : index
    %c896 = arith.constant 896 : index
    %162 = vector.load %arg8[%c0_155, %c896] : memref<8x1056xf32, #tpu.memory_space<vmem>>, vector<8x128xf32>
    %163 = tpu.concatenate %159, %160, %161, %162 in 1 : vector<8x128xf32>, vector<8x128xf32>, vector<8x128xf32>, vector<8x128xf32> -> vector<8x512xf32>
    %c0_156 = arith.constant 0 : index
    %c369_157 = arith.constant 369 : index
    %164 = vector.load %arg8[%c0_156, %c369_157] : memref<8x1056xf32, #tpu.memory_space<vmem>>, vector<8x128xf32>
    %c0_158 = arith.constant 0 : index
    %c545_159 = arith.constant 545 : index
    %165 = vector.load %arg8[%c0_158, %c545_159] : memref<8x1056xf32, #tpu.memory_space<vmem>>, vector<8x128xf32>
    %c0_160 = arith.constant 0 : index
    %c721_161 = arith.constant 721 : index
    %166 = vector.load %arg8[%c0_160, %c721_161] : memref<8x1056xf32, #tpu.memory_space<vmem>>, vector<8x128xf32>
    %c0_162 = arith.constant 0 : index
    %c897 = arith.constant 897 : index
    %167 = vector.load %arg8[%c0_162, %c897] : memref<8x1056xf32, #tpu.memory_space<vmem>>, vector<8x128xf32>
    %168 = tpu.concatenate %164, %165, %166, %167 in 1 : vector<8x128xf32>, vector<8x128xf32>, vector<8x128xf32>, vector<8x128xf32> -> vector<8x512xf32>
    %c0_163 = arith.constant 0 : index
    %c370_164 = arith.constant 370 : index
    %169 = vector.load %arg8[%c0_163, %c370_164] : memref<8x1056xf32, #tpu.memory_space<vmem>>, vector<8x128xf32>
    %c0_165 = arith.constant 0 : index
    %c546_166 = arith.constant 546 : index
    %170 = vector.load %arg8[%c0_165, %c546_166] : memref<8x1056xf32, #tpu.memory_space<vmem>>, vector<8x128xf32>
    %c0_167 = arith.constant 0 : index
    %c722_168 = arith.constant 722 : index
    %171 = vector.load %arg8[%c0_167, %c722_168] : memref<8x1056xf32, #tpu.memory_space<vmem>>, vector<8x128xf32>
    %c0_169 = arith.constant 0 : index
    %c898 = arith.constant 898 : index
    %172 = vector.load %arg8[%c0_169, %c898] : memref<8x1056xf32, #tpu.memory_space<vmem>>, vector<8x128xf32>
    %173 = tpu.concatenate %169, %170, %171, %172 in 1 : vector<8x128xf32>, vector<8x128xf32>, vector<8x128xf32>, vector<8x128xf32> -> vector<8x512xf32>
    %c0_170 = arith.constant 0 : index
    %c384_171 = arith.constant 384 : index
    %174 = vector.load %arg8[%c0_170, %c384_171] : memref<8x1056xf32, #tpu.memory_space<vmem>>, vector<8x128xf32>
    %c0_172 = arith.constant 0 : index
    %c560_173 = arith.constant 560 : index
    %175 = vector.load %arg8[%c0_172, %c560_173] : memref<8x1056xf32, #tpu.memory_space<vmem>>, vector<8x128xf32>
    %c0_174 = arith.constant 0 : index
    %c736_175 = arith.constant 736 : index
    %176 = vector.load %arg8[%c0_174, %c736_175] : memref<8x1056xf32, #tpu.memory_space<vmem>>, vector<8x128xf32>
    %c0_176 = arith.constant 0 : index
    %c912 = arith.constant 912 : index
    %177 = vector.load %arg8[%c0_176, %c912] : memref<8x1056xf32, #tpu.memory_space<vmem>>, vector<8x128xf32>
    %178 = tpu.concatenate %174, %175, %176, %177 in 1 : vector<8x128xf32>, vector<8x128xf32>, vector<8x128xf32>, vector<8x128xf32> -> vector<8x512xf32>
    %c0_177 = arith.constant 0 : index
    %c385_178 = arith.constant 385 : index
    %179 = vector.load %arg8[%c0_177, %c385_178] : memref<8x1056xf32, #tpu.memory_space<vmem>>, vector<8x128xf32>
    %c0_179 = arith.constant 0 : index
    %c561_180 = arith.constant 561 : index
    %180 = vector.load %arg8[%c0_179, %c561_180] : memref<8x1056xf32, #tpu.memory_space<vmem>>, vector<8x128xf32>
    %c0_181 = arith.constant 0 : index
    %c737_182 = arith.constant 737 : index
    %181 = vector.load %arg8[%c0_181, %c737_182] : memref<8x1056xf32, #tpu.memory_space<vmem>>, vector<8x128xf32>
    %c0_183 = arith.constant 0 : index
    %c913 = arith.constant 913 : index
    %182 = vector.load %arg8[%c0_183, %c913] : memref<8x1056xf32, #tpu.memory_space<vmem>>, vector<8x128xf32>
    %183 = tpu.concatenate %179, %180, %181, %182 in 1 : vector<8x128xf32>, vector<8x128xf32>, vector<8x128xf32>, vector<8x128xf32> -> vector<8x512xf32>
    %c0_184 = arith.constant 0 : index
    %c386_185 = arith.constant 386 : index
    %184 = vector.load %arg8[%c0_184, %c386_185] : memref<8x1056xf32, #tpu.memory_space<vmem>>, vector<8x128xf32>
    %c0_186 = arith.constant 0 : index
    %c562_187 = arith.constant 562 : index
    %185 = vector.load %arg8[%c0_186, %c562_187] : memref<8x1056xf32, #tpu.memory_space<vmem>>, vector<8x128xf32>
    %c0_188 = arith.constant 0 : index
    %c738_189 = arith.constant 738 : index
    %186 = vector.load %arg8[%c0_188, %c738_189] : memref<8x1056xf32, #tpu.memory_space<vmem>>, vector<8x128xf32>
    %c0_190 = arith.constant 0 : index
    %c914 = arith.constant 914 : index
    %187 = vector.load %arg8[%c0_190, %c914] : memref<8x1056xf32, #tpu.memory_space<vmem>>, vector<8x128xf32>
    %188 = tpu.concatenate %184, %185, %186, %187 in 1 : vector<8x128xf32>, vector<8x128xf32>, vector<8x128xf32>, vector<8x128xf32> -> vector<8x512xf32>
    %189 = tpu.concatenate %148, %153, %158, %163, %168, %173, %178, %183, %188 in 0 : vector<8x512xf32>, vector<8x512xf32>, vector<8x512xf32>, vector<8x512xf32>, vector<8x512xf32>, vector<8x512xf32>, vector<8x512xf32>, vector<8x512xf32>, vector<8x512xf32> -> vector<72x512xf32>
    %190 = vector.extract_strided_slice %43 {offsets = [0, 144], sizes = [8, 72], strides = [1, 1]} : vector<8x216xf32> to vector<8x72xf32>
    %cst_191 = arith.constant dense<0.000000e+00> : vector<8x512xf32>
    %191 = tpu.matmul %190, %189, %cst_191 {dimension_numbers = #tpu.dot_dimension_numbers<[1], [0], [0], [1], [0, 0, 1, 1], [], []>} : vector<8x72xf32>, vector<72x512xf32>, vector<8x512xf32> -> vector<8x512xf32>
    %192 = arith.addf %143, %191 : vector<8x512xf32>
    %193 = vector.broadcast %44 : vector<8x1xf32> to vector<8x512xf32>
    %194 = arith.addf %192, %193 : vector<8x512xf32>
    %c0_192 = arith.constant 0 : index
    %c0_193 = arith.constant 0 : index
    %c0_194 = arith.constant 0 : index
    %195 = vector.load %arg6[%c0_192, %c0_193, %c0_194] : memref<1x8x512xf32, #tpu.memory_space<vmem>>, vector<1x8x512xf32>
    %196 = vector.shape_cast %195 : vector<1x8x512xf32> to vector<8x512xf32>
    %197 = arith.addf %194, %196 : vector<8x512xf32>
    %c0_195 = arith.constant 0 : index
    %c0_196 = arith.constant 0 : index
    %c0_197 = arith.constant 0 : index
    %198 = vector.load %arg7[%c0_195, %c0_196, %c0_197] : memref<1x8x512xf32, #tpu.memory_space<vmem>>, vector<1x8x512xf32>
    %199 = vector.shape_cast %198 : vector<1x8x512xf32> to vector<8x512xf32>
    %200 = vector.shape_cast %197 : vector<8x512xf32> to vector<1x8x512xf32>
    tpu.vector_store %arg7[%c0_195, %c0_196, %c0_197], %200 {strides = array<i32>} : memref<1x8x512xf32, #tpu.memory_space<vmem>>, vector<1x8x512xf32>,
    return
  }
  func.func @transform_0(%arg0: i32) -> (i32, i32, i32) {
    %c0_i32 = arith.constant 0 : i32
    %c0_i32_0 = arith.constant 0 : i32
    %c0_i32_1 = arith.constant 0 : i32
    return %arg0, %c0_i32, %c0_i32_0 : i32, i32, i32
  }
  func.func @transform_1(%arg0: i32) -> (i32, i32) {
    %c0_i32 = arith.constant 0 : i32
    %c0_i32_0 = arith.constant 0 : i32
    %c0_i32_1 = arith.constant 0 : i32
    return %c0_i32, %c0_i32_0 : i32, i32
  }
  func.func @transform_2(%arg0: i32) -> (i32, i32) {
    %c0_i32 = arith.constant 0 : i32
    %c0_i32_0 = arith.constant 0 : i32
    %c0_i32_1 = arith.constant 0 : i32
    return %c0_i32, %c0_i32_0 : i32, i32
  }
  func.func @transform_3(%arg0: i32) -> (i32, i32) {
    %c0_i32 = arith.constant 0 : i32
    %c0_i32_0 = arith.constant 0 : i32
    %c0_i32_1 = arith.constant 0 : i32
    return %c0_i32, %c0_i32_0 : i32, i32
  }
  func.func @transform_4(%arg0: i32) -> (i32, i32) {
    %c0_i32 = arith.constant 0 : i32
    %c0_i32_0 = arith.constant 0 : i32
    %c0_i32_1 = arith.constant 0 : i32
    return %c0_i32, %c0_i32_0 : i32, i32
  }
  func.func @transform_5(%arg0: i32) -> (i32, i32, i32) {
    %c0_i32 = arith.constant 0 : i32
    %c0_i32_0 = arith.constant 0 : i32
    %c0_i32_1 = arith.constant 0 : i32
    return %arg0, %c0_i32, %c0_i32_0 : i32, i32, i32
  }
  func.func @transform_6(%arg0: i32) -> (i32, i32, i32) {
    %c0_i32 = arith.constant 0 : i32
    %c0_i32_0 = arith.constant 0 : i32
    %c0_i32_1 = arith.constant 0 : i32
    return %arg0, %c0_i32, %c0_i32_0 : i32, i32, i32
  }
}

</mosaic_0001>

<bundles_post_ra>
// kernel: res_conv3d.2
= control target key start
LH: loop header
LB: loop body
LE: loop exit
PB: predicated region body
PF: predicated region fallthrough
CT: control target
= control target key end

     0   :  { %s1784_s21 = smov 0   ;;  %s2128_s0 = inlined_call_operand.vmem [shape: f32[2,8,512], index: 0, kind: input, shape index: {}]   ;;  %s2129_s1 = inlined_call_operand.vmem [shape: f32[8,1], index: 1, kind: input, shape index: {}]   ;;  %s2130_s2 = inlined_call_operand.vmem [shape: f32[8,1], index: 2, kind: input, shape index: {}]   ;;  %s2131_s3 = inlined_call_operand.vmem [shape: f32[8,216], index: 3, kind: input, shape index: {}]   ;;  %s2132_s4 = inlined_call_operand.vmem [shape: f32[8,1], index: 4, kind: input, shape index: {}]   ;;  %s2133_s5 = inlined_call_operand.vmem [shape: f32[2,8,512], index: 5, kind: output, shape index: {0}]   ;;  %s2134_s6 = inlined_call_operand.vmem [shape: f32[2,8,2], index: 6, kind: output, shape index: {1}]  }
   0x1 LB: > { %s1323_s22 = sadd.s32 4294967295, %s1717_s21   ;;  %p1327_p0 = scmp.ge.s32.totalorder %s1717_s21, 1  ;;  %s1717_s21 = sphi %s1784_s21, %s17_s21  }
   0x2   : > { %p215_p1 = scmp.lt.s32.totalorder %s1717_s21, 3 }
   0x4   : > { %p216_p2 = pnand %p1327_p0, %p215_p1 }
   0x5   : > { %v263_v0 = vld [vmem:[%s2129_s1] sm:$0xff] (!%p216_p2)  ;;  %v1719_v1 = vmov (!%p216_p2), 0   ;;  %v1720_v3 = vmov (!%p216_p2), 0.0   ;;  %p249_p3 = scmp.lt.s32.totalorder (!%p216_p2), %s1323_s22, 1  ;;  %v269_v4 = vlaneseq (!%p216_p2)  ;;  %s1721_s7 = smov (!%p216_p2), 33   ;;  %v1847_v40 = vld [vmem:[%s2131_s3 + $0x8] sm:$0xff] (!%p216_p2) }
   0x6   : > { %219 = sbr.rel (%p216_p2) target bundleno = 872 (0x368), region = 40  ;;  %1485 = vset.pattern.permute.xlu0 (!%p216_p2), %v1719_v1  ;;  %v264_v2 = vld [vmem:[%s2130_s2] sm:$0xff] (!%p216_p2)  ;;  %364 = vst [vmem:[#allocation2 + $0x20] sm:$0xff] (!%p216_p2), %v1720_v3  ;;  %365 = vst [vmem:[#allocation2 + $0x28] sm:$0xff] (!%p216_p2), %v1720_v3  ;;  %774 = vmatprep.mubr.f32.mxu0 (!%p216_p2), %v1720_v3  ;;  %s1722_s8 = smov (!%p216_p2), 65   ;;  %vm368_vm4 = vcmask (!%p216_p2), 261120  }
   0x7   : > { %328 = vperm.xlu0 (!%p216_p2), %1485, %v263_v0   ;;  %361 = vst [vmem:[#allocation2 + $0x8] sm:$0xff] (!%p216_p2), %v1720_v3  ;;  %362 = vst [vmem:[#allocation2 + $0x10] sm:$0xff] (!%p216_p2), %v1720_v3  ;;  %845 = vmatprep.mubr.f32.mxu1 (!%p216_p2), %v1720_v3  ;;  %v270_v5 = vand.u32 (!%p216_p2), 127, %v269_v4  ;;  %v1833_v35 = vld [vmem:[%s2131_s3] sm:$0xff] (!%p216_p2)  ;;  %s1723_s11 = smov (!%p216_p2), 113   ;;  %s1724_s12 = smov (!%p216_p2), 56  }
   0x8   : > { %363 = vst [vmem:[#allocation2 + $0x18] sm:$0xff] (!%p216_p2), %v1720_v3  ;;  %366 = vst [vmem:[#allocation2 + $0x30] sm:$0xff] (!%p216_p2), %v1720_v3  ;;  %s1725_s13 = smov (!%p216_p2), 81   ;;  %vm390_vm5 = vcmask (!%p216_p2), 1047816   ;;  %vm392_vm6 = vcmask (!%p216_p2), 269312   ;;  %vm374_vm7 = vcmask (!%p216_p2), 1048072  }
   0x9   : > { %v272_v6 = vadd.s32 (!%p216_p2), 256, %v270_v5  ;;  %v278_v12 = vand.u32 (!%p216_p2), 15, %v270_v5  ;;  %v271_v13 = vadd.s32 (!%p216_p2), 128, %v270_v5  ;;  %v273_v25 = vadd.s32 (!%p216_p2), 384, %v270_v5  ;;  %369 = vst.msk [vmem:[#allocation2 + $0x40] sm:$0xff] (!%p216_p2), %vm368_vm4, %v1720_v3  ;;  %s1726_s16 = smov (!%p216_p2), 126  }
   0xa   : > { %vm376_vm8 = vcmask (!%p216_p2), 531456   ;;  %vm382_vm9 = vcmask (!%p216_p2), 1048456   ;;  %vm384_vm10 = vcmask (!%p216_p2), 924672   ;;  %vm398_vm11 = vcmask (!%p216_p2), 1048200   ;;  %s1727_s17 = smov (!%p216_p2), 127   ;;  %s1728_s18 = smov (!%p216_p2), 30  }
   0xb   : > { %337 = vperm.xlu0 (!%p216_p2), %1485, %v264_v2   ;;  %v292_v11 = vand.u32 (!%p216_p2), 15, %v272_v6  ;;  %vm1818_vm1 = vcmp.lt.s32.totalorder (!%p216_p2), %v278_v12, 8  ;;  %v285_v24 = vand.u32 (!%p216_p2), 15, %v271_v13  ;;  %v299_v34 = vand.u32 (!%p216_p2), 15, %v273_v25  ;;  %s1729_s19 = smov (!%p216_p2), 46   ;;  %s1730_s20 = smov (!%p216_p2), 31  }
   0xc   : > { %vm400_vm12 = vcmask (!%p216_p2), 662528   ;;  %s1731_s23 = smov (!%p216_p2), 78   ;;  %s1732_s24 = smov (!%p216_p2), 79   ;;  %v404_v63 = vld [vmem:[%s2132_s4] sm:$0xff] (!%p216_p2)  ;;  %vm2138_vm13 = vcmask (!%p216_p2), 1031168   ;;  %vm455_vm14 = vcmask (!%p216_p2), 252928  }
   0xd   : > { %s2167_s22 = smov (!%p249_p3, %s1323_s22), 1  ;;  %vm1814_vm0 = vcmp.lt.s32.totalorder %v292_v11, 8  ;;  %vm1826_vm2 = vcmp.lt.s32.totalorder %v285_v24, 8  ;;  %vm1837_vm3 = vcmp.lt.s32.totalorder %v299_v34, 8  ;;  %s1733_s25 = smov 32   ;;  %vm417_vm15 = vcmask 654336  }
   0xe   : > { %s2135_s27 = sshll.u32 %s2167_s22, 5  ;;  %s1734_s26 = smov 63  }
   0xf   : > { %s253_s30 = scalar_lea.vmem %s2128_s0, %s2135_s27  ;;  %s1735_s28 = smov 80  }
  0x10   : > { %v266_v8 = vld [vmem:[%s253_s30 + $0x8] sm:$0xff]  ;;  %v267_v9 = vld [vmem:[%s253_s30 + $0x10] sm:$0xff]  ;;  %v265_v10 = vld [vmem:[%s253_s30] sm:$0xff]  ;;  %s1736_s29 = smov 111   ;;  %s1740_s9 = smov 48  }
  0x11   : > { %v268_v17 = vld [vmem:[%s253_s30 + $0x18] sm:$0xff]  ;;  %s1737_s30 = smov 64   ;;  %s1741_s10 = smov 96   ;;  %v1018_v57 = vld [vmem:[#allocation2 + $0x40] sm:$0xff] }
  0x12   : > { %s1745_s14 = smov 15   ;;  %s1746_s15 = smov 94   ;;  %v1691_v59 = vpack.i.bf16 %v1018_v57, %v1720_v3 }
  0x13   : > { %s1748_s27 = smov 95  }
  0x86   : > { %v329_v7 = vpop.permute.xlu0 %328 }
  0x87   : > { %v332_v14 = vmul.f32 %v329_v7, %v266_v8  ;;  %v333_v15 = vmul.f32 %v329_v7, %v267_v9  ;;  %v331_v16 = vmul.f32 %v329_v7, %v265_v10  ;;  %v334_v26 = vmul.f32 %v329_v7, %v268_v17 }
  0x8a   : > { %v338_v18 = vpop.permute.xlu0 %337 }
  0x8b   : > { %v342_v19 = vadd.f32 %v338_v18, %v333_v15  ;;  %v340_v20 = vadd.f32 %v338_v18, %v331_v16  ;;  %v341_v21 = vadd.f32 %v338_v18, %v332_v14  ;;  %v343_v32 = vadd.f32 %v338_v18, %v334_v26 }
  0x8d   : > { %v346_v27 = vmax.f32 %v342_v19, 0.0  ;;  %v344_v28 = vmax.f32 %v340_v20, 0.0  ;;  %v345_v31 = vmax.f32 %v341_v21, 0.0  ;;  %v347_v37 = vmax.f32 %v343_v32, 0.0 }
  0x8f   : > { %v358_v29 = vsel %vm1814_vm0, %v346_v27, 0.0  ;;  %v356_v30 = vsel %vm1818_vm1, %v344_v28, 0.0  ;;  %v357_v36 = vsel %vm1826_vm2, %v345_v31, 0.0  ;;  %v359_v39 = vsel %vm1837_vm3, %v347_v37, 0.0 }
  0x90   : > { %387 = vrot.lane.b32.xlu0 %v358_v29, %s1721_s7  ;;  %371 = vrot.lane.b32.xlu1 %v356_v30, %s1722_s8  ;;  %s1738_s7 = smov 16   ;;  %s1739_s8 = smov 112  }
  0x94   : > { %379 = vrot.lane.b32.xlu1 %v357_v36, %s1723_s11  ;;  %701 = vrot.lane.b32.xlu0 %v1833_v35, %s1724_s12  ;;  %s1742_s11 = smov 62  }
  0x98   : > { %395 = vrot.lane.b32.xlu1 %v359_v39, %s1725_s13  ;;  %s1744_s13 = smov 110  }
  0x9c   : > { %703 = vrot.lane.b32.xlu1 %v1847_v40, %s1724_s12  ;;  %s1743_s12 = smov 14  }
 0x102   : > { %v388_v41 = vpop.permute.xlu0 %387  ;;  %v372_v42 = vpop.permute.xlu1 %371 }
 0x103   : > { %391 = vst.msk [vmem:[#allocation2 + $0x20] sm:$0xff] %vm390_vm5, %v388_v41  ;;  %vm448_vm5 = vcmask 646144  }
 0x104   : > { %393 = vst.msk [vmem:[#allocation2 + $0x28] sm:$0xff] %vm392_vm6, %v388_v41  ;;  %vm503_vm6 = vcmask 523264  }
 0x105   : > { %375 = vst.msk [vmem:[#allocation2 + $0x8] sm:$0xff] %vm374_vm7, %v372_v42  ;;  %vm530_vm7 = vcmask 515072  }
 0x106   : > { %377 = vst.msk [vmem:[#allocation2 + $0x10] sm:$0xff] %vm376_vm8, %v372_v42  ;;  %v380_v43 = vpop.permute.xlu1 %379  ;;  %v1925_v61 = vpop.permute.xlu0 %701  ;;  %vm2139_vm8 = vcmask 916480  }
 0x107   : > { %383 = vst.msk [vmem:[#allocation2 + $0x10] sm:$0xff] %vm382_vm9, %v380_v43  ;;  %vm2136_vm9 = vcmask 908288  }
 0x108   : > { %385 = vst.msk [vmem:[#allocation2 + $0x18] sm:$0xff] %vm384_vm10, %v380_v43  ;;  %vm2141_vm10 = vcmask 244736  }
 0x10a   : > { %v396_v44 = vpop.permute.xlu1 %395  ;;  %v409_v45 = vld [vmem:[#allocation2 + $0x20] sm:$0xff] }
 0x10b   : > { %399 = vst.msk [vmem:[#allocation2 + $0x28] sm:$0xff] %vm398_vm11, %v396_v44  ;;  %vm2137_vm11 = vcmask 130048  }
 0x10c   : > { %401 = vst.msk [vmem:[#allocation2 + $0x30] sm:$0xff] %vm400_vm12, %v396_v44  ;;  %v1852_v46 = vld [vmem:[#allocation2 + $0x8] sm:$0xff]  ;;  %vm2140_vm12 = vcmask 637952  }
 0x10d   : > { %v1862_v49 = vpack.i.bf16 %v1852_v46, %v1720_v3 }
 0x10e   : > { %v407_v50 = vld [vmem:[#allocation2 + $0x10] sm:$0xff]  ;;  %v1920_v60 = vpop.permute.xlu1 %703 }
 0x10f   : > { %v1854_v47 = vld [vmem:[#allocation2 + $0x18] sm:$0xff]  ;;  %v1511_v53 = vpack.i.bf16 %v407_v50, %v1852_v46 }
 0x110   : > { %631 = vrot.lane.b32.xlu1 %v1854_v47, %s1726_s16  ;;  %v1486_v48 = vpack.i.bf16 %v409_v45, %v1854_v47  ;;  %v1501_v52 = vpack.i.bf16 %v1854_v47, %v407_v50 }
 0x112   : > { %1487 = vrot.lane.b32.xlu0 %v1486_v48, %s1727_s17  ;;  %v410_v54 = vld [vmem:[#allocation2 + $0x28] sm:$0xff] }
 0x113   : > { %v1867_v51 = vld [vmem:[#allocation2 + $0x30] sm:$0xff]  ;;  %v1531_v56 = vpack.i.bf16 %v410_v54, %v409_v45 }
 0x114   : > { %1492 = vrot.lane.b32.xlu1 %v1862_v49, %s1727_s17  ;;  %v1521_v55 = vpack.i.bf16 %v1867_v51, %v410_v54  ;;  %v1681_v58 = vpack.i.bf16 %v1720_v3, %v1867_v51 }
 0x116   : > { %633 = vrot.lane.b32.xlu0 %v409_v45, %s1726_s16 }
 0x118   : > { %695 = vrot.lane.b32.xlu1 %v1867_v51, %s1728_s18 }
 0x11a   : > { %624 = vrot.lane.b32.xlu0 %v1852_v46, %s1729_s19 }
 0x11c   : > { %1502 = vrot.lane.b32.xlu1 %v1501_v52, %s1730_s20 }
 0x11e   : > { %637 = vrot.lane.b32.xlu0 %v409_v45, %s1731_s23 }
 0x120   : > { %1512 = vrot.lane.b32.xlu1 %v1511_v53, %s1732_s24 }
 0x122   : > { %1497 = vrot.lane.b32.xlu0 %v1501_v52, %s1733_s25 }
 0x124   : > { %1522 = vrot.lane.b32.xlu1 %v1521_v55, %s1734_s26 }
 0x126   : > { %1507 = vrot.lane.b32.xlu0 %v1511_v53, %s1735_s28 }
 0x128   : > { %1532 = vrot.lane.b32.xlu1 %v1531_v56, %s1736_s29 }
 0x12a   : > { %1517 = vrot.lane.b32.xlu0 %v1521_v55, %s1737_s30 }
 0x12c   : > { %1542 = vrot.lane.b32.xlu1 %v1501_v52, %s1738_s7 }
 0x12e   : > { %1527 = vrot.lane.b32.xlu0 %v1531_v56, %s1739_s8 }
 0x130   : > { %1552 = vrot.lane.b32.xlu1 %v1511_v53, %s1737_s30  ;;  %s1747_s30 = smov 47  }
 0x132   : > { %1537 = vrot.lane.b32.xlu0 %v1501_v52, %s1728_s18 }
 0x134   : > { %1562 = vrot.lane.b32.xlu1 %v1521_v55, %s1740_s9 }
 0x136   : > { %1547 = vrot.lane.b32.xlu0 %v1511_v53, %s1731_s23 }
 0x138   : > { %1572 = vrot.lane.b32.xlu1 %v1531_v56, %s1741_s10 }
 0x13a   : > { %1557 = vrot.lane.b32.xlu0 %v1521_v55, %s1742_s11 }
 0x13c   : > { %1582 = vrot.lane.b32.xlu1 %v1501_v52, %s1743_s12 }
 0x13e   : > { %1567 = vrot.lane.b32.xlu0 %v1531_v56, %s1744_s13 }
 0x140   : > { %1592 = vrot.lane.b32.xlu1 %v1511_v53, %s1742_s11 }
 0x142   : > { %1577 = vrot.lane.b32.xlu0 %v1501_v52, %s1745_s14 }
 0x144   : > { %1602 = vrot.lane.b32.xlu1 %v1521_v55, %s1729_s19 }
 0x146   : > { %1587 = vrot.lane.b32.xlu0 %v1511_v53, %s1734_s26 }
 0x148   : > { %1612 = vrot.lane.b32.xlu1 %v1531_v56, %s1746_s15 }
 0x14a   : > { %1597 = vrot.lane.b32.xlu0 %v1521_v55, %s1747_s30 }
 0x14c   : > { %1617 = vrot.lane.b32.xlu1 %v1511_v53, %s1740_s9 }
 0x14e   : > { %1607 = vrot.lane.b32.xlu0 %v1531_v56, %s1748_s27 }
 0x150   : > { %1627 = vrot.lane.b32.xlu1 %v1521_v55, %s1733_s25 }
 0x152   : > { %1622 = vrot.lane.b32.xlu0 %v1511_v53, %s1747_s30 }
 0x154   : > { %1637 = vrot.lane.b32.xlu1 %v1531_v56, %s1735_s28 }
 0x156   : > { %1632 = vrot.lane.b32.xlu0 %v1521_v55, %s1730_s20 }
 0x158   : > { %626 = vrot.lane.b32.xlu1 %v407_v50, %s1729_s19 }
 0x15a   : > { %1642 = vrot.lane.b32.xlu0 %v1531_v56, %s1732_s24 }
 0x15c   : > { %639 = vrot.lane.b32.xlu1 %v410_v54, %s1731_s23  ;;  %s1332_s23 = sshll.u32 %s2167_s22, 3 }
 0x15d   : > { %s262_s26 = scalar_lea.vmem %s2134_s6, %s1332_s23 }
 0x15e   : > { %693 = vrot.lane.b32.xlu0 %v410_v54, %s1728_s18 }
 0x160   : > { %1652 = vrot.lane.b32.xlu1 %v1862_v49, %s1739_s8 }
 0x162   : > { %1647 = vrot.lane.b32.xlu0 %v1862_v49, %s1726_s16 }
 0x164   : > { %1662 = vrot.lane.b32.xlu1 %v1862_v49, %s1744_s13 }
 0x166   : > { %1657 = vrot.lane.b32.xlu0 %v1862_v49, %s1736_s29 }
 0x168   : > { %1672 = vrot.lane.b32.xlu1 %v1862_v49, %s1748_s27 }
 0x16a   : > { %1667 = vrot.lane.b32.xlu0 %v1862_v49, %s1741_s10 }
 0x16c   : > { %620 = vrot.lane.b32.xlu1 %v1852_v46, %s1746_s15 }
 0x16e   : > { %618 = vrot.lane.b32.xlu0 %v1720_v3, %s1746_s15 }
 0x170   : > { %1682 = vrot.lane.b32.xlu1 %v1681_v58, %s1745_s14 }
 0x172   : > { %1677 = vrot.lane.b32.xlu0 %v1681_v58, %s1738_s7 }
 0x174   : > { %1692 = vrot.lane.b32.xlu1 %v1691_v59, %s1727_s17 }
 0x176   : > { %1687 = vrot.lane.b32.xlu0 %v1681_v58, %s1743_s12 }
 0x178   : > { %1702 = vrot.lane.b32.xlu1 %v1691_v59, %s1739_s8 }
 0x17a   : > { %1697 = vrot.lane.b32.xlu0 %v1691_v59, %s1726_s16  ;;  %s2165_s16 = sshll.u32 %s2167_s22, 5 }
 0x17b   : > { %s258_s20 = scalar_lea.vmem %s2133_s5, %s2165_s16 }
 0x17c   : > { %1044 = vrot.lane.b32.xlu1 %v1720_v3, %s1744_s13 }
 0x17e   : > { %1707 = vrot.lane.b32.xlu0 %v1691_v59, %s1736_s29 }
 0x180   : > { %1050 = vrot.lane.b32.xlu1 %v1847_v40, %s1739_s8 }
 0x182   : > { %1046 = vrot.lane.b32.xlu0 %v1018_v57, %s1744_s13  ;;  %v632_v62 = vpop.permute.xlu1 %631 }
 0x184   : > { %v1933_v0 = vpop.permute.xlu0 %1487 }
 0x186   : > { %1202 = vperm.xlu0 %1485, %v404_v63   ;;  %v1935_v1 = vpop.permute.xlu1 %1492 }
 0x188   : > { %v634_v2 = vpop.permute.xlu0 %633 }
 0x189   : > { %v1938_v4 = vsel %vm2138_vm13, %v632_v62, %v634_v2  ;;  %vm517_vm13 = vcmask 785408  }
 0x18a   : > { %v1940_v5 = vpop.permute.xlu1 %695 }
 0x18c   : > { %v1942_v6 = vpop.permute.xlu0 %624 }
 0x18e   : > { %v1503_v7 = vpop.permute.xlu1 %1502 }
 0x18f   : > { %v1505_v10 = vunpack.i.h.bf16 %v1503_v7  ;;  %v1504_v11 = vunpack.i.l.bf16 %v1503_v7 }
 0x190   : > { %v1944_v8 = vpop.permute.xlu0 %637 }
 0x191   : > { %v456_v19 = vsel %vm455_vm14, %v1504_v11, %v1505_v10 }
 0x192   : > { %v1513_v9 = vpop.permute.xlu1 %1512 }
 0x193   : > { %v1515_v16 = vunpack.i.h.bf16 %v1513_v9  ;;  %v1514_v17 = vunpack.i.l.bf16 %v1513_v9 }
 0x194   : > { %v1498_v12 = vpop.permute.xlu0 %1497 }
 0x195   : > { %v1500_v13 = vunpack.i.h.bf16 %v1498_v12  ;;  %v1499_v14 = vunpack.i.l.bf16 %v1498_v12  ;;  %v449_v30 = vsel %vm448_vm5, %v1514_v17, %v1515_v16 }
 0x196   : > { %v1523_v15 = vpop.permute.xlu1 %1522 }
 0x197   : > { %v425_v18 = vsel %vm368_vm4, %v1499_v14, %v1500_v13  ;;  %v1525_v27 = vunpack.i.h.bf16 %v1523_v15  ;;  %v1524_v28 = vunpack.i.l.bf16 %v1523_v15 }
 0x198   : > { %v1508_v20 = vpop.permute.xlu0 %1507  ;;  %v1948_v21 = vpack.c.bf16 %v456_v19, %v425_v18 }
 0x199   : > { %v1510_v24 = vunpack.i.h.bf16 %v1508_v20  ;;  %v1509_v25 = vunpack.i.l.bf16 %v1508_v20  ;;  %v655_v42 = vsel %vm530_vm7, %v1524_v28, %v1525_v27 }
 0x19a   : > { %v1533_v26 = vpop.permute.xlu1 %1532  ;;  %1344 = vmatprep.subr.bf16.mxu0 %v1948_v21 }
 0x19b   : > { %v418_v29 = vsel %vm417_vm15, %v1509_v25, %v1510_v24  ;;  %v1535_v39 = vunpack.i.h.bf16 %v1533_v26  ;;  %v1534_v40 = vunpack.i.l.bf16 %v1533_v26 }
 0x19c   : > { %v1518_v31 = vpop.permute.xlu0 %1517  ;;  %v1953_v32 = vpack.c.bf16 %v449_v30, %v418_v29 }
 0x19d   : > { %v1520_v34 = vunpack.i.h.bf16 %v1518_v31  ;;  %v1519_v36 = vunpack.i.l.bf16 %v1518_v31  ;;  %v463_v52 = vsel %vm2136_vm9, %v1534_v40, %v1535_v39  ;;  %vm557_vm9 = vcmask 506880  }
 0x19e   : > { %v1543_v37 = vpop.permute.xlu1 %1542  ;;  %1346 = vmatpush1.bf16.msra.mxu0 %v1953_v32 }
 0x19f   : > { %v649_v41 = vsel %vm503_vm6, %v1519_v36, %v1520_v34  ;;  %v1545_v49 = vunpack.i.h.bf16 %v1543_v37  ;;  %v1544_v50 = vunpack.i.l.bf16 %v1543_v37 }
 0x1a0   : > { %v1528_v43 = vpop.permute.xlu0 %1527  ;;  %v1958_v44 = vpack.c.bf16 %v655_v42, %v649_v41 }
 0x1a1   : > { %v1530_v45 = vunpack.i.h.bf16 %v1528_v43  ;;  %v1529_v46 = vunpack.i.l.bf16 %v1528_v43  ;;  %v511_v63 = vsel %vm2137_vm11, %v1544_v50, %v1545_v49  ;;  %vm584_vm11 = vcmask 392192  }
 0x1a2   : > { %v1553_v48 = vpop.permute.xlu1 %1552  ;;  %1360 = vmatprep.subr.bf16.mxu1 %v1958_v44 }
 0x1a3   : > { %v434_v51 = vsel %vm2139_vm8, %v1529_v46, %v1530_v45  ;;  %v1555_v58 = vunpack.i.h.bf16 %v1553_v48  ;;  %v1554_v59 = vunpack.i.l.bf16 %v1553_v48  ;;  %vm2143_vm8 = vcmask 121856  }
 0x1a4   : > { %v1538_v53 = vpop.permute.xlu0 %1537  ;;  %v1963_v54 = vpack.c.bf16 %v463_v52, %v434_v51  ;;  %v1490_v46 = vunpack.i.h.bf16 %v1933_v0  ;;  %v1489_v48 = vunpack.i.l.bf16 %v1933_v0 }
 0x1a5   : > { %v1540_v55 = vunpack.i.h.bf16 %v1538_v53  ;;  %v1539_v56 = vunpack.i.l.bf16 %v1538_v53  ;;  %v504_v15 = vsel %vm503_vm6, %v1554_v59, %v1555_v58  ;;  %vm490_vm6 = vcmask 900096  }
 0x1a6   : > { %v1563_v57 = vpop.permute.xlu1 %1562  ;;  %1362 = vmatpush1.bf16.msra.mxu1 %v1963_v54 }
 0x1a7   : > { %v484_v62 = vsel %vm2141_vm10, %v1539_v56, %v1540_v55  ;;  %v1565_v12 = vunpack.i.h.bf16 %v1563_v57  ;;  %v1564_v13 = vunpack.i.l.bf16 %v1563_v57  ;;  %vm441_vm10 = vcmask 1039360  }
 0x1a8   : > { %v1548_v2 = vpop.permute.xlu0 %1547  ;;  %v1968_v7 = vpack.c.bf16 %v511_v63, %v484_v62  ;;  %v610_v0 = vsel %vm441_vm10, %v1489_v48, %v1490_v46 }
 0x1a9   : > { %v1550_v9 = vunpack.i.h.bf16 %v1548_v2  ;;  %v1549_v10 = vunpack.i.l.bf16 %v1548_v2  ;;  %v667_v27 = vsel %vm584_vm11, %v1564_v13, %v1565_v12 }
 0x1aa   : > { %v1573_v11 = vpop.permute.xlu1 %1572  ;;  %1348 = vmatprep.subr.bf16.mxu0 %v1968_v7 }
 0x1ab   : > { %v477_v14 = vsel %vm2140_vm12, %v1549_v10, %v1550_v9  ;;  %v1575_v24 = vunpack.i.h.bf16 %v1573_v11  ;;  %v1574_v25 = vunpack.i.l.bf16 %v1573_v11  ;;  %vm2142_vm12 = vcmask 113664  }
 0x1ac   : > { %v1558_v16 = vpop.permute.xlu0 %1557  ;;  %v1973_v17 = vpack.c.bf16 %v504_v15, %v477_v14  ;;  %v1999_v14 = vpack.c.bf16 %v610_v0, %v1854_v47 }
 0x1ad   : > { %v1560_v18 = vunpack.i.h.bf16 %v1558_v16  ;;  %v1559_v19 = vunpack.i.l.bf16 %v1558_v16  ;;  %v518_v40 = vsel %vm517_vm13, %v1574_v25, %v1575_v24 }
 0x1ae   : > { %v1583_v20 = vpop.permute.xlu1 %1582  ;;  %1350 = vmatpush1.bf16.msra.mxu0 %v1973_v17 }
 0x1af   : > { %v661_v26 = vsel %vm557_vm9, %v1559_v19, %v1560_v18  ;;  %v1585_v36 = vunpack.i.h.bf16 %v1583_v20  ;;  %v1584_v37 = vunpack.i.l.bf16 %v1583_v20 }
 0x1b0   : > { %v1568_v28 = vpop.permute.xlu0 %1567  ;;  %v1978_v29 = vpack.c.bf16 %v667_v27, %v661_v26 }
 0x1b1   : > { %v1570_v30 = vunpack.i.h.bf16 %v1568_v28  ;;  %v1569_v31 = vunpack.i.l.bf16 %v1568_v28  ;;  %v565_v53 = vsel %vm2142_vm12, %v1584_v37, %v1585_v36  ;;  %vm603_vm12 = vcmask 384000  }
 0x1b2   : > { %v1593_v34 = vpop.permute.xlu1 %1592  ;;  %1364 = vmatprep.subr.bf16.mxu1 %v1978_v29 }
 0x1b3   : > { %v491_v39 = vsel %vm490_vm6, %v1569_v31, %v1570_v30  ;;  %v1595_v50 = vunpack.i.h.bf16 %v1593_v34  ;;  %v1594_v51 = vunpack.i.l.bf16 %v1593_v34 }
 0x1b4   : > { %v1578_v41 = vpop.permute.xlu0 %1577  ;;  %v1983_v42 = vpack.c.bf16 %v518_v40, %v491_v39 }
 0x1b5   : > { %v1580_v43 = vunpack.i.h.bf16 %v1578_v41  ;;  %v1579_v45 = vunpack.i.l.bf16 %v1578_v41  ;;  %v558_v9 = vsel %vm557_vm9, %v1594_v51, %v1595_v50  ;;  %vm2144_vm9 = vcmask 769024  }
 0x1b6   : > { %v1603_v49 = vpop.permute.xlu1 %1602  ;;  %1366 = vmatpush1.bf16.msra.mxu1 %v1983_v42  ;;  %v1495_v41 = vunpack.i.h.bf16 %v1935_v1 }
 0x1b7   : > { %v538_v52 = vsel %vm2143_vm8, %v1579_v45, %v1580_v43  ;;  %v1605_v62 = vunpack.i.h.bf16 %v1603_v49  ;;  %v1604_v63 = vunpack.i.l.bf16 %v1603_v49  ;;  %vm628_vm8 = vcmask 375808  }
 0x1b8   : > { %v1588_v55 = vpop.permute.xlu0 %1587  ;;  %v1990_v56 = vpack.c.bf16 %v565_v53, %v538_v52  ;;  %v1494_v43 = vunpack.i.l.bf16 %v1935_v1 }
 0x1b9   : > { %v1590_v57 = vunpack.i.h.bf16 %v1588_v55  ;;  %v1589_v58 = vunpack.i.l.bf16 %v1588_v55  ;;  %v679_v20 = vsel %vm628_vm8, %v1604_v63, %v1605_v62 }
 0x1ba   : > { %v1613_v59 = vpop.permute.xlu1 %1612  ;;  %1352 = vmatprep.subr.bf16.mxu0 %v1990_v56 }
 0x1bb   : > { %v531_v2 = vsel %vm530_vm7, %v1589_v58, %v1590_v57  ;;  %v1615_v16 = vunpack.i.h.bf16 %v1613_v59  ;;  %v1614_v18 = vunpack.i.l.bf16 %v1613_v59  ;;  %vm544_vm7 = vcmask 777216  }
 0x1bc   : > { %v1598_v10 = vpop.permute.xlu0 %1597  ;;  %v1996_v11 = vpack.c.bf16 %v558_v9, %v531_v2  ;;  %v442_v57 = vsel %vm441_vm10, %v1494_v43, %v1495_v41 }
 0x1bd   : > { %v1600_v12 = vunpack.i.h.bf16 %v1598_v10  ;;  %v1599_v13 = vunpack.i.l.bf16 %v1598_v10  ;;  %v572_v34 = vsel %vm2144_vm9, %v1614_v18, %v1615_v16  ;;  %vm705_vm9 = vcmask 457728  }
 0x1be   : > { %v1618_v15 = vpop.permute.xlu1 %1617  ;;  %1354 = vmatpush1.bf16.msra.mxu0 %v1996_v11 }
 0x1bf   : > { %1356 = vmatprep.subr.bf16.mxu0 %v1999_v14  ;;  %v673_v19 = vsel %vm603_vm12, %v1599_v13, %v1600_v12  ;;  %v1620_v28 = vunpack.i.h.bf16 %v1618_v15  ;;  %v1619_v30 = vunpack.i.l.bf16 %v1618_v15  ;;  %v706_v13 = vsel %vm705_vm9, %v1925_v61, %v1920_v60 }
 0x1c0   : > { %v1608_v24 = vpop.permute.xlu0 %1607  ;;  %v2005_v25 = vpack.c.bf16 %v679_v20, %v673_v19  ;;  %v1377_v15 = vpack.c.bf16 %v442_v57, %v1720_v3  ;;  %vm2161_vm9 = vcmask 113664  }
 0x1c1   : > { %v1610_v26 = vunpack.i.h.bf16 %v1608_v24  ;;  %v1609_v27 = vunpack.i.l.bf16 %v1608_v24  ;;  %v585_v49 = vsel %vm584_vm11, %v1619_v30, %v1620_v28  ;;  %vm707_vm11 = vcmask 588800  }
 0x1c2   : > { %v1628_v47 = vpop.permute.xlu1 %1627  ;;  %1368 = vmatprep.subr.bf16.mxu1 %v2005_v25 }
 0x1c3   : > { %v545_v31 = vsel %vm544_vm7, %v1609_v27, %v1610_v26  ;;  %v1630_v46 = vunpack.i.h.bf16 %v1628_v47  ;;  %v1629_v48 = vunpack.i.l.bf16 %v1628_v47 }
 0x1c4   : > { %v1623_v36 = vpop.permute.xlu0 %1622  ;;  %v2010_v37 = vpack.c.bf16 %v572_v34, %v545_v31 }
 0x1c5   : > { %v1625_v39 = vunpack.i.h.bf16 %v1623_v36  ;;  %v1624_v40 = vunpack.i.l.bf16 %v1623_v36  ;;  %v685_v0 = vsel %vm368_vm4, %v1629_v48, %v1630_v46  ;;  %vm2153_vm4 = vcmask 244736  }
 0x1c6   : > { %v1638_v45 = vpop.permute.xlu1 %1637  ;;  %1370 = vmatpush1.bf16.msra.mxu1 %v2010_v37 }
 0x1c7   : > { %v604_v50 = vsel %vm603_vm12, %v1624_v40, %v1625_v39  ;;  %v1640_v1 = vunpack.i.h.bf16 %v1638_v45  ;;  %v1639_v59 = vunpack.i.l.bf16 %v1638_v45  ;;  %vm2158_vm12 = vcmask 769024  }
 0x1c8   : > { %v1633_v51 = vpop.permute.xlu0 %1632  ;;  %v2017_v52 = vpack.c.bf16 %v604_v50, %v585_v49 }
 0x1c9   : > { %v1635_v53 = vunpack.i.h.bf16 %v1633_v51  ;;  %v1634_v55 = vunpack.i.l.bf16 %v1633_v51  ;;  %v591_v18 = vsel %vm417_vm15, %v1639_v59, %v1640_v1  ;;  %vm2155_vm15 = vcmask 916480  }
 0x1ca   : > { %v627_v58 = vpop.permute.xlu1 %626  ;;  %1358 = vmatpush1.bf16.msra.mxu0 %v2017_v52 }
 0x1cb   : > { %726 = vmatprep.subr.mxu0 %v1938_v4  ;;  %v691_v62 = vsel %vm455_vm14, %v1634_v55, %v1635_v53  ;;  %v2028_v12 = vsel %vm628_vm8, %v1942_v6, %v627_v58  ;;  %vm2154_vm14 = vcmask 637952   ;;  %vm2157_vm8 = vcmask 908288  }
 0x1cc   : > { %v1643_v63 = vpop.permute.xlu0 %1642  ;;  %v2024_v2 = vpack.c.bf16 %v691_v62, %v685_v0 }
 0x1cd   : > { %v1645_v9 = vunpack.i.h.bf16 %v1643_v63  ;;  %v1644_v10 = vunpack.i.l.bf16 %v1643_v63 }
 0x1ce   : > { %v640_v16 = vpop.permute.xlu1 %639  ;;  %727 = vmatpush1.msra.mxu0 %v2028_v12  ;;  %1372 = vmatprep.subr.bf16.mxu1 %v2024_v2 }
 0x1cf   : > { %1333 = vmatmul.mubr.msk.f32.vlgmr.msra.gmra.mrb[0].mxu0 %vm707_vm11, %v706_v13  ;;  %1376 = vmatprep.subr.bf16.mxu0 %v1953_v32  ;;  %v616_v19 = vsel %vm448_vm5, %v1644_v10, %v1645_v9  ;;  %v2051_v28 = vsel %vm2154_vm14, %v1944_v8, %v640_v16  ;;  %vm2156_vm5 = vcmask 1031168   ;;  %vm2164_vm14 = vmmov %vm2157_vm8 }
 0x1d0   : > { %v694_v6 = vpop.permute.xlu0 %693  ;;  %1378 = vmatpush1.bf16.msra.mxu0 %v1377_v15  ;;  %v2039_v20 = vpack.c.bf16 %v616_v19, %v591_v18  ;;  %918 = vmatprep.mubr.f32.mxu0 %v1720_v3 }
 0x1d1   : > { %1380 = vmatprep.subr.bf16.mxu0 %v1973_v17  ;;  %v2045_v60 = vsel %vm2153_vm4, %v694_v6, %v1940_v5  ;;  %vm2162_vm4 = vmmov %vm2156_vm5 }
 0x1d2   : > { %v1653_v61 = vpop.permute.xlu1 %1652  ;;  %1374 = vmatpush1.bf16.msra.mxu1 %v2039_v20 }
 0x1d3   : > { %v1655_v32 = vunpack.i.h.bf16 %v1653_v61  ;;  %v1654_v24 = vunpack.i.l.bf16 %v1653_v61  ;;  %797 = vmatprep.subr.mxu1 %v2045_v60 }
 0x1d4   : > { %v1648_v26 = vpop.permute.xlu0 %1647 }
 0x1d5   : > { %v1650_v27 = vunpack.i.h.bf16 %v1648_v26  ;;  %v1649_v47 = vunpack.i.l.bf16 %v1648_v26  ;;  %v497_v5 = vsel %vm2155_vm15, %v1654_v24, %v1655_v32 }
 0x1d6   : > { %v1663_v30 = vpop.permute.xlu1 %1662  ;;  %798 = vmatpush1.msra.mxu1 %v2051_v28 }
 0x1d7   : > { %v470_v17 = vsel %vm2156_vm5, %v1649_v47, %v1650_v27  ;;  %v1665_v31 = vunpack.i.h.bf16 %v1663_v30  ;;  %v1664_v34 = vunpack.i.l.bf16 %v1663_v30  ;;  %1334 = vmatmul.mubr.msk.f32.vlgmr.msra.gmra.mrb[0].mxu1 %vm707_vm11, %v706_v13  ;;  %1392 = vmatprep.subr.bf16.mxu1 %v1963_v54 }
 0x1d8   : > { %v1381_v36 = vpack.c.bf16 %v497_v5, %v470_v17  ;;  %v1658_v39 = vpop.permute.xlu0 %1657  ;;  %1394 = vmatpush1.bf16.msra.mxu1 %v1948_v21  ;;  %989 = vmatprep.mubr.f32.mxu1 %v1720_v3 }
 0x1d9   : > { %v1660_v8 = vunpack.i.h.bf16 %v1658_v39  ;;  %v1659_v40 = vunpack.i.l.bf16 %v1658_v39  ;;  %1396 = vmatprep.subr.bf16.mxu1 %v1983_v42  ;;  %v551_v43 = vsel %vm490_vm6, %v1664_v34, %v1665_v31 }
 0x1da   : > { %v1673_v41 = vpop.permute.xlu1 %1672  ;;  %1382 = vmatpush1.bf16.msra.mxu0 %v1381_v36 }
 0x1db   : > { %v524_v45 = vsel %vm2157_vm8, %v1659_v40, %v1660_v8  ;;  %v1675_v46 = vunpack.i.h.bf16 %v1673_v41  ;;  %v1674_v48 = vunpack.i.l.bf16 %v1673_v41  ;;  %1384 = vmatprep.subr.bf16.mxu0 %v1996_v11 }
 0x1dc   : > { %v1385_v49 = vpack.c.bf16 %v551_v43, %v524_v45  ;;  %v1668_v50 = vpop.permute.xlu0 %1667  ;;  %1398 = vmatpush1.bf16.msra.mxu1 %v1968_v7 }
 0x1dd   : > { %v1670_v51 = vunpack.i.h.bf16 %v1668_v50  ;;  %v1669_v53 = vunpack.i.l.bf16 %v1668_v50  ;;  %1400 = vmatprep.subr.bf16.mxu1 %v2010_v37  ;;  %v597_v57 = vsel %vm544_vm7, %v1674_v48, %v1675_v46  ;;  %vm2160_vm7 = vcmask 121856  }
 0x1de   : > { %v621_v55 = vpop.permute.xlu1 %620  ;;  %1386 = vmatpush1.bf16.msra.mxu0 %v1385_v49 }
 0x1df   : > { %v578_v58 = vsel %vm517_vm13, %v1669_v53, %v1670_v51  ;;  %1388 = vmatprep.subr.bf16.mxu0 %v2017_v52  ;;  %vm2159_vm13 = vcmask 130048  }
 0x1e0   : > { %v1389_v1 = vpack.c.bf16 %v597_v57, %v578_v58  ;;  %v619_v59 = vpop.permute.xlu0 %618  ;;  %1402 = vmatpush1.bf16.msra.mxu1 %v1990_v56 }
 0x1e1   : > { %1404 = vmatprep.subr.bf16.mxu1 %v2039_v20  ;;  %v622_v9 = vsel %vm2158_vm12, %v619_v59, %v621_v55 }
 0x1e2   : > { %v1683_v11 = vpop.permute.xlu1 %1682  ;;  %1390 = vmatpush1.bf16.msra.mxu0 %v1389_v1 }
 0x1e3   : > { %v1685_v0 = vunpack.i.h.bf16 %v1683_v11  ;;  %v1684_v62 = vunpack.i.l.bf16 %v1683_v11  ;;  %870 = vmatprep.subr.mxu0 %v2028_v12 }
 0x1e4   : > { %v1678_v63 = vpop.permute.xlu0 %1677  ;;  %1406 = vmatpush1.bf16.msra.mxu1 %v1999_v14 }
 0x1e5   : > { %v1680_v10 = vunpack.i.h.bf16 %v1678_v63  ;;  %v1679_v13 = vunpack.i.l.bf16 %v1678_v63  ;;  %941 = vmatprep.subr.mxu1 %v2051_v28  ;;  %v1010_v12 = vsel %vm2160_vm7, %v1684_v62, %v1685_v0 }
 0x1e6   : > { %871 = vmatpush1.msra.mxu0 %v622_v9  ;;  %v1693_v52 = vpop.permute.xlu1 %1692 }
 0x1e7   : > { %1408 = vmatprep.subr.bf16.mxu0 %v1963_v54  ;;  %1335 = vmatmul.mubr.msk.f32.vlgmr.msra.gmra.mrb[0].mxu0 %vm707_vm11, %v1833_v35  ;;  %v1004_v15 = vsel %vm2159_vm13, %v1679_v13, %v1680_v10  ;;  %v1695_v19 = vunpack.i.h.bf16 %v1693_v52  ;;  %v1694_v6 = vunpack.i.l.bf16 %v1693_v52 }
 0x1e8   : > { %v1688_v16 = vpop.permute.xlu0 %1687  ;;  %942 = vmatpush1.msra.mxu1 %v1938_v4  ;;  %1410 = vmatpush1.bf16.msra.mxu0 %v1948_v21  ;;  %v1423_v18 = vpack.c.bf16 %v1010_v12, %v1004_v15 }
 0x1e9   : > { %v1690_v61 = vunpack.i.h.bf16 %v1688_v16  ;;  %v1689_v32 = vunpack.i.l.bf16 %v1688_v16  ;;  %1412 = vmatprep.subr.bf16.mxu0 %v1983_v42  ;;  %1336 = vmatmul.mubr.msk.f32.vlgmr.msra.gmra.mrb[0].mxu1 %vm707_vm11, %v1833_v35  ;;  %v1024_v42 = vsel %vm441_vm10, %v1694_v6, %v1695_v19  ;;  %vm2163_vm10 = vmmov %vm2155_vm15 }
 0x1ea   : > { %1424 = vmatprep.subr.bf16.mxu1 %v1423_v18  ;;  %v1703_v54 = vpop.permute.xlu1 %1702  ;;  %1118 = vmatprep.mubr.f32.mxu0 %v1720_v3 }
 0x1eb   : > { %1426 = vmatpush1.bf16.msra.mxu1 %v1958_v44  ;;  %v1016_v24 = vsel %vm2161_vm9, %v1689_v32, %v1690_v61  ;;  %1189 = vmatprep.mubr.f32.mxu1 %v1720_v3  ;;  %v1705_v35 = vunpack.i.h.bf16 %v1703_v54  ;;  %v1704_v30 = vunpack.i.l.bf16 %v1703_v54 }
 0x1ec   : > { %v1698_v21 = vpop.permute.xlu0 %1697  ;;  %1414 = vmatpush1.bf16.msra.mxu0 %v1968_v7  ;;  %v1427_v26 = vpack.c.bf16 %v1720_v3, %v1016_v24 }
 0x1ed   : > { %v1700_v27 = vunpack.i.h.bf16 %v1698_v21  ;;  %v1699_v47 = vunpack.i.l.bf16 %v1698_v21  ;;  %1416 = vmatprep.subr.bf16.mxu0 %v2010_v37  ;;  %v1036_v34 = vsel %vm2163_vm10, %v1704_v30, %v1705_v35 }
 0x1ee   : > { %1428 = vmatprep.subr.bf16.mxu1 %v1427_v26  ;;  %v1045_v7 = vpop.permute.xlu1 %1044 }
 0x1ef   : > { %1430 = vmatpush1.bf16.msra.mxu1 %v1978_v29  ;;  %v1030_v44 = vsel %vm2162_vm4, %v1699_v47, %v1700_v27 }
 0x1f0   : > { %v1708_v5 = vpop.permute.xlu0 %1707  ;;  %1418 = vmatpush1.bf16.msra.mxu0 %v1990_v56  ;;  %v1431_v17 = vpack.c.bf16 %v1030_v44, %v1024_v42 }
 0x1f1   : > { %v1710_v31 = vunpack.i.h.bf16 %v1708_v5  ;;  %v1709_v3 = vunpack.i.l.bf16 %v1708_v5  ;;  %1420 = vmatprep.subr.bf16.mxu0 %v2039_v20 }
 0x1f2   : > { %1432 = vmatprep.subr.bf16.mxu1 %v1431_v17  ;;  %v1051_v56 = vpop.permute.xlu1 %1050 }
 0x1f3   : > { %1434 = vmatpush1.bf16.msra.mxu1 %v2005_v25  ;;  %v1042_v37 = vsel %vm2164_vm14, %v1709_v3, %v1710_v31 }
 0x1f4   : > { %v1047_v29 = vpop.permute.xlu0 %1046  ;;  %1422 = vmatpush1.bf16.msra.mxu0 %v1999_v14  ;;  %v1435_v36 = vpack.c.bf16 %v1042_v37, %v1036_v34 }
 0x1f5   : > { %1070 = vmatprep.subr.mxu0 %v2051_v28  ;;  %v1048_v20 = vsel %vm490_vm6, %v1045_v7, %v1047_v29 }
 0x1f6   : > { %1436 = vmatprep.subr.bf16.mxu1 %v1435_v36 }
 0x1f7   : > { %1438 = vmatpush1.bf16.msra.mxu1 %v2024_v2 }
 0x1f8   : > { %1071 = vmatpush1.msra.mxu0 %v1938_v4  ;;  %1141 = vmatprep.subr.mxu1 %v1048_v20 }
 0x1f9   : > { %1337 = vmatmul.mubr.msk.f32.vlgmr.msra.gmra.mrb[0].mxu0 %vm707_vm11, %v1051_v56 }
 0x1fb   : > { %1142 = vmatpush1.msra.mxu1 %v2045_v60 }
 0x1fc   : > { %1338 = vmatmul.mubr.msk.f32.vlgmr.msra.gmra.mrb[0].mxu1 %vm707_vm11, %v1051_v56 }
 0x205   : > { %v1203_v25 = vpop.permute.xlu0 %1202 }
 0x2cc   : > { %v1120_v14 = vpop.f32.mrb[0].mxu0 }
 0x2cd   : > { %v1205_v28 = vadd.f32 %v1203_v25, %v1120_v14  ;;  %v1122_v2 = vpop.f32.mrb[1].mxu0 }
 0x2ce   : > { %v1206_v39 = vadd.f32 %v1203_v25, %v1122_v2 }
 0x2cf   : > { %v1209_v4 = vsel %vm1818_vm1, %v1205_v28, 0.0  ;;  %v1191_v8 = vpop.f32.mrb[0].mxu1  ;;  %vm1235_vm1 = vcmask 15368  }
 0x2d0   : > { %v1219_v40 = vmul.f32 %v1209_v4, %v1209_v4  ;;  %1229 = vst [vmem:[%s258_s20] sm:$0xff] %v1209_v4  ;;  %v1210_v60 = vsel %vm1826_vm2, %v1206_v39, 0.0  ;;  %v1207_v41 = vadd.f32 %v1203_v25, %v1191_v8  ;;  %v1193_v43 = vpop.f32.mrb[1].mxu1 }
 0x2d1   : > { %v1213_v45 = vadd.f32 %v1210_v60, %v1209_v4  ;;  %v1220_v46 = vmul.f32 %v1210_v60, %v1210_v60  ;;  %1230 = vst [vmem:[%s258_s20 + $0x8] sm:$0xff] %v1210_v60  ;;  %v1208_v48 = vadd.f32 %v1203_v25, %v1193_v43 }
 0x2d2   : > { %v1211_v49 = vsel %vm1814_vm0, %v1207_v41, 0.0  ;;  %vm1233_vm0 = vcmask 7168  }
 0x2d3   : > { %v1221_v50 = vmul.f32 %v1211_v49, %v1211_v49  ;;  %1231 = vst [vmem:[%s258_s20 + $0x10] sm:$0xff] %v1211_v49  ;;  %v1212_v23 = vsel %vm1837_vm3, %v1208_v48, 0.0  ;;  %v1214_v51 = vadd.f32 %v1213_v45, %v1211_v49  ;;  %v1223_v53 = vadd.f32 %v1220_v46, %v1219_v40 }
 0x2d4   : > { %1232 = vst [vmem:[%s258_s20 + $0x18] sm:$0xff] %v1212_v23  ;;  %v1222_v33 = vmul.f32 %v1212_v23, %v1212_v23 }
 0x2d5   : > { %v1215_v55 = vadd.f32 %v1214_v51, %v1212_v23  ;;  %v1224_v57 = vadd.f32 %v1223_v53, %v1221_v50 }
 0x2d7   : > { %1216 = vadd.xlane.f32.xlu1 %v1215_v55  ;;  %v1225_v58 = vadd.f32 %v1224_v57, %v1222_v33 }
 0x2d9   : > { %1226 = vadd.xlane.f32.xlu0 %v1225_v58 }
 0x364   : > { %v1217_v22 = vpop.xlane.xlu1 %1216 }
 0x365   : > { %1234 = vst.msk [vmem:[%s262_s26] sm:$0xff] %vm1233_vm0, %v1217_v22 }
 0x366   : > { %v1227_v38 = vpop.xlane.xlu0 %1226 }
 0x367   : > { %1236 = vst.msk [vmem:[%s262_s26] sm:$0xff] %vm1235_vm1, %v1227_v38 }
 0x368 PF: > { %s17_s21 = sadd.s32 1, %s1717_s21  }
 0x369   : > { %p14_p4 = scmp.ge.s32.totalorder %s17_s21, 4  }
 0x36b   :  { %16 = sbr.rel (!%p14_p4) target bundleno = 1 (0x1), region = 82 }

// kernel: res_conv3d.3
= control target key start
LH: loop header
LB: loop body
LE: loop exit
PB: predicated region body
PF: predicated region fallthrough
CT: control target
= control target key end

     0   :  { %s1760_s21 = smov 0   ;;  %s2091_s0 = inlined_call_operand.vmem [shape: f32[2,8,512], index: 0, kind: input, shape index: {}]   ;;  %s2092_s1 = inlined_call_operand.vmem [shape: f32[8,1], index: 1, kind: input, shape index: {}]   ;;  %s2093_s2 = inlined_call_operand.vmem [shape: f32[8,1], index: 2, kind: input, shape index: {}]   ;;  %s2094_s3 = inlined_call_operand.vmem [shape: f32[8,216], index: 3, kind: input, shape index: {}]   ;;  %s2095_s4 = inlined_call_operand.vmem [shape: f32[8,1], index: 4, kind: input, shape index: {}]   ;;  %s2096_s5 = inlined_call_operand.vmem [shape: f32[2,8,512], index: 5, kind: input, shape index: {}]   ;;  %s2097_s6 = inlined_call_operand.vmem [shape: f32[2,8,512], index: 6, kind: output, shape index: {}]  }
   0x1 LB: > { %s1297_s22 = sadd.s32 4294967295, %s1693_s21   ;;  %p1301_p0 = scmp.ge.s32.totalorder %s1693_s21, 1  ;;  %s1693_s21 = sphi %s1760_s21, %s16_s21  }
   0x2   : > { %p222_p1 = scmp.lt.s32.totalorder %s1693_s21, 3 }
   0x4   : > { %p223_p2 = pnand %p1301_p0, %p222_p1 }
   0x5   : > { %v272_v0 = vld [vmem:[%s2092_s1] sm:$0xff] (!%p223_p2)  ;;  %v1695_v1 = vmov (!%p223_p2), 0   ;;  %v1696_v3 = vmov (!%p223_p2), 0.0   ;;  %p257_p3 = scmp.lt.s32.totalorder (!%p223_p2), %s1297_s22, 1  ;;  %v278_v4 = vlaneseq (!%p223_p2)  ;;  %s1697_s7 = smov (!%p223_p2), 113   ;;  %vm377_vm4 = vcmask (!%p223_p2), 261120  }
   0x6   : > { %226 = sbr.rel (%p223_p2) target bundleno = 729 (0x2d9), region = 44  ;;  %1461 = vset.pattern.permute.xlu0 (!%p223_p2), %v1695_v1  ;;  %v273_v2 = vld [vmem:[%s2093_s2] sm:$0xff] (!%p223_p2)  ;;  %372 = vst [vmem:[#allocation2 + $0x18] sm:$0xff] (!%p223_p2), %v1696_v3  ;;  %370 = vst [vmem:[#allocation2 + $0x8] sm:$0xff] (!%p223_p2), %v1696_v3  ;;  %783 = vmatprep.mubr.f32.mxu0 (!%p223_p2), %v1696_v3  ;;  %s1698_s8 = smov (!%p223_p2), 65   ;;  %vm393_vm5 = vcmask (!%p223_p2), 924672  }
   0x7   : > { %337 = vperm.xlu0 (!%p223_p2), %1461, %v272_v0   ;;  %371 = vst [vmem:[#allocation2 + $0x10] sm:$0xff] (!%p223_p2), %v1696_v3  ;;  %373 = vst [vmem:[#allocation2 + $0x20] sm:$0xff] (!%p223_p2), %v1696_v3  ;;  %854 = vmatprep.mubr.f32.mxu1 (!%p223_p2), %v1696_v3  ;;  %v279_v5 = vand.u32 (!%p223_p2), 127, %v278_v4  ;;  %s1699_s9 = smov (!%p223_p2), 33   ;;  %s1700_s10 = smov (!%p223_p2), 81   ;;  %vm383_vm6 = vcmask (!%p223_p2), 1048072  }
   0x8   : > { %374 = vst [vmem:[#allocation2 + $0x28] sm:$0xff] (!%p223_p2), %v1696_v3  ;;  %375 = vst [vmem:[#allocation2 + $0x30] sm:$0xff] (!%p223_p2), %v1696_v3  ;;  %vm385_vm7 = vcmask (!%p223_p2), 531456   ;;  %vm391_vm8 = vcmask (!%p223_p2), 1048456   ;;  %vm399_vm9 = vcmask (!%p223_p2), 1047816   ;;  %vm401_vm10 = vcmask (!%p223_p2), 269312  }
   0x9   : > { %v280_v6 = vadd.s32 (!%p223_p2), 128, %v279_v5  ;;  %v287_v12 = vand.u32 (!%p223_p2), 15, %v279_v5  ;;  %v281_v13 = vadd.s32 (!%p223_p2), 256, %v279_v5  ;;  %v282_v23 = vadd.s32 (!%p223_p2), 384, %v279_v5  ;;  %378 = vst.msk [vmem:[#allocation2 + $0x40] sm:$0xff] (!%p223_p2), %vm377_vm4, %v1696_v3  ;;  %s1701_s11 = smov (!%p223_p2), 126  }
   0xa   : > { %vm407_vm11 = vcmask (!%p223_p2), 1048200   ;;  %vm409_vm12 = vcmask (!%p223_p2), 662528   ;;  %s2098_s12 = smov (!%p223_p2), 127   ;;  %s1703_s13 = smov (!%p223_p2), 31   ;;  %v412_v51 = vld [vmem:[%s2094_s3 + $0x8] sm:$0xff] (!%p223_p2)  ;;  %v1853_v52 = vld [vmem:[%s2094_s3] sm:$0xff] (!%p223_p2) }
   0xb   : > { %346 = vperm.xlu0 (!%p223_p2), %1461, %v273_v2   ;;  %v294_v11 = vand.u32 (!%p223_p2), 15, %v280_v6  ;;  %vm331_vm1 = vcmp.lt.s32.totalorder (!%p223_p2), %v287_v12, 8  ;;  %v301_v22 = vand.u32 (!%p223_p2), 15, %v281_v13  ;;  %v308_v31 = vand.u32 (!%p223_p2), 15, %v282_v23  ;;  %s1704_s14 = smov (!%p223_p2), 63   ;;  %s1705_s15 = smov (!%p223_p2), 30  }
   0xc   : > { %s1706_s16 = smov (!%p223_p2), 112   ;;  %s1707_s17 = smov (!%p223_p2), 46   ;;  %vm2106_vm13 = vcmask (!%p223_p2), 1031168   ;;  %v413_v60 = vld [vmem:[%s2095_s4] sm:$0xff] (!%p223_p2)  ;;  %vm464_vm14 = vcmask (!%p223_p2), 252928   ;;  %vm539_vm15 = vcmask (!%p223_p2), 515072  }
   0xd   : > { %s2122_s22 = smov (!%p257_p3, %s1297_s22), 1  ;;  %vm332_vm0 = vcmp.lt.s32.totalorder %v294_v11, 8  ;;  %vm333_vm2 = vcmp.lt.s32.totalorder %v301_v22, 8  ;;  %vm334_vm3 = vcmp.lt.s32.totalorder %v308_v31, 8  ;;  %s1708_s18 = smov 111  }
   0xe   : > { %s1782_s27 = sshll.u32 %s2122_s22, 5  ;;  %s1709_s19 = smov 78  }
   0xf   : > { %s261_s30 = scalar_lea.vmem %s2091_s0, %s1782_s27  ;;  %s2100_s20 = smov 16  }
  0x10   : > { %v275_v8 = vld [vmem:[%s261_s30 + $0x8] sm:$0xff]  ;;  %v276_v9 = vld [vmem:[%s261_s30 + $0x10] sm:$0xff]  ;;  %v274_v10 = vld [vmem:[%s261_s30] sm:$0xff]  ;;  %s1711_s22 = smov 32   ;;  %s1712_s23 = smov 48  }
  0x11   : > { %v277_v17 = vld [vmem:[%s261_s30 + $0x18] sm:$0xff]  ;;  %s1713_s24 = smov 64   ;;  %s1714_s25 = smov 110   ;;  %v1027_v54 = vld [vmem:[#allocation2 + $0x40] sm:$0xff] }
  0x12   : > { %s1715_s26 = smov 80   ;;  %s2101_s28 = smov 96   ;;  %v1667_v55 = vpack.i.bf16 %v1027_v54, %v1696_v3 }
  0x13   : > { %s1717_s29 = smov 79   ;;  %s2099_s30 = smov 14  }
  0x86   : > { %v338_v7 = vpop.permute.xlu0 %337 }
  0x87   : > { %v341_v14 = vmul.f32 %v338_v7, %v275_v8  ;;  %v342_v15 = vmul.f32 %v338_v7, %v276_v9  ;;  %v340_v16 = vmul.f32 %v338_v7, %v274_v10  ;;  %v343_v24 = vmul.f32 %v338_v7, %v277_v17 }
  0x8a   : > { %v347_v18 = vpop.permute.xlu0 %346 }
  0x8b   : > { %v350_v19 = vadd.f32 %v347_v18, %v341_v14  ;;  %v349_v20 = vadd.f32 %v347_v18, %v340_v16  ;;  %v351_v21 = vadd.f32 %v347_v18, %v342_v15  ;;  %v352_v30 = vadd.f32 %v347_v18, %v343_v24 }
  0x8d   : > { %v354_v25 = vmax.f32 %v350_v19, 0.0  ;;  %v353_v26 = vmax.f32 %v349_v20, 0.0  ;;  %v355_v29 = vmax.f32 %v351_v21, 0.0  ;;  %v356_v33 = vmax.f32 %v352_v30, 0.0 }
  0x8f   : > { %v366_v27 = vsel %vm332_vm0, %v354_v25, 0.0  ;;  %v365_v28 = vsel %vm331_vm1, %v353_v26, 0.0  ;;  %v367_v32 = vsel %vm333_vm2, %v355_v29, 0.0  ;;  %v368_v34 = vsel %vm334_vm3, %v356_v33, 0.0 }
  0x90   : > { %388 = vrot.lane.b32.xlu0 %v366_v27, %s1697_s7  ;;  %380 = vrot.lane.b32.xlu1 %v365_v28, %s1698_s8  ;;  %s1719_s7 = smov 62   ;;  %s1720_s8 = smov 95   ;;  %vm2104_vm0 = vcmask 908288   ;;  %vm512_vm1 = vcmask 523264   ;;  %vm442_vm2 = vcmask 916480   ;;  %vm426_vm3 = vcmask 654336  }
  0x94   : > { %396 = vrot.lane.b32.xlu1 %v367_v32, %s1699_s9  ;;  %s1721_s9 = smov 94  }
  0x98   : > { %404 = vrot.lane.b32.xlu1 %v368_v34, %s1700_s10  ;;  %s1722_s10 = smov 15  }
 0x102   : > { %v389_v35 = vpop.permute.xlu0 %388  ;;  %v381_v36 = vpop.permute.xlu1 %380 }
 0x103   : > { %394 = vst.msk [vmem:[#allocation2 + $0x18] sm:$0xff] %vm393_vm5, %v389_v35  ;;  %vm457_vm5 = vcmask 646144  }
 0x104   : > { %384 = vst.msk [vmem:[#allocation2 + $0x8] sm:$0xff] %vm383_vm6, %v381_v36  ;;  %vm492_vm6 = vcmask 244736  }
 0x105   : > { %386 = vst.msk [vmem:[#allocation2 + $0x10] sm:$0xff] %vm385_vm7, %v381_v36  ;;  %vm2102_vm7 = vcmask 130048  }
 0x106   : > { %392 = vst.msk [vmem:[#allocation2 + $0x10] sm:$0xff] %vm391_vm8, %v389_v35  ;;  %v397_v37 = vpop.permute.xlu1 %396  ;;  %vm593_vm8 = vcmask 392192  }
 0x107   : > { %400 = vst.msk [vmem:[#allocation2 + $0x20] sm:$0xff] %vm399_vm9, %v397_v37  ;;  %vm2103_vm9 = vcmask 785408  }
 0x108   : > { %402 = vst.msk [vmem:[#allocation2 + $0x28] sm:$0xff] %vm401_vm10, %v397_v37  ;;  %vm566_vm10 = vcmask 506880  }
 0x10a   : > { %v405_v39 = vpop.permute.xlu1 %404  ;;  %v1792_v40 = vld [vmem:[#allocation2 + $0x18] sm:$0xff] }
 0x10b   : > { %v1790_v38 = vld [vmem:[#allocation2 + $0x8] sm:$0xff]  ;;  %408 = vst.msk [vmem:[#allocation2 + $0x28] sm:$0xff] %vm407_vm11, %v405_v39  ;;  %640 = vrot.lane.b32.xlu1 %v1792_v40, %s1701_s11  ;;  %vm2105_vm11 = vcmask 900096  }
 0x10c   : > { %410 = vst.msk [vmem:[#allocation2 + $0x30] sm:$0xff] %vm409_vm12, %v405_v39  ;;  %v1798_v41 = vpack.i.bf16 %v1790_v38, %v1696_v3  ;;  %vm485_vm12 = vcmask 637952  }
 0x10d   : > { %v1800_v42 = vld [vmem:[#allocation2 + $0x10] sm:$0xff] }
 0x10e   : > { %v418_v43 = vld [vmem:[#allocation2 + $0x20] sm:$0xff]  ;;  %v1477_v45 = vpack.i.bf16 %v1792_v40, %v1800_v42  ;;  %v1492_v50 = vpack.i.bf16 %v1800_v42, %v1790_v38 }
 0x10f   : > { %1468 = vrot.lane.b32.xlu1 %v1798_v41, %s2098_s12  ;;  %v1462_v44 = vpack.i.bf16 %v418_v43, %v1792_v40 }
 0x111   : > { %1463 = vrot.lane.b32.xlu0 %v1462_v44, %s2098_s12  ;;  %s1723_s12 = smov 47  }
 0x112   : > { %v1808_v46 = vld [vmem:[#allocation2 + $0x28] sm:$0xff] }
 0x113   : > { %v1810_v47 = vld [vmem:[#allocation2 + $0x30] sm:$0xff]  ;;  %1478 = vrot.lane.b32.xlu1 %v1477_v45, %s1703_s13  ;;  %v1497_v49 = vpack.i.bf16 %v1808_v46, %v418_v43 }
 0x114   : > { %v1487_v48 = vpack.i.bf16 %v1810_v47, %v1808_v46  ;;  %v1657_v53 = vpack.i.bf16 %v1696_v3, %v1810_v47 }
 0x115   : > { %642 = vrot.lane.b32.xlu0 %v418_v43, %s1701_s11 }
 0x117   : > { %1488 = vrot.lane.b32.xlu1 %v1487_v48, %s1704_s14 }
 0x119   : > { %704 = vrot.lane.b32.xlu0 %v1810_v47, %s1705_s15 }
 0x11b   : > { %1498 = vrot.lane.b32.xlu1 %v1497_v49, %s1706_s16 }
 0x11d   : > { %633 = vrot.lane.b32.xlu0 %v1790_v38, %s1707_s17 }
 0x11f   : > { %1508 = vrot.lane.b32.xlu1 %v1497_v49, %s1708_s18 }
 0x121   : > { %646 = vrot.lane.b32.xlu0 %v418_v43, %s1709_s19 }
 0x123   : > { %1518 = vrot.lane.b32.xlu1 %v1477_v45, %s2100_s20 }
 0x125   : > { %1473 = vrot.lane.b32.xlu0 %v1477_v45, %s1711_s22 }
 0x127   : > { %1528 = vrot.lane.b32.xlu1 %v1487_v48, %s1712_s23 }
 0x129   : > { %1483 = vrot.lane.b32.xlu0 %v1487_v48, %s1713_s24 }
 0x12b   : > { %1538 = vrot.lane.b32.xlu1 %v1497_v49, %s1714_s25 }
 0x12d   : > { %1493 = vrot.lane.b32.xlu0 %v1492_v50, %s1715_s26 }
 0x12f   : > { %1548 = vrot.lane.b32.xlu1 %v1497_v49, %s2101_s28  ;;  %s1724_s28 = smov 56  }
 0x131   : > { %1503 = vrot.lane.b32.xlu0 %v1492_v50, %s1717_s29 }
 0x133   : > { %1558 = vrot.lane.b32.xlu1 %v1477_v45, %s2099_s30 }
 0x135   : > { %1513 = vrot.lane.b32.xlu0 %v1477_v45, %s1705_s15 }
 0x137   : > { %1568 = vrot.lane.b32.xlu1 %v1487_v48, %s1707_s17 }
 0x139   : > { %1523 = vrot.lane.b32.xlu0 %v1487_v48, %s1719_s7 }
 0x13b   : > { %1578 = vrot.lane.b32.xlu1 %v1497_v49, %s1720_s8 }
 0x13d   : > { %1533 = vrot.lane.b32.xlu0 %v1492_v50, %s1709_s19 }
 0x13f   : > { %1588 = vrot.lane.b32.xlu1 %v1497_v49, %s1721_s9 }
 0x141   : > { %1543 = vrot.lane.b32.xlu0 %v1492_v50, %s1713_s24 }
 0x143   : > { %1593 = vrot.lane.b32.xlu1 %v1487_v48, %s1711_s22 }
 0x145   : > { %1553 = vrot.lane.b32.xlu0 %v1477_v45, %s1722_s10 }
 0x147   : > { %1603 = vrot.lane.b32.xlu1 %v1492_v50, %s1712_s23 }
 0x149   : > { %1563 = vrot.lane.b32.xlu0 %v1487_v48, %s1723_s12 }
 0x14b   : > { %1613 = vrot.lane.b32.xlu1 %v1492_v50, %s1723_s12 }
 0x14d   : > { %1573 = vrot.lane.b32.xlu0 %v1492_v50, %s1704_s14 }
 0x14f   : > { %712 = vrot.lane.b32.xlu1 %v412_v51, %s1724_s28 }
 0x151   : > { %1583 = vrot.lane.b32.xlu0 %v1492_v50, %s1719_s7 }
 0x153   : > { %702 = vrot.lane.b32.xlu1 %v1808_v46, %s1705_s15  ;;  %s2109_s15 = smov 16  }
 0x155   : > { %1598 = vrot.lane.b32.xlu0 %v1487_v48, %s1703_s13  ;;  %s2108_s13 = smov 96  }
 0x157   : > { %635 = vrot.lane.b32.xlu1 %v1800_v42, %s1707_s17  ;;  %s2110_s17 = smov 127  }
 0x159   : > { %1608 = vrot.lane.b32.xlu0 %v1497_v49, %s1715_s26 }
 0x15b   : > { %648 = vrot.lane.b32.xlu1 %v1808_v46, %s1709_s19  ;;  %s2111_s19 = smov 14  }
 0x15d   : > { %1618 = vrot.lane.b32.xlu0 %v1497_v49, %s1717_s29 }
 0x15f   : > { %1628 = vrot.lane.b32.xlu1 %v1798_v41, %s1706_s16 }
 0x161   : > { %710 = vrot.lane.b32.xlu0 %v1853_v52, %s1724_s28 }
 0x163   : > { %1638 = vrot.lane.b32.xlu1 %v1798_v41, %s1714_s25 }
 0x165   : > { %1623 = vrot.lane.b32.xlu0 %v1798_v41, %s1701_s11 }
 0x167   : > { %1648 = vrot.lane.b32.xlu1 %v1798_v41, %s1720_s8 }
 0x169   : > { %1633 = vrot.lane.b32.xlu0 %v1798_v41, %s1708_s18 }
 0x16b   : > { %1658 = vrot.lane.b32.xlu1 %v1657_v53, %s1722_s10 }
 0x16d   : > { %1643 = vrot.lane.b32.xlu0 %v1798_v41, %s2108_s13 }
 0x16f   : > { %629 = vrot.lane.b32.xlu1 %v1790_v38, %s1721_s9 }
 0x171   : > { %1653 = vrot.lane.b32.xlu0 %v1657_v53, %s2109_s15 }
 0x173   : > { %1668 = vrot.lane.b32.xlu1 %v1667_v55, %s2110_s17 }
 0x175   : > { %627 = vrot.lane.b32.xlu0 %v1696_v3, %s1721_s9 }
 0x177   : > { %1678 = vrot.lane.b32.xlu1 %v1667_v55, %s1706_s16 }
 0x179   : > { %1663 = vrot.lane.b32.xlu0 %v1657_v53, %s2111_s19 }
 0x17b   : > { %1053 = vrot.lane.b32.xlu1 %v1696_v3, %s1714_s25 }
 0x17d   : > { %1673 = vrot.lane.b32.xlu0 %v1667_v55, %s1701_s11  ;;  %v641_v56 = vpop.permute.xlu1 %640 }
 0x17f   : > { %1059 = vrot.lane.b32.xlu1 %v412_v51, %s1706_s16 }
 0x181   : > { %1683 = vrot.lane.b32.xlu0 %v1667_v55, %s1708_s18  ;;  %v1883_v57 = vpop.permute.xlu1 %1468  ;;  %s266_s18 = scalar_lea.vmem %s2096_s5, %s1782_s27 }
 0x183   : > { %v1885_v58 = vpop.permute.xlu0 %1463 }
 0x185   : > { %1055 = vrot.lane.b32.xlu0 %v1027_v54, %s1714_s25  ;;  %v1479_v59 = vpop.permute.xlu1 %1478  ;;  %s271_s25 = scalar_lea.vmem %s2097_s6, %s1782_s27 }
 0x186   : > { %v1481_v7 = vunpack.i.h.bf16 %v1479_v59  ;;  %v1480_v8 = vunpack.i.l.bf16 %v1479_v59 }
 0x187   : > { %v643_v61 = vpop.permute.xlu0 %642 }
 0x188   : > { %v1892_v62 = vsel %vm2106_vm13, %v641_v56, %v643_v61  ;;  %v465_v18 = vsel %vm464_vm14, %v1480_v8, %v1481_v7  ;;  %vm553_vm13 = vcmask 777216  }
 0x189   : > { %1211 = vperm.xlu0 %1461, %v413_v60   ;;  %v1489_v63 = vpop.permute.xlu1 %1488 }
 0x18a   : > { %v1491_v15 = vunpack.i.h.bf16 %v1489_v63  ;;  %v1490_v16 = vunpack.i.l.bf16 %v1489_v63 }
 0x18b   : > { %v1894_v0 = vpop.permute.xlu0 %704 }
 0x18c   : > { %v664_v28 = vsel %vm539_vm15, %v1490_v16, %v1491_v15 }
 0x18d   : > { %v1499_v1 = vpop.permute.xlu1 %1498 }
 0x18e   : > { %v1501_v19 = vunpack.i.h.bf16 %v1499_v1  ;;  %v1500_v20 = vunpack.i.l.bf16 %v1499_v1 }
 0x18f   : > { %v1896_v2 = vpop.permute.xlu0 %633 }
 0x190   : > { %v443_v31 = vsel %vm442_vm2, %v1500_v20, %v1501_v19 }
 0x191   : > { %v1509_v4 = vpop.permute.xlu1 %1508 }
 0x192   : > { %v1511_v12 = vunpack.i.h.bf16 %v1509_v4  ;;  %v1510_v13 = vunpack.i.l.bf16 %v1509_v4 }
 0x193   : > { %v1898_v5 = vpop.permute.xlu0 %646 }
 0x194   : > { %v472_v26 = vsel %vm2104_vm0, %v1510_v13, %v1511_v12  ;;  %vm637_vm0 = vcmask 375808  }
 0x195   : > { %v1900_v6 = vpop.permute.xlu1 %1518  ;;  %v1915_v32 = vpack.c.bf16 %v472_v26, %v443_v31 }
 0x196   : > { %v1521_v41 = vunpack.i.h.bf16 %v1900_v6  ;;  %v1520_v42 = vunpack.i.l.bf16 %v1900_v6 }
 0x197   : > { %v1474_v9 = vpop.permute.xlu0 %1473 }
 0x198   : > { %v1476_v10 = vunpack.i.h.bf16 %v1474_v9  ;;  %v1475_v11 = vunpack.i.l.bf16 %v1474_v9  ;;  %v520_v56 = vsel %vm2102_vm7, %v1520_v42, %v1521_v41  ;;  %vm546_vm7 = vcmask 121856  }
 0x199   : > { %v1902_v14 = vpop.permute.xlu1 %1528 }
 0x19a   : > { %v434_v17 = vsel %vm377_vm4, %v1475_v11, %v1476_v10  ;;  %v1531_v53 = vunpack.i.h.bf16 %v1902_v14  ;;  %v1530_v54 = vunpack.i.l.bf16 %v1902_v14 }
 0x19b   : > { %v1484_v21 = vpop.permute.xlu0 %1483  ;;  %v1906_v22 = vpack.c.bf16 %v465_v18, %v434_v17 }
 0x19c   : > { %v1486_v23 = vunpack.i.h.bf16 %v1484_v21  ;;  %v1485_v24 = vunpack.i.l.bf16 %v1484_v21  ;;  %v676_v9 = vsel %vm593_vm8, %v1530_v54, %v1531_v53 }
 0x19d   : > { %v1539_v25 = vpop.permute.xlu1 %1538  ;;  %1320 = vmatprep.subr.bf16.mxu0 %v1906_v22 }
 0x19e   : > { %v658_v27 = vsel %vm512_vm1, %v1485_v24, %v1486_v23  ;;  %v1541_v59 = vunpack.i.h.bf16 %v1539_v25  ;;  %v1540_v60 = vunpack.i.l.bf16 %v1539_v25 }
 0x19f   : > { %v1494_v29 = vpop.permute.xlu0 %1493  ;;  %v1912_v30 = vpack.c.bf16 %v664_v28, %v658_v27 }
 0x1a0   : > { %v1496_v34 = vunpack.i.h.bf16 %v1494_v29  ;;  %v1495_v35 = vunpack.i.l.bf16 %v1494_v29  ;;  %v500_v12 = vsel %vm2105_vm11, %v1540_v60, %v1541_v59  ;;  %vm580_vm11 = vcmask 769024  }
 0x1a1   : > { %v1549_v33 = vpop.permute.xlu1 %1548  ;;  %1336 = vmatprep.subr.bf16.mxu1 %v1912_v30  ;;  %v1465_v59 = vunpack.i.l.bf16 %v1885_v58 }
 0x1a2   : > { %1338 = vmatpush1.bf16.msra.mxu1 %v1915_v32  ;;  %v427_v43 = vsel %vm426_vm3, %v1495_v35, %v1496_v34  ;;  %v1551_v49 = vunpack.i.h.bf16 %v1549_v33  ;;  %v1550_v50 = vunpack.i.l.bf16 %v1549_v33 }
 0x1a3   : > { %v1504_v36 = vpop.permute.xlu0 %1503 }
 0x1a4   : > { %v1506_v37 = vunpack.i.h.bf16 %v1504_v36  ;;  %v1505_v38 = vunpack.i.l.bf16 %v1504_v36  ;;  %v527_v7 = vsel %vm2103_vm9, %v1550_v50, %v1551_v49  ;;  %vm2107_vm9 = vcmask 113664  }
 0x1a5   : > { %v1919_v39 = vpop.permute.xlu1 %1558  ;;  %v1943_v13 = vpack.c.bf16 %v527_v7, %v500_v12 }
 0x1a6   : > { %v458_v44 = vsel %vm457_vm5, %v1505_v38, %v1506_v37  ;;  %v1561_v21 = vunpack.i.h.bf16 %v1919_v39  ;;  %v1560_v23 = vunpack.i.l.bf16 %v1919_v39 }
 0x1a7   : > { %v1514_v45 = vpop.permute.xlu0 %1513  ;;  %v1925_v46 = vpack.c.bf16 %v458_v44, %v427_v43 }
 0x1a8   : > { %v1516_v47 = vunpack.i.h.bf16 %v1514_v45  ;;  %v1515_v48 = vunpack.i.l.bf16 %v1514_v45  ;;  %v574_v38 = vsel %vm2107_vm9, %v1560_v23, %v1561_v21  ;;  %vm450_vm9 = vcmask 1039360  }
 0x1a9   : > { %v1927_v51 = vpop.permute.xlu1 %1568  ;;  %1322 = vmatpush1.bf16.msra.mxu0 %v1925_v46 }
 0x1aa   : > { %v493_v55 = vsel %vm492_vm6, %v1515_v48, %v1516_v47  ;;  %v1571_v35 = vunpack.i.h.bf16 %v1927_v51  ;;  %v1570_v36 = vunpack.i.l.bf16 %v1927_v51 }
 0x1ab   : > { %v1524_v61 = vpop.permute.xlu0 %1523  ;;  %v1934_v63 = vpack.c.bf16 %v520_v56, %v493_v55  ;;  %v1466_v56 = vunpack.i.h.bf16 %v1885_v58 }
 0x1ac   : > { %v1526_v1 = vunpack.i.h.bf16 %v1524_v61  ;;  %v1525_v4 = vunpack.i.l.bf16 %v1524_v61  ;;  %v688_v50 = vsel %vm637_vm0, %v1570_v36, %v1571_v35  ;;  %v1470_v36 = vunpack.i.l.bf16 %v1883_v57 }
 0x1ad   : > { %v1579_v6 = vpop.permute.xlu1 %1578  ;;  %1324 = vmatprep.subr.bf16.mxu0 %v1934_v63  ;;  %v619_v58 = vsel %vm450_vm9, %v1465_v59, %v1466_v56 }
 0x1ae   : > { %v670_v8 = vsel %vm566_vm10, %v1525_v4, %v1526_v1  ;;  %v1581_v39 = vunpack.i.h.bf16 %v1579_v6  ;;  %v1580_v41 = vunpack.i.l.bf16 %v1579_v6 }
 0x1af   : > { %v1534_v10 = vpop.permute.xlu0 %1533  ;;  %v1940_v11 = vpack.c.bf16 %v676_v9, %v670_v8 }
 0x1b0   : > { %v1536_v15 = vunpack.i.h.bf16 %v1534_v10  ;;  %v1535_v16 = vunpack.i.l.bf16 %v1534_v10  ;;  %v554_v54 = vsel %vm553_vm13, %v1580_v41, %v1581_v39 }
 0x1b1   : > { %v1589_v14 = vpop.permute.xlu1 %1588  ;;  %1340 = vmatprep.subr.bf16.mxu1 %v1940_v11 }
 0x1b2   : > { %1342 = vmatpush1.bf16.msra.mxu1 %v1943_v13  ;;  %v486_v24 = vsel %vm485_vm12, %v1535_v16, %v1536_v15  ;;  %v1591_v31 = vunpack.i.h.bf16 %v1589_v14  ;;  %v1590_v33 = vunpack.i.l.bf16 %v1589_v14 }
 0x1b3   : > { %v1544_v17 = vpop.permute.xlu0 %1543 }
 0x1b4   : > { %v1546_v18 = vunpack.i.h.bf16 %v1544_v17  ;;  %v1545_v19 = vunpack.i.l.bf16 %v1544_v17  ;;  %v581_v48 = vsel %vm580_vm11, %v1590_v33, %v1591_v31 }
 0x1b5   : > { %v1947_v20 = vpop.permute.xlu1 %1593  ;;  %v1969_v55 = vpack.c.bf16 %v581_v48, %v554_v54 }
 0x1b6   : > { %v513_v25 = vsel %vm512_vm1, %v1545_v19, %v1546_v18  ;;  %vm612_vm1 = vcmask 384000   ;;  %v1596_v10 = vunpack.i.h.bf16 %v1947_v20  ;;  %v1595_v12 = vunpack.i.l.bf16 %v1947_v20 }
 0x1b7   : > { %v1554_v26 = vpop.permute.xlu0 %1553  ;;  %v1953_v27 = vpack.c.bf16 %v513_v25, %v486_v24  ;;  %v1983_v25 = vpack.c.bf16 %v619_v58, %v1792_v40  ;;  %v1471_v40 = vunpack.i.h.bf16 %v1883_v57 }
 0x1b8   : > { %v1556_v28 = vunpack.i.h.bf16 %v1554_v26  ;;  %v1555_v29 = vunpack.i.l.bf16 %v1554_v26 }
 0x1b9   : > { %v1604_v34 = vpop.permute.xlu1 %1603  ;;  %1326 = vmatpush1.bf16.msra.mxu0 %v1953_v27 }
 0x1ba   : > { %v547_v37 = vsel %vm546_vm7, %v1555_v29, %v1556_v28  ;;  %v1606_v15 = vunpack.i.h.bf16 %v1604_v34  ;;  %v1605_v16 = vunpack.i.l.bf16 %v1604_v34  ;;  %v694_v29 = vsel %vm377_vm4, %v1595_v12, %v1596_v10 }
 0x1bb   : > { %v1564_v42 = vpop.permute.xlu0 %1563  ;;  %v1960_v43 = vpack.c.bf16 %v574_v38, %v547_v37  ;;  %vm714_vm4 = vcmask 457728  }
 0x1bc   : > { %v1566_v44 = vunpack.i.h.bf16 %v1564_v42  ;;  %v1565_v45 = vunpack.i.l.bf16 %v1564_v42  ;;  %v594_v28 = vsel %vm593_vm8, %v1605_v16, %v1606_v15 }
 0x1bd   : > { %v1614_v47 = vpop.permute.xlu1 %1613  ;;  %1328 = vmatprep.subr.bf16.mxu0 %v1960_v43 }
 0x1be   : > { %v682_v49 = vsel %vm612_vm1, %v1565_v45, %v1566_v44  ;;  %v1616_v6 = vunpack.i.h.bf16 %v1614_v47  ;;  %v1615_v7 = vunpack.i.l.bf16 %v1614_v47  ;;  %v451_v47 = vsel %vm450_vm9, %v1470_v36, %v1471_v40 }
 0x1bf   : > { %v1574_v51 = vpop.permute.xlu0 %1573  ;;  %v1966_v53 = vpack.c.bf16 %v688_v50, %v682_v49  ;;  %v1353_v54 = vpack.c.bf16 %v451_v47, %v1696_v3 }
 0x1c0   : > { %v1576_v61 = vunpack.i.h.bf16 %v1574_v51  ;;  %v1575_v1 = vunpack.i.l.bf16 %v1574_v51  ;;  %v613_v26 = vsel %vm612_vm1, %v1615_v7, %v1616_v6 }
 0x1c1   : > { %v713_v60 = vpop.permute.xlu1 %712  ;;  %1344 = vmatprep.subr.bf16.mxu1 %v1966_v53  ;;  %v1991_v34 = vpack.c.bf16 %v613_v26, %v594_v28 }
 0x1c2   : > { %1346 = vmatpush1.bf16.msra.mxu1 %v1969_v55  ;;  %v540_v17 = vsel %vm539_vm15, %v1575_v1, %v1576_v61  ;;  %vm2112_vm15 = vcmask 1031168  }
 0x1c3   : > { %v1584_v4 = vpop.permute.xlu0 %1583 }
 0x1c4   : > { %v1586_v8 = vunpack.i.h.bf16 %v1584_v4  ;;  %v1585_v9 = vunpack.i.l.bf16 %v1584_v4 }
 0x1c5   : > { %v703_v14 = vpop.permute.xlu1 %702 }
 0x1c6   : > { %v567_v18 = vsel %vm566_vm10, %v1585_v9, %v1586_v8  ;;  %v2016_v59 = vsel %vm492_vm6, %v703_v14, %v1894_v0  ;;  %vm2117_vm6 = vcmask 113664  }
 0x1c7   : > { %v1599_v19 = vpop.permute.xlu0 %1598  ;;  %v1980_v21 = vpack.c.bf16 %v567_v18, %v540_v17 }
 0x1c8   : > { %v1601_v23 = vunpack.i.h.bf16 %v1599_v19  ;;  %v1600_v24 = vunpack.i.l.bf16 %v1599_v19 }
 0x1c9   : > { %v636_v20 = vpop.permute.xlu1 %635  ;;  %1330 = vmatpush1.bf16.msra.mxu0 %v1980_v21 }
 0x1ca   : > { %1332 = vmatprep.subr.bf16.mxu0 %v1983_v25  ;;  %v700_v31 = vsel %vm464_vm14, %v1600_v24, %v1601_v23  ;;  %v2002_v45 = vsel %vm637_vm0, %v1896_v2, %v636_v20  ;;  %vm716_vm14 = vcmask 588800   ;;  %vm2113_vm0 = vcmask 900096  }
 0x1cb   : > { %v1609_v33 = vpop.permute.xlu0 %1608  ;;  %v1993_v35 = vpack.c.bf16 %v700_v31, %v694_v29 }
 0x1cc   : > { %v1611_v38 = vunpack.i.h.bf16 %v1609_v33  ;;  %v1610_v39 = vunpack.i.l.bf16 %v1609_v33 }
 0x1cd   : > { %v649_v37 = vpop.permute.xlu1 %648  ;;  %1334 = vmatpush1.bf16.msra.mxu0 %v1991_v34  ;;  %1348 = vmatprep.subr.bf16.mxu1 %v1993_v35 }
 0x1ce   : > { %735 = vmatprep.subr.mxu0 %v1892_v62  ;;  %v600_v57 = vsel %vm426_vm3, %v1610_v39, %v1611_v38  ;;  %v2023_v6 = vsel %vm485_vm12, %v1898_v5, %v649_v37  ;;  %vm2114_vm3 = vcmask 908288  }
 0x1cf   : > { %v1619_v41 = vpop.permute.xlu0 %1618  ;;  %vm2119_vm8 = vmmov %vm2114_vm3 }
 0x1d0   : > { %v1621_v42 = vunpack.i.h.bf16 %v1619_v41  ;;  %v1620_v44 = vunpack.i.l.bf16 %v1619_v41 }
 0x1d1   : > { %v1629_v48 = vpop.permute.xlu1 %1628  ;;  %736 = vmatpush1.msra.mxu0 %v2002_v45 }
 0x1d2   : > { %1352 = vmatprep.subr.bf16.mxu0 %v1925_v46  ;;  %v625_v49 = vsel %vm457_vm5, %v1620_v44, %v1621_v42  ;;  %v1631_v46 = vunpack.i.h.bf16 %v1629_v48  ;;  %v1630_v61 = vunpack.i.l.bf16 %v1629_v48  ;;  %vm2115_vm5 = vcmask 785408  }
 0x1d3   : > { %v711_v50 = vpop.permute.xlu0 %710  ;;  %v2009_v51 = vpack.c.bf16 %v625_v49, %v600_v57 }
 0x1d4   : > { %v715_v2 = vsel %vm714_vm4, %v711_v50, %v713_v60  ;;  %v506_v0 = vsel %vm442_vm2, %v1630_v61, %v1631_v46 }
 0x1d5   : > { %v1639_v56 = vpop.permute.xlu1 %1638  ;;  %1308 = vmatmul.mubr.msk.f32.vlgmr.msra.gmra.mrb[0].mxu0 %vm716_vm14, %v715_v2  ;;  %1350 = vmatpush1.bf16.msra.mxu1 %v2009_v51 }
 0x1d6   : > { %1354 = vmatpush1.bf16.msra.mxu0 %v1353_v54  ;;  %806 = vmatprep.subr.mxu1 %v2016_v59  ;;  %v1641_v8 = vunpack.i.h.bf16 %v1639_v56  ;;  %v1640_v9 = vunpack.i.l.bf16 %v1639_v56 }
 0x1d7   : > { %1356 = vmatprep.subr.bf16.mxu0 %v1953_v27  ;;  %v1624_v1 = vpop.permute.xlu0 %1623  ;;  %927 = vmatprep.mubr.f32.mxu0 %v1696_v3 }
 0x1d8   : > { %v1626_v60 = vunpack.i.h.bf16 %v1624_v1  ;;  %v1625_v4 = vunpack.i.l.bf16 %v1624_v1  ;;  %v560_v15 = vsel %vm2113_vm0, %v1640_v9, %v1641_v8  ;;  %v1219_v9 = vld [vmem:[%s266_s18 + $0x8] sm:$0xff] }
 0x1d9   : > { %v1649_v7 = vpop.permute.xlu1 %1648  ;;  %807 = vmatpush1.msra.mxu1 %v2023_v6 }
 0x1da   : > { %v479_v10 = vsel %vm2112_vm15, %v1625_v4, %v1626_v60  ;;  %1309 = vmatmul.mubr.msk.f32.vlgmr.msra.gmra.mrb[0].mxu1 %vm716_vm14, %v715_v2  ;;  %1368 = vmatprep.subr.bf16.mxu1 %v1915_v32  ;;  %v1651_v16 = vunpack.i.h.bf16 %v1649_v7  ;;  %v1650_v17 = vunpack.i.l.bf16 %v1649_v7 }
 0x1db   : > { %v1357_v27 = vpack.c.bf16 %v506_v0, %v479_v10  ;;  %v1634_v12 = vpop.permute.xlu0 %1633  ;;  %1370 = vmatpush1.bf16.msra.mxu1 %v1906_v22  ;;  %998 = vmatprep.mubr.f32.mxu1 %v1696_v3 }
 0x1dc   : > { %v1636_v5 = vunpack.i.h.bf16 %v1634_v12  ;;  %v1635_v14 = vunpack.i.l.bf16 %v1634_v12  ;;  %1372 = vmatprep.subr.bf16.mxu1 %v1943_v13  ;;  %v606_v20 = vsel %vm553_vm13, %v1650_v17, %v1651_v16  ;;  %vm2116_vm13 = vcmask 130048  }
 0x1dd   : > { %v1659_v58 = vpop.permute.xlu1 %1658  ;;  %1358 = vmatpush1.bf16.msra.mxu0 %v1357_v27 }
 0x1de   : > { %v533_v18 = vsel %vm2114_vm3, %v1635_v14, %v1636_v5  ;;  %1360 = vmatprep.subr.bf16.mxu0 %v1980_v21  ;;  %v1661_v36 = vunpack.i.h.bf16 %v1659_v58  ;;  %v1660_v37 = vunpack.i.l.bf16 %v1659_v58  ;;  %v1221_v14 = vld [vmem:[%s266_s18 + $0x18] sm:$0xff] }
 0x1df   : > { %v1361_v19 = vpack.c.bf16 %v560_v15, %v533_v18  ;;  %v1644_v23 = vpop.permute.xlu0 %1643  ;;  %1374 = vmatpush1.bf16.msra.mxu1 %v1934_v63 }
 0x1e0   : > { %v1646_v24 = vunpack.i.h.bf16 %v1644_v23  ;;  %v1645_v26 = vunpack.i.l.bf16 %v1644_v23  ;;  %1376 = vmatprep.subr.bf16.mxu1 %v1969_v55  ;;  %v1019_v42 = vsel %vm546_vm7, %v1660_v37, %v1661_v36  ;;  %vm2118_vm7 = vmmov %vm2112_vm15 }
 0x1e1   : > { %1362 = vmatpush1.bf16.msra.mxu0 %v1361_v19  ;;  %v630_v31 = vpop.permute.xlu1 %629 }
 0x1e2   : > { %v587_v28 = vsel %vm2115_vm5, %v1645_v26, %v1646_v24  ;;  %1364 = vmatprep.subr.bf16.mxu0 %v1991_v34 }
 0x1e3   : > { %v1365_v29 = vpack.c.bf16 %v606_v20, %v587_v28  ;;  %v1654_v33 = vpop.permute.xlu0 %1653  ;;  %1378 = vmatpush1.bf16.msra.mxu1 %v1960_v43 }
 0x1e4   : > { %v1656_v21 = vunpack.i.h.bf16 %v1654_v33  ;;  %v1655_v40 = vunpack.i.l.bf16 %v1654_v33  ;;  %1380 = vmatprep.subr.bf16.mxu1 %v2009_v51 }
 0x1e5   : > { %1366 = vmatpush1.bf16.msra.mxu0 %v1365_v29  ;;  %v1669_v34 = vpop.permute.xlu1 %1668 }
 0x1e6   : > { %879 = vmatprep.subr.mxu0 %v2002_v45  ;;  %v1013_v39 = vsel %vm2116_vm13, %v1655_v40, %v1656_v21  ;;  %v1671_v47 = vunpack.i.h.bf16 %v1669_v34  ;;  %v1670_v48 = vunpack.i.l.bf16 %v1669_v34 }
 0x1e7   : > { %v628_v38 = vpop.permute.xlu0 %627  ;;  %1382 = vmatpush1.bf16.msra.mxu1 %v1983_v25  ;;  %v1399_v44 = vpack.c.bf16 %v1019_v42, %v1013_v39 }
 0x1e8   : > { %v631_v41 = vsel %vm580_vm11, %v628_v38, %v630_v31  ;;  %950 = vmatprep.subr.mxu1 %v2023_v6 }
 0x1e9   : > { %880 = vmatpush1.msra.mxu0 %v631_v41 }
 0x1ea   : > { %1384 = vmatprep.subr.bf16.mxu0 %v1915_v32  ;;  %1310 = vmatmul.mubr.msk.f32.vlgmr.msra.gmra.mrb[0].mxu0 %vm716_vm14, %v1853_v52  ;;  %v1679_v32 = vpop.permute.xlu1 %1678 }
 0x1eb   : > { %v1664_v45 = vpop.permute.xlu0 %1663  ;;  %951 = vmatpush1.msra.mxu1 %v1892_v62  ;;  %1386 = vmatpush1.bf16.msra.mxu0 %v1906_v22  ;;  %v1680_v46 = vunpack.i.l.bf16 %v1679_v32 }
 0x1ec   : > { %v1666_v57 = vunpack.i.h.bf16 %v1664_v45  ;;  %v1665_v49 = vunpack.i.l.bf16 %v1664_v45  ;;  %1388 = vmatprep.subr.bf16.mxu0 %v1943_v13  ;;  %1400 = vmatprep.subr.bf16.mxu1 %v1399_v44  ;;  %v1033_v13 = vsel %vm450_vm9, %v1670_v48, %v1671_v47  ;;  %vm2120_vm9 = vmmov %vm2113_vm0 }
 0x1ed   : > { %1311 = vmatmul.mubr.msk.f32.vlgmr.msra.gmra.mrb[0].mxu1 %vm716_vm14, %v1853_v52  ;;  %1127 = vmatprep.mubr.f32.mxu0 %v1696_v3  ;;  %v1681_v52 = vunpack.i.h.bf16 %v1679_v32 }
 0x1ee   : > { %1402 = vmatpush1.bf16.msra.mxu1 %v1912_v30  ;;  %v1025_v50 = vsel %vm2117_vm6, %v1665_v49, %v1666_v57  ;;  %1198 = vmatprep.mubr.f32.mxu1 %v1696_v3 }
 0x1ef   : > { %v1674_v22 = vpop.permute.xlu0 %1673  ;;  %1390 = vmatpush1.bf16.msra.mxu0 %v1934_v63  ;;  %v1403_v54 = vpack.c.bf16 %v1696_v3, %v1025_v50  ;;  %v1054_v63 = vpop.permute.xlu1 %1053  ;;  %v1045_v4 = vsel %vm442_vm2, %v1680_v46, %v1681_v52 }
 0x1f0   : > { %v1676_v2 = vunpack.i.h.bf16 %v1674_v22  ;;  %v1675_v56 = vunpack.i.l.bf16 %v1674_v22  ;;  %1392 = vmatprep.subr.bf16.mxu0 %v1969_v55 }
 0x1f1   : > { %1404 = vmatprep.subr.bf16.mxu1 %v1403_v54 }
 0x1f2   : > { %1406 = vmatpush1.bf16.msra.mxu1 %v1940_v11  ;;  %v1039_v30 = vsel %vm2118_vm7, %v1675_v56, %v1676_v2 }
 0x1f3   : > { %v1684_v61 = vpop.permute.xlu0 %1683  ;;  %1394 = vmatpush1.bf16.msra.mxu0 %v1960_v43  ;;  %v1407_v1 = vpack.c.bf16 %v1039_v30, %v1033_v13  ;;  %v1060_v0 = vpop.permute.xlu1 %1059 }
 0x1f4   : > { %v1686_v60 = vunpack.i.h.bf16 %v1684_v61  ;;  %v1685_v3 = vunpack.i.l.bf16 %v1684_v61  ;;  %1396 = vmatprep.subr.bf16.mxu0 %v2009_v51  ;;  %v1218_v51 = vld [vmem:[%s266_s18] sm:$0xff] }
 0x1f5   : > { %1408 = vmatprep.subr.bf16.mxu1 %v1407_v1 }
 0x1f6   : > { %1410 = vmatpush1.bf16.msra.mxu1 %v1966_v53  ;;  %v1051_v55 = vsel %vm2119_vm8, %v1685_v3, %v1686_v60 }
 0x1f7   : > { %1398 = vmatpush1.bf16.msra.mxu0 %v1983_v25  ;;  %v1411_v11 = vpack.c.bf16 %v1051_v55, %v1045_v4  ;;  %v1056_v7 = vpop.permute.xlu0 %1055 }
 0x1f8   : > { %1079 = vmatprep.subr.mxu0 %v2023_v6  ;;  %v1057_v43 = vsel %vm2120_vm9, %v1054_v63, %v1056_v7 }
 0x1f9   : > { %1412 = vmatprep.subr.bf16.mxu1 %v1411_v11 }
 0x1fa   : > { %1414 = vmatpush1.bf16.msra.mxu1 %v1993_v35 }
 0x1fb   : > { %1080 = vmatpush1.msra.mxu0 %v1892_v62  ;;  %1150 = vmatprep.subr.mxu1 %v1057_v43 }
 0x1fc   : > { %1312 = vmatmul.mubr.msk.f32.vlgmr.msra.gmra.mrb[0].mxu0 %vm716_vm14, %v1060_v0 }
 0x1fe   : > { %1151 = vmatpush1.msra.mxu1 %v2016_v59  ;;  %v1220_v59 = vld [vmem:[%s266_s18 + $0x10] sm:$0xff] }
 0x1ff   : > { %1313 = vmatmul.mubr.msk.f32.vlgmr.msra.gmra.mrb[0].mxu1 %vm716_vm14, %v1060_v0 }
 0x208   : > { %v1212_v53 = vpop.permute.xlu0 %1211 }
 0x2cf   : > { %v1129_v25 = vpop.f32.mrb[0].mxu0 }
 0x2d0   : > { %v1214_v6 = vadd.f32 %v1212_v53, %v1129_v25  ;;  %v1131_v8 = vpop.f32.mrb[1].mxu0 }
 0x2d1   : > { %v1215_v62 = vadd.f32 %v1212_v53, %v1131_v8 }
 0x2d2   : > { %v1222_v35 = vadd.f32 %v1218_v51, %v1214_v6  ;;  %v1200_v10 = vpop.f32.mrb[0].mxu1 }
 0x2d3   : > { %v1223_v27 = vadd.f32 %v1219_v9, %v1215_v62  ;;  %v1216_v12 = vadd.f32 %v1212_v53, %v1200_v10  ;;  %v1202_v5 = vpop.f32.mrb[1].mxu1 }
 0x2d4   : > { %1226 = vst [vmem:[%s271_s25] sm:$0xff] %v1222_v35  ;;  %v1217_v58 = vadd.f32 %v1212_v53, %v1202_v5 }
 0x2d5   : > { %1227 = vst [vmem:[%s271_s25 + $0x8] sm:$0xff] %v1223_v27  ;;  %v1224_v15 = vadd.f32 %v1220_v59, %v1216_v12 }
 0x2d6   : > { %v1225_v16 = vadd.f32 %v1221_v14, %v1217_v58 }
 0x2d7   : > { %1228 = vst [vmem:[%s271_s25 + $0x10] sm:$0xff] %v1224_v15 }
 0x2d8   : > { %1229 = vst [vmem:[%s271_s25 + $0x18] sm:$0xff] %v1225_v16 }
 0x2d9 PF: > { %s16_s21 = sadd.s32 1, %s1693_s21  }
 0x2da   : > { %p13_p4 = scmp.ge.s32.totalorder %s16_s21, 4  }
 0x2dc   :  { %15 = sbr.rel (!%p13_p4) target bundleno = 1 (0x1), region = 77 }

</bundles_post_ra>
